<compile_context>
chip_gen: v5e
topology: v5e:2x2
jax: 0.10.0
libtpu: 0.0.40
codegen_flags: <defaults>
</compile_context>

<pallas_src>
import jax
import jax.numpy as jnp
from jax.experimental import pallas as pl
from jax.experimental.pallas import tpu as pltpu

EMBED_DIM = 32
HIDDEN_DIM = 32
CLASS_DIM = 3
FC_DIM = 512
VOCAB = 50
B = 2
T = 8

N_STREAMS = 8                    # (sentence, batch, direction): rows 0-3 fwd, 4-7 bwd
N_GROUPS = 4                     # weight groups: s1-fwd, s2-fwd, s1-bwd, s2-bwd
GD = N_GROUPS * EMBED_DIM        # 128: block-diagonal contraction width
G4H = 4 * HIDDEN_DIM             # 128: i,f,g,o gate width

# constant-slab row offsets (all multiples of 8)
_OFF_WIH = 0
_OFF_WHH = GD
_OFF_BIAS = 2 * GD
_OFF_GMASK = 2 * GD + N_STREAMS
CONST_ROWS = 2 * GD + 2 * N_STREAMS          # 272


# ---------------------------------------------------------------------------
# One fused kernel: bi-LSTM (8 streams, unrolled time loop) -> batched
# self-interaction attention (4 groups) -> 3-layer dense head.
# ---------------------------------------------------------------------------
def sela_kernel(x_ref,        # (T, 8, 32)  f32  per-stream embeddings (bwd rows time-flipped)
                mask_ref,     # (T, 8, 1)   f32  per-(step, stream) activity mask
                const_ref,    # (272, 128)  f32  [wih | whh | bias | gmask] (g-cols pre-scaled x2)
                w1_ref,       # (192, 512)  bf16 merged head layer 1
                headb_ref,    # (3, 512)    f32  [b1 ; b2 ; b3(padded)]
                w2_hbm_ref,   # (512, 512)  bf16 in HBM (pl.ANY)
                w3_ref,       # (512, 3)    bf16
                out_ref,      # (B, 3)      f32
                w2_vmem,      # scratch (512, 512) bf16
                w2_sem):      # scratch DMA sem (1,)
    H = HIDDEN_DIM

    # ---- overlap the 512 KiB head-weight DMA with the whole recurrence
    w2_copy = pltpu.make_async_copy(w2_hbm_ref, w2_vmem, w2_sem.at[0])
    w2_copy.start()

    wih = const_ref[_OFF_WIH:_OFF_WIH + GD, :]                      # (128, 128)
    whh = const_ref[_OFF_WHH:_OFF_WHH + GD, :]                      # (128, 128)
    bias = const_ref[_OFF_BIAS:_OFF_BIAS + N_STREAMS, :]            # (8, 128)
    gmask = const_ref[_OFF_GMASK:_OFF_GMASK + N_STREAMS, :]         # (8, 128)

    # ---- hoisted input projection: block-diag placement + one (64,128)@(128,128) pass
    x2d = x_ref[...].reshape(T * N_STREAMS, EMBED_DIM)              # (64, 32)
    x_blk = (jnp.concatenate([x2d] * N_GROUPS, axis=1)
             * jnp.concatenate([gmask] * T, axis=0))                # (64, 128)
    preact = (jnp.dot(x_blk, wih, preferred_element_type=jnp.float32)
              + jnp.concatenate([bias] * T, axis=0))                # (64, 128)

    h = jnp.zeros((N_STREAMS, H), jnp.float32)
    c = jnp.zeros((N_STREAMS, H), jnp.float32)
    h_blk = jnp.zeros((N_STREAMS, GD), jnp.float32)
    outs = []

    # ---- recurrent part: statically unrolled, one MXU pass per step
    for s in range(T):
        gates = (preact[s * N_STREAMS:(s + 1) * N_STREAMS, :]
                 + jnp.dot(h_blk, whh, preferred_element_type=jnp.float32))  # (8, 128)
        sig = jax.nn.sigmoid(gates)                        # single full-width EUP pass
        i_g = sig[:, 0:H]
        f_g = sig[:, H:2 * H]
        g_g = 2.0 * sig[:, 2 * H:3 * H] - 1.0              # = tanh(raw) (g cols pre-scaled x2)
        o_g = sig[:, 3 * H:4 * H]
        c_new = f_g * c + i_g * g_g
        h_new = o_g * jnp.tanh(c_new)                      # small (8,32) tanh only

        m = mask_ref[s]                                    # (8, 1)
        h = h + m * (h_new - h)                            # freeze / keep-zero past length
        c = c + m * (c_new - c)
        out_t = m * h                                      # packed-sequence zero padding
        outs.append(out_t)
        # re-place h into this stream's 32-lane block for the next hh matmul
        h_blk = jnp.concatenate([h] * N_GROUPS, axis=1) * gmask       # (8, 128)

    # ---- batched self-interaction attention over the 4 (sentence, batch) groups
    # build (T, 4, 2H): fwd outputs at real time t, bwd outputs at real time t
    co_t = jnp.stack(
        [jnp.concatenate([outs[t][0:4, :], outs[T - 1 - t][4:8, :]], axis=1)
         for t in range(T)], axis=0)                                  # (T, 4, 64)
    co = pltpu.einshape("tgd->gtd", co_t)                             # (4, T, 64)

    emb = jnp.max(co, axis=1)                                         # (4, 2H)
    m_int = jnp.einsum('gtd,gsd->gts', co, co,
                       preferred_element_type=jnp.float32)            # (4, T, T)
    alpha = jax.nn.softmax(m_int, axis=1)          # softmax over dim=1 of (B,T,T)
    beta = jax.nn.softmax(m_int, axis=2)           # softmax over dim=2 of (B,T,T)
    beta_avg = jnp.mean(beta, axis=1, keepdims=True)                  # (4, 1, T)
    gamma = jnp.sum(alpha * beta_avg, axis=2, keepdims=True)          # (4, T, 1)
    ws = jnp.sum(co * gamma, axis=1)                                  # (4, 2H)

    # groups 0,1 = sentence 1 (batch 0,1); groups 2,3 = sentence 2
    feat = jnp.concatenate([jnp.abs(emb[0:2] - emb[2:4]),
                            ws[0:2], ws[2:4]], axis=1)                # (B, 192)

    # ---- dense head (purely linear, as in the reference), bf16 MXU, f32 accumulate
    h1 = jnp.dot(feat.astype(jnp.bfloat16), w1_ref[...],
                 preferred_element_type=jnp.float32) + headb_ref[0:1, :]
    w2_copy.wait()                                                    # DMA hidden behind LSTM
    h2 = jnp.dot(h1.astype(jnp.bfloat16), w2_vmem[...],
                 preferred_element_type=jnp.float32) + headb_ref[1:2, :]
    out_ref[...] = (jnp.dot(h2.astype(jnp.bfloat16), w3_ref[...],
                            preferred_element_type=jnp.float32)
                    + headb_ref[2:3, 0:CLASS_DIM])


# ---------------------------------------------------------------------------
# One-time, input-independent operand packing (run once, not per call).
# ---------------------------------------------------------------------------
def pack_constants(params):
    H = HIDDEN_DIM
    p1, p2 = params["lstm1"], params["lstm2"]
    # stacked LSTM weights, group order (s1-fwd, s2-fwd, s1-bwd, s2-bwd)
    wih = jnp.concatenate([p1["wih_f"], p2["wih_f"], p1["wih_b"], p2["wih_b"]], axis=0)  # (128,128)
    whh = jnp.concatenate([p1["whh_f"], p2["whh_f"], p1["whh_b"], p2["whh_b"]], axis=0)  # (128,128)
    b_groups = jnp.concatenate([p1["b_f"], p2["b_f"], p1["b_b"], p2["b_b"]], axis=0)     # (4,128)
    b_stack = jnp.repeat(b_groups, 2, axis=0)                                            # (8,128)

    # pre-scale the g-gate columns by 2 so tanh(z) = 2*sigmoid(2z)-1 in the kernel
    def scale_g(w):
        return jnp.concatenate([w[:, :2 * H], 2.0 * w[:, 2 * H:3 * H], w[:, 3 * H:]], axis=1)

    wih, whh, b_stack = scale_g(wih), scale_g(whh), scale_g(b_stack)

    groups = jnp.array([0, 0, 1, 1, 2, 2, 3, 3], jnp.int32)
    gmask = jnp.repeat(jax.nn.one_hot(groups, N_GROUPS, dtype=jnp.float32),
                       HIDDEN_DIM, axis=1)                                               # (8,128)

    const_f32 = jnp.concatenate([wih, whh, b_stack, gmask], axis=0)                      # (272,128)

    d = params["dense"]
    w1 = jnp.concatenate([d["w1a"], d["w1b"], d["w1c"]], axis=0).astype(jnp.bfloat16)    # (192,512)
    w2 = d["w2"].astype(jnp.bfloat16)                                                    # (512,512)
    w3 = d["w3"].astype(jnp.bfloat16)                                                    # (512,3)
    b3_pad = jnp.zeros((1, FC_DIM), jnp.float32).at[:, :CLASS_DIM].set(d["b3"])
    head_b = jnp.concatenate([d["b1"], d["b2"], b3_pad], axis=0)                         # (3,512)

    return {"const": const_f32, "w1": w1, "w2": w2, "w3": w3, "head_b": head_b}


# ---------------------------------------------------------------------------
# Per-call wrapper: embedding lookup + per-call stream/mask build, then ONE pallas_call.
# ---------------------------------------------------------------------------
def sela_forward(inputs, embedding_matrix, packed):
    t1 = inputs[0]
    t2 = inputs[2]
    len1 = jnp.sum((t1 != 0).astype(jnp.int32), axis=1)              # (B,)
    len2 = jnp.sum((t2 != 0).astype(jnp.int32), axis=1)
    # TODO(synk): token->vector embedding gather stays in XLA (data-dependent gather).
    ctx1 = jnp.take(embedding_matrix, t1, axis=0)                    # (B, T, E)
    ctx2 = jnp.take(embedding_matrix, t2, axis=0)

    # streams: cols 0-3 = fwd (s1b0, s1b1, s2b0, s2b1), cols 4-7 = same order, bwd (time-flipped)
    e1 = jnp.transpose(ctx1, (1, 0, 2))                              # (T, B, E)
    e2 = jnp.transpose(ctx2, (1, 0, 2))
    x_fwd = jnp.concatenate([e1, e2], axis=1)                        # (T, 4, E)
    x_streams = jnp.concatenate([x_fwd, jnp.flip(x_fwd, axis=0)], axis=1)   # (T, 8, E)

    # per-(step, stream) activity mask; bwd rows see reversed time indices.
    row_lens = jnp.concatenate([len1, len2, len1, len2])             # (8,)
    steps = jnp.arange(T)[:, None]
    t_real = jnp.concatenate([jnp.tile(steps, (1, 4)),
                              jnp.tile(T - 1 - steps, (1, 4))], axis=1)      # (T, 8)
    mask = (t_real < row_lens[None, :]).astype(jnp.float32)[:, :, None]      # (T, 8, 1)

    vmem = pl.BlockSpec(memory_space=pltpu.MemorySpace.VMEM)
    return pl.pallas_call(
        sela_kernel,
        out_shape=jax.ShapeDtypeStruct((B, CLASS_DIM), jnp.float32),
        in_specs=[vmem, vmem, vmem, vmem, vmem,
                  pl.BlockSpec(memory_space=pl.ANY),   # w2 stays in HBM, async-copied in kernel
                  vmem],
        out_specs=vmem,
        scratch_shapes=[pltpu.VMEM((FC_DIM, FC_DIM), jnp.bfloat16),
                        pltpu.SemaphoreType.DMA((1,))],
    )(x_streams, mask, packed["const"], packed["w1"], packed["head_b"],
      packed["w2"], packed["w3"])


def init_params(key):
    ks = iter(jax.random.split(key, 24))

    def u(shape, scale=0.2):
        return jax.random.uniform(next(ks), shape, jnp.float32, -scale, scale)

    def lstm():
        # (in, 4H) layout with gate order i,f,g,o (if loading real torch weights,
        # transpose the (4H, in) tensors first).
        return {"wih_f": u((EMBED_DIM, G4H)), "whh_f": u((HIDDEN_DIM, G4H)), "b_f": u((1, G4H)),
                "wih_b": u((EMBED_DIM, G4H)), "whh_b": u((HIDDEN_DIM, G4H)), "b_b": u((1, G4H))}

    D2 = 2 * HIDDEN_DIM
    dense = {"w1a": u((D2, FC_DIM)), "w1b": u((D2, FC_DIM)), "w1c": u((D2, FC_DIM)),
             "b1": u((1, FC_DIM)),
             "w2": u((FC_DIM, FC_DIM)), "b2": u((1, FC_DIM)),
             "w3": u((FC_DIM, CLASS_DIM)), "b3": u((1, CLASS_DIM))}
    return {"lstm1": lstm(), "lstm2": lstm(), "dense": dense}


if __name__ == "__main__":
    key = jax.random.PRNGKey(0)
    k_emb, k_p, k_t1, k_t2 = jax.random.split(key, 4)

    embedding_matrix = jax.random.normal(k_emb, (VOCAB, EMBED_DIM), jnp.float32)
    params = init_params(k_p)
    packed = pack_constants(params)          # one-time packing, outside the per-call path

    # token indices with trailing zero padding (0 = pad id)
    t1 = jax.random.randint(k_t1, (B, T), 1, VOCAB)
    t2 = jax.random.randint(k_t2, (B, T), 1, VOCAB)
    lens1 = jnp.array([T, 5], jnp.int32)
    lens2 = jnp.array([6, T], jnp.int32)
    pos = jnp.arange(T)[None, :]
    t1 = jnp.where(pos < lens1[:, None], t1, 0).astype(jnp.int32)
    t2 = jnp.where(pos < lens2[:, None], t2, 0).astype(jnp.int32)

    fwd = jax.jit(lambda a, b: sela_forward([a, None, b], embedding_matrix, packed))
    out = jax.block_until_ready(fwd(t1, t2))

    assert out.shape == (B, CLASS_DIM)
    assert bool(jnp.all(jnp.isfinite(out)))
    print("KERNEL_OK")
</pallas_src>

<mosaic_0001>
module attributes {stable_mosaic.version = 11 : i64} {
  func.func @sela_kernel(%arg0: memref<8x8x32xf32, #tpu.memory_space<vmem>>, %arg1: memref<8x8x1xf32, #tpu.memory_space<vmem>>, %arg2: memref<272x128xf32, #tpu.memory_space<vmem>>, %arg3: memref<192x512xbf16, #tpu.memory_space<vmem>>, %arg4: memref<3x512xf32, #tpu.memory_space<vmem>>, %arg5: memref<512x512xbf16, #tpu.memory_space<any>>, %arg6: memref<512x3xbf16, #tpu.memory_space<vmem>>, %arg7: memref<2x3xf32, #tpu.memory_space<vmem>>, %arg8: memref<512x512xbf16, #tpu.memory_space<vmem>>, %arg9: memref<1x!tpu.dma_semaphore, #tpu.memory_space<semaphore_mem>>) attributes {dimension_semantics = [], scalar_prefetch = 0 : i64, scratch_operands = 2 : i64, tpu.core_type = #tpu.core_type<tc>} {
    %c0_i32 = arith.constant 0 : i32
    %0 = tpu.memref_slice %arg9[%c0_i32] : memref<1x!tpu.dma_semaphore, #tpu.memory_space<semaphore_mem>> -> memref<1x!tpu.dma_semaphore, #tpu.memory_space<semaphore_mem>>
    %1 = tpu.memref_squeeze %0 : memref<1x!tpu.dma_semaphore, #tpu.memory_space<semaphore_mem>> -> memref<!tpu.dma_semaphore, #tpu.memory_space<semaphore_mem>>
    tpu.enqueue_dma source(%arg5 : memref<512x512xbf16, #tpu.memory_space<any>>) target(%arg8 : memref<512x512xbf16, #tpu.memory_space<vmem>>) target_semaphore(%1 : memref<!tpu.dma_semaphore, #tpu.memory_space<semaphore_mem>>)
    %c0 = arith.constant 0 : index
    %c0_0 = arith.constant 0 : index
    %2 = vector.load %arg2[%c0, %c0_0] : memref<272x128xf32, #tpu.memory_space<vmem>>, vector<128x128xf32>
    %c128 = arith.constant 128 : index
    %c0_1 = arith.constant 0 : index
    %3 = vector.load %arg2[%c128, %c0_1] : memref<272x128xf32, #tpu.memory_space<vmem>>, vector<128x128xf32>
    %c256 = arith.constant 256 : index
    %c0_2 = arith.constant 0 : index
    %4 = vector.load %arg2[%c256, %c0_2] : memref<272x128xf32, #tpu.memory_space<vmem>>, vector<8x128xf32>
    %c264 = arith.constant 264 : index
    %c0_3 = arith.constant 0 : index
    %5 = vector.load %arg2[%c264, %c0_3] : memref<272x128xf32, #tpu.memory_space<vmem>>, vector<8x128xf32>
    %c0_4 = arith.constant 0 : index
    %c0_5 = arith.constant 0 : index
    %c0_6 = arith.constant 0 : index
    %6 = vector.load %arg0[%c0_4, %c0_5, %c0_6] : memref<8x8x32xf32, #tpu.memory_space<vmem>>, vector<8x8x32xf32>
    %7 = vector.shape_cast %6 : vector<8x8x32xf32> to vector<64x32xf32>
    %8 = tpu.concatenate %7, %7, %7, %7 in 1 : vector<64x32xf32>, vector<64x32xf32>, vector<64x32xf32>, vector<64x32xf32> -> vector<64x128xf32>
    %9 = tpu.concatenate %5, %5, %5, %5, %5, %5, %5, %5 in 0 : vector<8x128xf32>, vector<8x128xf32>, vector<8x128xf32>, vector<8x128xf32>, vector<8x128xf32>, vector<8x128xf32>, vector<8x128xf32>, vector<8x128xf32> -> vector<64x128xf32>
    %10 = arith.mulf %8, %9 : vector<64x128xf32>
    %cst = arith.constant dense<0.000000e+00> : vector<64x128xf32>
    %11 = tpu.matmul %10, %2, %cst {dimension_numbers = #tpu.dot_dimension_numbers<[1], [0], [0], [1], [0, 0, 1, 1], [], []>} : vector<64x128xf32>, vector<128x128xf32>, vector<64x128xf32> -> vector<64x128xf32>
    %12 = tpu.concatenate %4, %4, %4, %4, %4, %4, %4, %4 in 0 : vector<8x128xf32>, vector<8x128xf32>, vector<8x128xf32>, vector<8x128xf32>, vector<8x128xf32>, vector<8x128xf32>, vector<8x128xf32>, vector<8x128xf32> -> vector<64x128xf32>
    %13 = arith.addf %11, %12 : vector<64x128xf32>
    %cst_7 = arith.constant 0.000000e+00 : f32
    %14 = vector.broadcast %cst_7 : f32 to vector<8x32xf32>
    %cst_8 = arith.constant 0.000000e+00 : f32
    %15 = vector.broadcast %cst_8 : f32 to vector<8x32xf32>
    %cst_9 = arith.constant 0.000000e+00 : f32
    %16 = vector.broadcast %cst_9 : f32 to vector<8x128xf32>
    %17 = vector.extract_strided_slice %13 {offsets = [0, 0], sizes = [8, 128], strides = [1, 1]} : vector<64x128xf32> to vector<8x128xf32>
    %cst_10 = arith.constant dense<0.000000e+00> : vector<8x128xf32>
    %18 = tpu.matmul %16, %3, %cst_10 {dimension_numbers = #tpu.dot_dimension_numbers<[1], [0], [0], [1], [0, 0, 1, 1], [], []>} : vector<8x128xf32>, vector<128x128xf32>, vector<8x128xf32> -> vector<8x128xf32>
    %19 = arith.addf %17, %18 : vector<8x128xf32>
    %20 = arith.negf %19 : vector<8x128xf32>
    %21 = math.exp %20 : vector<8x128xf32>
    %cst_11 = arith.constant 1.000000e+00 : f32
    %22 = vector.broadcast %cst_11 : f32 to vector<8x128xf32>
    %23 = arith.addf %22, %21 : vector<8x128xf32>
    %24 = arith.divf %22, %23 : vector<8x128xf32>
    %25 = vector.extract_strided_slice %24 {offsets = [0, 0], sizes = [8, 32], strides = [1, 1]} : vector<8x128xf32> to vector<8x32xf32>
    %26 = vector.extract_strided_slice %24 {offsets = [0, 32], sizes = [8, 32], strides = [1, 1]} : vector<8x128xf32> to vector<8x32xf32>
    %27 = vector.extract_strided_slice %24 {offsets = [0, 64], sizes = [8, 32], strides = [1, 1]} : vector<8x128xf32> to vector<8x32xf32>
    %cst_12 = arith.constant 2.000000e+00 : f32
    %28 = vector.broadcast %cst_12 : f32 to vector<8x32xf32>
    %29 = arith.mulf %28, %27 : vector<8x32xf32>
    %cst_13 = arith.constant 1.000000e+00 : f32
    %30 = vector.broadcast %cst_13 : f32 to vector<8x32xf32>
    %31 = arith.subf %29, %30 : vector<8x32xf32>
    %32 = vector.extract_strided_slice %24 {offsets = [0, 96], sizes = [8, 32], strides = [1, 1]} : vector<8x128xf32> to vector<8x32xf32>
    %33 = arith.mulf %26, %15 : vector<8x32xf32>
    %34 = arith.mulf %25, %31 : vector<8x32xf32>
    %35 = arith.addf %33, %34 : vector<8x32xf32>
    %36 = math.tanh %35 : vector<8x32xf32>
    %37 = arith.mulf %32, %36 : vector<8x32xf32>
    %c0_14 = arith.constant 0 : index
    %c0_15 = arith.constant 0 : index
    %c0_16 = arith.constant 0 : index
    %38 = vector.load %arg1[%c0_14, %c0_15, %c0_16] : memref<8x8x1xf32, #tpu.memory_space<vmem>>, vector<1x8x1xf32>
    %39 = vector.shape_cast %38 : vector<1x8x1xf32> to vector<8x1xf32>
    %40 = arith.subf %37, %14 : vector<8x32xf32>
    %41 = vector.broadcast %39 : vector<8x1xf32> to vector<8x32xf32>
    %42 = arith.mulf %41, %40 : vector<8x32xf32>
    %43 = arith.addf %14, %42 : vector<8x32xf32>
    %44 = arith.subf %35, %15 : vector<8x32xf32>
    %45 = vector.broadcast %39 : vector<8x1xf32> to vector<8x32xf32>
    %46 = arith.mulf %45, %44 : vector<8x32xf32>
    %47 = arith.addf %15, %46 : vector<8x32xf32>
    %48 = vector.broadcast %39 : vector<8x1xf32> to vector<8x32xf32>
    %49 = arith.mulf %48, %43 : vector<8x32xf32>
    %50 = tpu.concatenate %43, %43, %43, %43 in 1 : vector<8x32xf32>, vector<8x32xf32>, vector<8x32xf32>, vector<8x32xf32> -> vector<8x128xf32>
    %51 = arith.mulf %50, %5 : vector<8x128xf32>
    %52 = vector.extract_strided_slice %13 {offsets = [8, 0], sizes = [8, 128], strides = [1, 1]} : vector<64x128xf32> to vector<8x128xf32>
    %cst_17 = arith.constant dense<0.000000e+00> : vector<8x128xf32>
    %53 = tpu.matmul %51, %3, %cst_17 {dimension_numbers = #tpu.dot_dimension_numbers<[1], [0], [0], [1], [0, 0, 1, 1], [], []>} : vector<8x128xf32>, vector<128x128xf32>, vector<8x128xf32> -> vector<8x128xf32>
    %54 = arith.addf %52, %53 : vector<8x128xf32>
    %55 = arith.negf %54 : vector<8x128xf32>
    %56 = math.exp %55 : vector<8x128xf32>
    %cst_18 = arith.constant 1.000000e+00 : f32
    %57 = vector.broadcast %cst_18 : f32 to vector<8x128xf32>
    %58 = arith.addf %57, %56 : vector<8x128xf32>
    %59 = arith.divf %57, %58 : vector<8x128xf32>
    %60 = vector.extract_strided_slice %59 {offsets = [0, 0], sizes = [8, 32], strides = [1, 1]} : vector<8x128xf32> to vector<8x32xf32>
    %61 = vector.extract_strided_slice %59 {offsets = [0, 32], sizes = [8, 32], strides = [1, 1]} : vector<8x128xf32> to vector<8x32xf32>
    %62 = vector.extract_strided_slice %59 {offsets = [0, 64], sizes = [8, 32], strides = [1, 1]} : vector<8x128xf32> to vector<8x32xf32>
    %cst_19 = arith.constant 2.000000e+00 : f32
    %63 = vector.broadcast %cst_19 : f32 to vector<8x32xf32>
    %64 = arith.mulf %63, %62 : vector<8x32xf32>
    %cst_20 = arith.constant 1.000000e+00 : f32
    %65 = vector.broadcast %cst_20 : f32 to vector<8x32xf32>
    %66 = arith.subf %64, %65 : vector<8x32xf32>
    %67 = vector.extract_strided_slice %59 {offsets = [0, 96], sizes = [8, 32], strides = [1, 1]} : vector<8x128xf32> to vector<8x32xf32>
    %68 = arith.mulf %61, %47 : vector<8x32xf32>
    %69 = arith.mulf %60, %66 : vector<8x32xf32>
    %70 = arith.addf %68, %69 : vector<8x32xf32>
    %71 = math.tanh %70 : vector<8x32xf32>
    %72 = arith.mulf %67, %71 : vector<8x32xf32>
    %c1 = arith.constant 1 : index
    %c0_21 = arith.constant 0 : index
    %c0_22 = arith.constant 0 : index
    %73 = vector.load %arg1[%c1, %c0_21, %c0_22] : memref<8x8x1xf32, #tpu.memory_space<vmem>>, vector<1x8x1xf32>
    %74 = vector.shape_cast %73 : vector<1x8x1xf32> to vector<8x1xf32>
    %75 = arith.subf %72, %43 : vector<8x32xf32>
    %76 = vector.broadcast %74 : vector<8x1xf32> to vector<8x32xf32>
    %77 = arith.mulf %76, %75 : vector<8x32xf32>
    %78 = arith.addf %43, %77 : vector<8x32xf32>
    %79 = arith.subf %70, %47 : vector<8x32xf32>
    %80 = vector.broadcast %74 : vector<8x1xf32> to vector<8x32xf32>
    %81 = arith.mulf %80, %79 : vector<8x32xf32>
    %82 = arith.addf %47, %81 : vector<8x32xf32>
    %83 = vector.broadcast %74 : vector<8x1xf32> to vector<8x32xf32>
    %84 = arith.mulf %83, %78 : vector<8x32xf32>
    %85 = tpu.concatenate %78, %78, %78, %78 in 1 : vector<8x32xf32>, vector<8x32xf32>, vector<8x32xf32>, vector<8x32xf32> -> vector<8x128xf32>
    %86 = arith.mulf %85, %5 : vector<8x128xf32>
    %87 = vector.extract_strided_slice %13 {offsets = [16, 0], sizes = [8, 128], strides = [1, 1]} : vector<64x128xf32> to vector<8x128xf32>
    %cst_23 = arith.constant dense<0.000000e+00> : vector<8x128xf32>
    %88 = tpu.matmul %86, %3, %cst_23 {dimension_numbers = #tpu.dot_dimension_numbers<[1], [0], [0], [1], [0, 0, 1, 1], [], []>} : vector<8x128xf32>, vector<128x128xf32>, vector<8x128xf32> -> vector<8x128xf32>
    %89 = arith.addf %87, %88 : vector<8x128xf32>
    %90 = arith.negf %89 : vector<8x128xf32>
    %91 = math.exp %90 : vector<8x128xf32>
    %cst_24 = arith.constant 1.000000e+00 : f32
    %92 = vector.broadcast %cst_24 : f32 to vector<8x128xf32>
    %93 = arith.addf %92, %91 : vector<8x128xf32>
    %94 = arith.divf %92, %93 : vector<8x128xf32>
    %95 = vector.extract_strided_slice %94 {offsets = [0, 0], sizes = [8, 32], strides = [1, 1]} : vector<8x128xf32> to vector<8x32xf32>
    %96 = vector.extract_strided_slice %94 {offsets = [0, 32], sizes = [8, 32], strides = [1, 1]} : vector<8x128xf32> to vector<8x32xf32>
    %97 = vector.extract_strided_slice %94 {offsets = [0, 64], sizes = [8, 32], strides = [1, 1]} : vector<8x128xf32> to vector<8x32xf32>
    %cst_25 = arith.constant 2.000000e+00 : f32
    %98 = vector.broadcast %cst_25 : f32 to vector<8x32xf32>
    %99 = arith.mulf %98, %97 : vector<8x32xf32>
    %cst_26 = arith.constant 1.000000e+00 : f32
    %100 = vector.broadcast %cst_26 : f32 to vector<8x32xf32>
    %101 = arith.subf %99, %100 : vector<8x32xf32>
    %102 = vector.extract_strided_slice %94 {offsets = [0, 96], sizes = [8, 32], strides = [1, 1]} : vector<8x128xf32> to vector<8x32xf32>
    %103 = arith.mulf %96, %82 : vector<8x32xf32>
    %104 = arith.mulf %95, %101 : vector<8x32xf32>
    %105 = arith.addf %103, %104 : vector<8x32xf32>
    %106 = math.tanh %105 : vector<8x32xf32>
    %107 = arith.mulf %102, %106 : vector<8x32xf32>
    %c2 = arith.constant 2 : index
    %c0_27 = arith.constant 0 : index
    %c0_28 = arith.constant 0 : index
    %108 = vector.load %arg1[%c2, %c0_27, %c0_28] : memref<8x8x1xf32, #tpu.memory_space<vmem>>, vector<1x8x1xf32>
    %109 = vector.shape_cast %108 : vector<1x8x1xf32> to vector<8x1xf32>
    %110 = arith.subf %107, %78 : vector<8x32xf32>
    %111 = vector.broadcast %109 : vector<8x1xf32> to vector<8x32xf32>
    %112 = arith.mulf %111, %110 : vector<8x32xf32>
    %113 = arith.addf %78, %112 : vector<8x32xf32>
    %114 = arith.subf %105, %82 : vector<8x32xf32>
    %115 = vector.broadcast %109 : vector<8x1xf32> to vector<8x32xf32>
    %116 = arith.mulf %115, %114 : vector<8x32xf32>
    %117 = arith.addf %82, %116 : vector<8x32xf32>
    %118 = vector.broadcast %109 : vector<8x1xf32> to vector<8x32xf32>
    %119 = arith.mulf %118, %113 : vector<8x32xf32>
    %120 = tpu.concatenate %113, %113, %113, %113 in 1 : vector<8x32xf32>, vector<8x32xf32>, vector<8x32xf32>, vector<8x32xf32> -> vector<8x128xf32>
    %121 = arith.mulf %120, %5 : vector<8x128xf32>
    %122 = vector.extract_strided_slice %13 {offsets = [24, 0], sizes = [8, 128], strides = [1, 1]} : vector<64x128xf32> to vector<8x128xf32>
    %cst_29 = arith.constant dense<0.000000e+00> : vector<8x128xf32>
    %123 = tpu.matmul %121, %3, %cst_29 {dimension_numbers = #tpu.dot_dimension_numbers<[1], [0], [0], [1], [0, 0, 1, 1], [], []>} : vector<8x128xf32>, vector<128x128xf32>, vector<8x128xf32> -> vector<8x128xf32>
    %124 = arith.addf %122, %123 : vector<8x128xf32>
    %125 = arith.negf %124 : vector<8x128xf32>
    %126 = math.exp %125 : vector<8x128xf32>
    %cst_30 = arith.constant 1.000000e+00 : f32
    %127 = vector.broadcast %cst_30 : f32 to vector<8x128xf32>
    %128 = arith.addf %127, %126 : vector<8x128xf32>
    %129 = arith.divf %127, %128 : vector<8x128xf32>
    %130 = vector.extract_strided_slice %129 {offsets = [0, 0], sizes = [8, 32], strides = [1, 1]} : vector<8x128xf32> to vector<8x32xf32>
    %131 = vector.extract_strided_slice %129 {offsets = [0, 32], sizes = [8, 32], strides = [1, 1]} : vector<8x128xf32> to vector<8x32xf32>
    %132 = vector.extract_strided_slice %129 {offsets = [0, 64], sizes = [8, 32], strides = [1, 1]} : vector<8x128xf32> to vector<8x32xf32>
    %cst_31 = arith.constant 2.000000e+00 : f32
    %133 = vector.broadcast %cst_31 : f32 to vector<8x32xf32>
    %134 = arith.mulf %133, %132 : vector<8x32xf32>
    %cst_32 = arith.constant 1.000000e+00 : f32
    %135 = vector.broadcast %cst_32 : f32 to vector<8x32xf32>
    %136 = arith.subf %134, %135 : vector<8x32xf32>
    %137 = vector.extract_strided_slice %129 {offsets = [0, 96], sizes = [8, 32], strides = [1, 1]} : vector<8x128xf32> to vector<8x32xf32>
    %138 = arith.mulf %131, %117 : vector<8x32xf32>
    %139 = arith.mulf %130, %136 : vector<8x32xf32>
    %140 = arith.addf %138, %139 : vector<8x32xf32>
    %141 = math.tanh %140 : vector<8x32xf32>
    %142 = arith.mulf %137, %141 : vector<8x32xf32>
    %c3 = arith.constant 3 : index
    %c0_33 = arith.constant 0 : index
    %c0_34 = arith.constant 0 : index
    %143 = vector.load %arg1[%c3, %c0_33, %c0_34] : memref<8x8x1xf32, #tpu.memory_space<vmem>>, vector<1x8x1xf32>
    %144 = vector.shape_cast %143 : vector<1x8x1xf32> to vector<8x1xf32>
    %145 = arith.subf %142, %113 : vector<8x32xf32>
    %146 = vector.broadcast %144 : vector<8x1xf32> to vector<8x32xf32>
    %147 = arith.mulf %146, %145 : vector<8x32xf32>
    %148 = arith.addf %113, %147 : vector<8x32xf32>
    %149 = arith.subf %140, %117 : vector<8x32xf32>
    %150 = vector.broadcast %144 : vector<8x1xf32> to vector<8x32xf32>
    %151 = arith.mulf %150, %149 : vector<8x32xf32>
    %152 = arith.addf %117, %151 : vector<8x32xf32>
    %153 = vector.broadcast %144 : vector<8x1xf32> to vector<8x32xf32>
    %154 = arith.mulf %153, %148 : vector<8x32xf32>
    %155 = tpu.concatenate %148, %148, %148, %148 in 1 : vector<8x32xf32>, vector<8x32xf32>, vector<8x32xf32>, vector<8x32xf32> -> vector<8x128xf32>
    %156 = arith.mulf %155, %5 : vector<8x128xf32>
    %157 = vector.extract_strided_slice %13 {offsets = [32, 0], sizes = [8, 128], strides = [1, 1]} : vector<64x128xf32> to vector<8x128xf32>
    %cst_35 = arith.constant dense<0.000000e+00> : vector<8x128xf32>
    %158 = tpu.matmul %156, %3, %cst_35 {dimension_numbers = #tpu.dot_dimension_numbers<[1], [0], [0], [1], [0, 0, 1, 1], [], []>} : vector<8x128xf32>, vector<128x128xf32>, vector<8x128xf32> -> vector<8x128xf32>
    %159 = arith.addf %157, %158 : vector<8x128xf32>
    %160 = arith.negf %159 : vector<8x128xf32>
    %161 = math.exp %160 : vector<8x128xf32>
    %cst_36 = arith.constant 1.000000e+00 : f32
    %162 = vector.broadcast %cst_36 : f32 to vector<8x128xf32>
    %163 = arith.addf %162, %161 : vector<8x128xf32>
    %164 = arith.divf %162, %163 : vector<8x128xf32>
    %165 = vector.extract_strided_slice %164 {offsets = [0, 0], sizes = [8, 32], strides = [1, 1]} : vector<8x128xf32> to vector<8x32xf32>
    %166 = vector.extract_strided_slice %164 {offsets = [0, 32], sizes = [8, 32], strides = [1, 1]} : vector<8x128xf32> to vector<8x32xf32>
    %167 = vector.extract_strided_slice %164 {offsets = [0, 64], sizes = [8, 32], strides = [1, 1]} : vector<8x128xf32> to vector<8x32xf32>
    %cst_37 = arith.constant 2.000000e+00 : f32
    %168 = vector.broadcast %cst_37 : f32 to vector<8x32xf32>
    %169 = arith.mulf %168, %167 : vector<8x32xf32>
    %cst_38 = arith.constant 1.000000e+00 : f32
    %170 = vector.broadcast %cst_38 : f32 to vector<8x32xf32>
    %171 = arith.subf %169, %170 : vector<8x32xf32>
    %172 = vector.extract_strided_slice %164 {offsets = [0, 96], sizes = [8, 32], strides = [1, 1]} : vector<8x128xf32> to vector<8x32xf32>
    %173 = arith.mulf %166, %152 : vector<8x32xf32>
    %174 = arith.mulf %165, %171 : vector<8x32xf32>
    %175 = arith.addf %173, %174 : vector<8x32xf32>
    %176 = math.tanh %175 : vector<8x32xf32>
    %177 = arith.mulf %172, %176 : vector<8x32xf32>
    %c4 = arith.constant 4 : index
    %c0_39 = arith.constant 0 : index
    %c0_40 = arith.constant 0 : index
    %178 = vector.load %arg1[%c4, %c0_39, %c0_40] : memref<8x8x1xf32, #tpu.memory_space<vmem>>, vector<1x8x1xf32>
    %179 = vector.shape_cast %178 : vector<1x8x1xf32> to vector<8x1xf32>
    %180 = arith.subf %177, %148 : vector<8x32xf32>
    %181 = vector.broadcast %179 : vector<8x1xf32> to vector<8x32xf32>
    %182 = arith.mulf %181, %180 : vector<8x32xf32>
    %183 = arith.addf %148, %182 : vector<8x32xf32>
    %184 = arith.subf %175, %152 : vector<8x32xf32>
    %185 = vector.broadcast %179 : vector<8x1xf32> to vector<8x32xf32>
    %186 = arith.mulf %185, %184 : vector<8x32xf32>
    %187 = arith.addf %152, %186 : vector<8x32xf32>
    %188 = vector.broadcast %179 : vector<8x1xf32> to vector<8x32xf32>
    %189 = arith.mulf %188, %183 : vector<8x32xf32>
    %190 = tpu.concatenate %183, %183, %183, %183 in 1 : vector<8x32xf32>, vector<8x32xf32>, vector<8x32xf32>, vector<8x32xf32> -> vector<8x128xf32>
    %191 = arith.mulf %190, %5 : vector<8x128xf32>
    %192 = vector.extract_strided_slice %13 {offsets = [40, 0], sizes = [8, 128], strides = [1, 1]} : vector<64x128xf32> to vector<8x128xf32>
    %cst_41 = arith.constant dense<0.000000e+00> : vector<8x128xf32>
    %193 = tpu.matmul %191, %3, %cst_41 {dimension_numbers = #tpu.dot_dimension_numbers<[1], [0], [0], [1], [0, 0, 1, 1], [], []>} : vector<8x128xf32>, vector<128x128xf32>, vector<8x128xf32> -> vector<8x128xf32>
    %194 = arith.addf %192, %193 : vector<8x128xf32>
    %195 = arith.negf %194 : vector<8x128xf32>
    %196 = math.exp %195 : vector<8x128xf32>
    %cst_42 = arith.constant 1.000000e+00 : f32
    %197 = vector.broadcast %cst_42 : f32 to vector<8x128xf32>
    %198 = arith.addf %197, %196 : vector<8x128xf32>
    %199 = arith.divf %197, %198 : vector<8x128xf32>
    %200 = vector.extract_strided_slice %199 {offsets = [0, 0], sizes = [8, 32], strides = [1, 1]} : vector<8x128xf32> to vector<8x32xf32>
    %201 = vector.extract_strided_slice %199 {offsets = [0, 32], sizes = [8, 32], strides = [1, 1]} : vector<8x128xf32> to vector<8x32xf32>
    %202 = vector.extract_strided_slice %199 {offsets = [0, 64], sizes = [8, 32], strides = [1, 1]} : vector<8x128xf32> to vector<8x32xf32>
    %cst_43 = arith.constant 2.000000e+00 : f32
    %203 = vector.broadcast %cst_43 : f32 to vector<8x32xf32>
    %204 = arith.mulf %203, %202 : vector<8x32xf32>
    %cst_44 = arith.constant 1.000000e+00 : f32
    %205 = vector.broadcast %cst_44 : f32 to vector<8x32xf32>
    %206 = arith.subf %204, %205 : vector<8x32xf32>
    %207 = vector.extract_strided_slice %199 {offsets = [0, 96], sizes = [8, 32], strides = [1, 1]} : vector<8x128xf32> to vector<8x32xf32>
    %208 = arith.mulf %201, %187 : vector<8x32xf32>
    %209 = arith.mulf %200, %206 : vector<8x32xf32>
    %210 = arith.addf %208, %209 : vector<8x32xf32>
    %211 = math.tanh %210 : vector<8x32xf32>
    %212 = arith.mulf %207, %211 : vector<8x32xf32>
    %c5 = arith.constant 5 : index
    %c0_45 = arith.constant 0 : index
    %c0_46 = arith.constant 0 : index
    %213 = vector.load %arg1[%c5, %c0_45, %c0_46] : memref<8x8x1xf32, #tpu.memory_space<vmem>>, vector<1x8x1xf32>
    %214 = vector.shape_cast %213 : vector<1x8x1xf32> to vector<8x1xf32>
    %215 = arith.subf %212, %183 : vector<8x32xf32>
    %216 = vector.broadcast %214 : vector<8x1xf32> to vector<8x32xf32>
    %217 = arith.mulf %216, %215 : vector<8x32xf32>
    %218 = arith.addf %183, %217 : vector<8x32xf32>
    %219 = arith.subf %210, %187 : vector<8x32xf32>
    %220 = vector.broadcast %214 : vector<8x1xf32> to vector<8x32xf32>
    %221 = arith.mulf %220, %219 : vector<8x32xf32>
    %222 = arith.addf %187, %221 : vector<8x32xf32>
    %223 = vector.broadcast %214 : vector<8x1xf32> to vector<8x32xf32>
    %224 = arith.mulf %223, %218 : vector<8x32xf32>
    %225 = tpu.concatenate %218, %218, %218, %218 in 1 : vector<8x32xf32>, vector<8x32xf32>, vector<8x32xf32>, vector<8x32xf32> -> vector<8x128xf32>
    %226 = arith.mulf %225, %5 : vector<8x128xf32>
    %227 = vector.extract_strided_slice %13 {offsets = [48, 0], sizes = [8, 128], strides = [1, 1]} : vector<64x128xf32> to vector<8x128xf32>
    %cst_47 = arith.constant dense<0.000000e+00> : vector<8x128xf32>
    %228 = tpu.matmul %226, %3, %cst_47 {dimension_numbers = #tpu.dot_dimension_numbers<[1], [0], [0], [1], [0, 0, 1, 1], [], []>} : vector<8x128xf32>, vector<128x128xf32>, vector<8x128xf32> -> vector<8x128xf32>
    %229 = arith.addf %227, %228 : vector<8x128xf32>
    %230 = arith.negf %229 : vector<8x128xf32>
    %231 = math.exp %230 : vector<8x128xf32>
    %cst_48 = arith.constant 1.000000e+00 : f32
    %232 = vector.broadcast %cst_48 : f32 to vector<8x128xf32>
    %233 = arith.addf %232, %231 : vector<8x128xf32>
    %234 = arith.divf %232, %233 : vector<8x128xf32>
    %235 = vector.extract_strided_slice %234 {offsets = [0, 0], sizes = [8, 32], strides = [1, 1]} : vector<8x128xf32> to vector<8x32xf32>
    %236 = vector.extract_strided_slice %234 {offsets = [0, 32], sizes = [8, 32], strides = [1, 1]} : vector<8x128xf32> to vector<8x32xf32>
    %237 = vector.extract_strided_slice %234 {offsets = [0, 64], sizes = [8, 32], strides = [1, 1]} : vector<8x128xf32> to vector<8x32xf32>
    %cst_49 = arith.constant 2.000000e+00 : f32
    %238 = vector.broadcast %cst_49 : f32 to vector<8x32xf32>
    %239 = arith.mulf %238, %237 : vector<8x32xf32>
    %cst_50 = arith.constant 1.000000e+00 : f32
    %240 = vector.broadcast %cst_50 : f32 to vector<8x32xf32>
    %241 = arith.subf %239, %240 : vector<8x32xf32>
    %242 = vector.extract_strided_slice %234 {offsets = [0, 96], sizes = [8, 32], strides = [1, 1]} : vector<8x128xf32> to vector<8x32xf32>
    %243 = arith.mulf %236, %222 : vector<8x32xf32>
    %244 = arith.mulf %235, %241 : vector<8x32xf32>
    %245 = arith.addf %243, %244 : vector<8x32xf32>
    %246 = math.tanh %245 : vector<8x32xf32>
    %247 = arith.mulf %242, %246 : vector<8x32xf32>
    %c6 = arith.constant 6 : index
    %c0_51 = arith.constant 0 : index
    %c0_52 = arith.constant 0 : index
    %248 = vector.load %arg1[%c6, %c0_51, %c0_52] : memref<8x8x1xf32, #tpu.memory_space<vmem>>, vector<1x8x1xf32>
    %249 = vector.shape_cast %248 : vector<1x8x1xf32> to vector<8x1xf32>
    %250 = arith.subf %247, %218 : vector<8x32xf32>
    %251 = vector.broadcast %249 : vector<8x1xf32> to vector<8x32xf32>
    %252 = arith.mulf %251, %250 : vector<8x32xf32>
    %253 = arith.addf %218, %252 : vector<8x32xf32>
    %254 = arith.subf %245, %222 : vector<8x32xf32>
    %255 = vector.broadcast %249 : vector<8x1xf32> to vector<8x32xf32>
    %256 = arith.mulf %255, %254 : vector<8x32xf32>
    %257 = arith.addf %222, %256 : vector<8x32xf32>
    %258 = vector.broadcast %249 : vector<8x1xf32> to vector<8x32xf32>
    %259 = arith.mulf %258, %253 : vector<8x32xf32>
    %260 = tpu.concatenate %253, %253, %253, %253 in 1 : vector<8x32xf32>, vector<8x32xf32>, vector<8x32xf32>, vector<8x32xf32> -> vector<8x128xf32>
    %261 = arith.mulf %260, %5 : vector<8x128xf32>
    %262 = vector.extract_strided_slice %13 {offsets = [56, 0], sizes = [8, 128], strides = [1, 1]} : vector<64x128xf32> to vector<8x128xf32>
    %cst_53 = arith.constant dense<0.000000e+00> : vector<8x128xf32>
    %263 = tpu.matmul %261, %3, %cst_53 {dimension_numbers = #tpu.dot_dimension_numbers<[1], [0], [0], [1], [0, 0, 1, 1], [], []>} : vector<8x128xf32>, vector<128x128xf32>, vector<8x128xf32> -> vector<8x128xf32>
    %264 = arith.addf %262, %263 : vector<8x128xf32>
    %265 = arith.negf %264 : vector<8x128xf32>
    %266 = math.exp %265 : vector<8x128xf32>
    %cst_54 = arith.constant 1.000000e+00 : f32
    %267 = vector.broadcast %cst_54 : f32 to vector<8x128xf32>
    %268 = arith.addf %267, %266 : vector<8x128xf32>
    %269 = arith.divf %267, %268 : vector<8x128xf32>
    %270 = vector.extract_strided_slice %269 {offsets = [0, 0], sizes = [8, 32], strides = [1, 1]} : vector<8x128xf32> to vector<8x32xf32>
    %271 = vector.extract_strided_slice %269 {offsets = [0, 32], sizes = [8, 32], strides = [1, 1]} : vector<8x128xf32> to vector<8x32xf32>
    %272 = vector.extract_strided_slice %269 {offsets = [0, 64], sizes = [8, 32], strides = [1, 1]} : vector<8x128xf32> to vector<8x32xf32>
    %cst_55 = arith.constant 2.000000e+00 : f32
    %273 = vector.broadcast %cst_55 : f32 to vector<8x32xf32>
    %274 = arith.mulf %273, %272 : vector<8x32xf32>
    %cst_56 = arith.constant 1.000000e+00 : f32
    %275 = vector.broadcast %cst_56 : f32 to vector<8x32xf32>
    %276 = arith.subf %274, %275 : vector<8x32xf32>
    %277 = vector.extract_strided_slice %269 {offsets = [0, 96], sizes = [8, 32], strides = [1, 1]} : vector<8x128xf32> to vector<8x32xf32>
    %278 = arith.mulf %271, %257 : vector<8x32xf32>
    %279 = arith.mulf %270, %276 : vector<8x32xf32>
    %280 = arith.addf %278, %279 : vector<8x32xf32>
    %281 = math.tanh %280 : vector<8x32xf32>
    %282 = arith.mulf %277, %281 : vector<8x32xf32>
    %c7 = arith.constant 7 : index
    %c0_57 = arith.constant 0 : index
    %c0_58 = arith.constant 0 : index
    %283 = vector.load %arg1[%c7, %c0_57, %c0_58] : memref<8x8x1xf32, #tpu.memory_space<vmem>>, vector<1x8x1xf32>
    %284 = vector.shape_cast %283 : vector<1x8x1xf32> to vector<8x1xf32>
    %285 = arith.subf %282, %253 : vector<8x32xf32>
    %286 = vector.broadcast %284 : vector<8x1xf32> to vector<8x32xf32>
    %287 = arith.mulf %286, %285 : vector<8x32xf32>
    %288 = arith.addf %253, %287 : vector<8x32xf32>
    %289 = vector.broadcast %284 : vector<8x1xf32> to vector<8x32xf32>
    %290 = arith.mulf %289, %288 : vector<8x32xf32>
    %291 = vector.extract_strided_slice %49 {offsets = [0, 0], sizes = [4, 32], strides = [1, 1]} : vector<8x32xf32> to vector<4x32xf32>
    %292 = vector.extract_strided_slice %290 {offsets = [4, 0], sizes = [4, 32], strides = [1, 1]} : vector<8x32xf32> to vector<4x32xf32>
    %293 = tpu.concatenate %291, %292 in 1 : vector<4x32xf32>, vector<4x32xf32> -> vector<4x64xf32>
    %294 = vector.extract_strided_slice %84 {offsets = [0, 0], sizes = [4, 32], strides = [1, 1]} : vector<8x32xf32> to vector<4x32xf32>
    %295 = vector.extract_strided_slice %259 {offsets = [4, 0], sizes = [4, 32], strides = [1, 1]} : vector<8x32xf32> to vector<4x32xf32>
    %296 = tpu.concatenate %294, %295 in 1 : vector<4x32xf32>, vector<4x32xf32> -> vector<4x64xf32>
    %297 = vector.extract_strided_slice %119 {offsets = [0, 0], sizes = [4, 32], strides = [1, 1]} : vector<8x32xf32> to vector<4x32xf32>
    %298 = vector.extract_strided_slice %224 {offsets = [4, 0], sizes = [4, 32], strides = [1, 1]} : vector<8x32xf32> to vector<4x32xf32>
    %299 = tpu.concatenate %297, %298 in 1 : vector<4x32xf32>, vector<4x32xf32> -> vector<4x64xf32>
    %300 = vector.extract_strided_slice %154 {offsets = [0, 0], sizes = [4, 32], strides = [1, 1]} : vector<8x32xf32> to vector<4x32xf32>
    %301 = vector.extract_strided_slice %189 {offsets = [4, 0], sizes = [4, 32], strides = [1, 1]} : vector<8x32xf32> to vector<4x32xf32>
    %302 = tpu.concatenate %300, %301 in 1 : vector<4x32xf32>, vector<4x32xf32> -> vector<4x64xf32>
    %303 = vector.extract_strided_slice %189 {offsets = [0, 0], sizes = [4, 32], strides = [1, 1]} : vector<8x32xf32> to vector<4x32xf32>
    %304 = vector.extract_strided_slice %154 {offsets = [4, 0], sizes = [4, 32], strides = [1, 1]} : vector<8x32xf32> to vector<4x32xf32>
    %305 = tpu.concatenate %303, %304 in 1 : vector<4x32xf32>, vector<4x32xf32> -> vector<4x64xf32>
    %306 = vector.extract_strided_slice %224 {offsets = [0, 0], sizes = [4, 32], strides = [1, 1]} : vector<8x32xf32> to vector<4x32xf32>
    %307 = vector.extract_strided_slice %119 {offsets = [4, 0], sizes = [4, 32], strides = [1, 1]} : vector<8x32xf32> to vector<4x32xf32>
    %308 = tpu.concatenate %306, %307 in 1 : vector<4x32xf32>, vector<4x32xf32> -> vector<4x64xf32>
    %309 = vector.extract_strided_slice %259 {offsets = [0, 0], sizes = [4, 32], strides = [1, 1]} : vector<8x32xf32> to vector<4x32xf32>
    %310 = vector.extract_strided_slice %84 {offsets = [4, 0], sizes = [4, 32], strides = [1, 1]} : vector<8x32xf32> to vector<4x32xf32>
    %311 = tpu.concatenate %309, %310 in 1 : vector<4x32xf32>, vector<4x32xf32> -> vector<4x64xf32>
    %312 = vector.extract_strided_slice %290 {offsets = [0, 0], sizes = [4, 32], strides = [1, 1]} : vector<8x32xf32> to vector<4x32xf32>
    %313 = vector.extract_strided_slice %49 {offsets = [4, 0], sizes = [4, 32], strides = [1, 1]} : vector<8x32xf32> to vector<4x32xf32>
    %314 = tpu.concatenate %312, %313 in 1 : vector<4x32xf32>, vector<4x32xf32> -> vector<4x64xf32>
    %315 = vector.shape_cast %293 : vector<4x64xf32> to vector<1x4x64xf32>
    %316 = vector.shape_cast %296 : vector<4x64xf32> to vector<1x4x64xf32>
    %317 = vector.shape_cast %299 : vector<4x64xf32> to vector<1x4x64xf32>
    %318 = vector.shape_cast %302 : vector<4x64xf32> to vector<1x4x64xf32>
    %319 = vector.shape_cast %305 : vector<4x64xf32> to vector<1x4x64xf32>
    %320 = vector.shape_cast %308 : vector<4x64xf32> to vector<1x4x64xf32>
    %321 = vector.shape_cast %311 : vector<4x64xf32> to vector<1x4x64xf32>
    %322 = vector.shape_cast %314 : vector<4x64xf32> to vector<1x4x64xf32>
    %323 = tpu.concatenate %315, %316, %317, %318, %319, %320, %321, %322 in 0 : vector<1x4x64xf32>, vector<1x4x64xf32>, vector<1x4x64xf32>, vector<1x4x64xf32>, vector<1x4x64xf32>, vector<1x4x64xf32>, vector<1x4x64xf32>, vector<1x4x64xf32> -> vector<8x4x64xf32>
    %324 = tpu.transpose %323, [1, 0, 2] : vector<8x4x64xf32> -> vector<4x8x64xf32>
    %cst_59 = arith.constant dense<0xFF800000> : vector<4x64xf32>
    %325 = vector.multi_reduction <maximumf>, %324, %cst_59 [1] : vector<4x8x64xf32> to vector<4x64xf32>
    "tpu.trace_start"() <{level = 10 : i32, message = "gtd,gsd->gts"}> : () -> ()
    %cst_60 = arith.constant dense<0.000000e+00> : vector<4x8x8xf32>
    %326 = tpu.matmul %324, %324, %cst_60 {dimension_numbers = #tpu.dot_dimension_numbers<[2], [2], [1], [1], [0, 0, 0, 1, 1, 1], [0], [0]>} : vector<4x8x64xf32>, vector<4x8x64xf32>, vector<4x8x8xf32> -> vector<4x8x8xf32>
    "tpu.trace_stop"() : () -> ()
    %cst_61 = arith.constant dense<0xFF800000> : vector<4x8xf32>
    %327 = vector.multi_reduction <maximumf>, %326, %cst_61 [1] : vector<4x8x8xf32> to vector<4x8xf32>
    %cst_62 = arith.constant 0xFF800000 : f32
    %328 = vector.broadcast %cst_62 : f32 to vector<4x8xf32>
    %329 = arith.maximumf %328, %327 : vector<4x8xf32>
    %330 = vector.shape_cast %329 : vector<4x8xf32> to vector<4x1x8xf32>
    %331 = vector.broadcast %330 : vector<4x1x8xf32> to vector<4x8x8xf32>
    %332 = arith.subf %326, %331 : vector<4x8x8xf32>
    %333 = math.exp %332 : vector<4x8x8xf32>
    %cst_63 = arith.constant dense<0.000000e+00> : vector<4x8xf32>
    %334 = vector.multi_reduction <add>, %333, %cst_63 [1] : vector<4x8x8xf32> to vector<4x8xf32>
    %335 = vector.shape_cast %334 : vector<4x8xf32> to vector<4x1x8xf32>
    %336 = vector.broadcast %335 : vector<4x1x8xf32> to vector<4x8x8xf32>
    %337 = arith.divf %333, %336 : vector<4x8x8xf32>
    %cst_64 = arith.constant dense<0xFF800000> : vector<4x8xf32>
    %338 = vector.multi_reduction <maximumf>, %326, %cst_64 [2] : vector<4x8x8xf32> to vector<4x8xf32>
    %cst_65 = arith.constant 0xFF800000 : f32
    %339 = vector.broadcast %cst_65 : f32 to vector<4x8xf32>
    %340 = arith.maximumf %339, %338 : vector<4x8xf32>
    %341 = vector.shape_cast %340 : vector<4x8xf32> to vector<4x8x1xf32>
    %342 = vector.broadcast %341 : vector<4x8x1xf32> to vector<4x8x8xf32>
    %343 = arith.subf %326, %342 : vector<4x8x8xf32>
    %344 = math.exp %343 : vector<4x8x8xf32>
    %cst_66 = arith.constant dense<0.000000e+00> : vector<4x8xf32>
    %345 = vector.multi_reduction <add>, %344, %cst_66 [2] : vector<4x8x8xf32> to vector<4x8xf32>
    %346 = vector.shape_cast %345 : vector<4x8xf32> to vector<4x8x1xf32>
    %347 = vector.broadcast %346 : vector<4x8x1xf32> to vector<4x8x8xf32>
    %348 = arith.divf %344, %347 : vector<4x8x8xf32>
    %cst_67 = arith.constant dense<0.000000e+00> : vector<4x8xf32>
    %349 = vector.multi_reduction <add>, %348, %cst_67 [1] : vector<4x8x8xf32> to vector<4x8xf32>
    %350 = vector.shape_cast %349 : vector<4x8xf32> to vector<4x1x8xf32>
    %cst_68 = arith.constant 8.000000e+00 : f32
    %351 = vector.broadcast %cst_68 : f32 to vector<4x1x8xf32>
    %352 = arith.divf %350, %351 : vector<4x1x8xf32>
    %353 = vector.broadcast %352 : vector<4x1x8xf32> to vector<4x8x8xf32>
    %354 = arith.mulf %337, %353 : vector<4x8x8xf32>
    %cst_69 = arith.constant dense<0.000000e+00> : vector<4x8xf32>
    %355 = vector.multi_reduction <add>, %354, %cst_69 [2] : vector<4x8x8xf32> to vector<4x8xf32>
    %356 = vector.shape_cast %355 : vector<4x8xf32> to vector<4x8x1xf32>
    %357 = vector.broadcast %356 : vector<4x8x1xf32> to vector<4x8x64xf32>
    %358 = arith.mulf %324, %357 : vector<4x8x64xf32>
    %cst_70 = arith.constant dense<0.000000e+00> : vector<4x64xf32>
    %359 = vector.multi_reduction <add>, %358, %cst_70 [1] : vector<4x8x64xf32> to vector<4x64xf32>
    %360 = vector.extract_strided_slice %325 {offsets = [0, 0], sizes = [2, 64], strides = [1, 1]} : vector<4x64xf32> to vector<2x64xf32>
    %361 = vector.extract_strided_slice %325 {offsets = [2, 0], sizes = [2, 64], strides = [1, 1]} : vector<4x64xf32> to vector<2x64xf32>
    %362 = arith.subf %360, %361 : vector<2x64xf32>
    %363 = math.absf %362 : vector<2x64xf32>
    %364 = vector.extract_strided_slice %359 {offsets = [0, 0], sizes = [2, 64], strides = [1, 1]} : vector<4x64xf32> to vector<2x64xf32>
    %365 = vector.extract_strided_slice %359 {offsets = [2, 0], sizes = [2, 64], strides = [1, 1]} : vector<4x64xf32> to vector<2x64xf32>
    %366 = tpu.concatenate %363, %364, %365 in 1 : vector<2x64xf32>, vector<2x64xf32>, vector<2x64xf32> -> vector<2x192xf32>
    %367 = arith.truncf %366 : vector<2x192xf32> to vector<2x192xbf16>
    %c0_71 = arith.constant 0 : index
    %c0_72 = arith.constant 0 : index
    %368 = vector.load %arg3[%c0_71, %c0_72] : memref<192x512xbf16, #tpu.memory_space<vmem>>, vector<192x512xbf16>
    %cst_73 = arith.constant dense<0.000000e+00> : vector<2x512xf32>
    %369 = tpu.matmul %367, %368, %cst_73 {dimension_numbers = #tpu.dot_dimension_numbers<[1], [0], [0], [1], [0, 0, 1, 1], [], []>} : vector<2x192xbf16>, vector<192x512xbf16>, vector<2x512xf32> -> vector<2x512xf32>
    %c0_74 = arith.constant 0 : index
    %c0_75 = arith.constant 0 : index
    %370 = vector.load %arg4[%c0_74, %c0_75] : memref<3x512xf32, #tpu.memory_space<vmem>>, vector<1x512xf32>
    %371 = vector.broadcast %370 : vector<1x512xf32> to vector<2x512xf32>
    %372 = arith.addf %369, %371 : vector<2x512xf32>
    %c0_i32_76 = arith.constant 0 : i32
    %373 = tpu.memref_slice %arg9[%c0_i32_76] : memref<1x!tpu.dma_semaphore, #tpu.memory_space<semaphore_mem>> -> memref<1x!tpu.dma_semaphore, #tpu.memory_space<semaphore_mem>>
    %374 = tpu.memref_squeeze %373 : memref<1x!tpu.dma_semaphore, #tpu.memory_space<semaphore_mem>> -> memref<!tpu.dma_semaphore, #tpu.memory_space<semaphore_mem>>
    tpu.wait_dma2 semaphore(%374 : memref<!tpu.dma_semaphore, #tpu.memory_space<semaphore_mem>>) src(%arg5 : memref<512x512xbf16, #tpu.memory_space<any>>) dst(%arg8 : memref<512x512xbf16, #tpu.memory_space<vmem>>)
    %375 = arith.truncf %372 : vector<2x512xf32> to vector<2x512xbf16>
    %c0_77 = arith.constant 0 : index
    %c0_78 = arith.constant 0 : index
    %376 = vector.load %arg8[%c0_77, %c0_78] : memref<512x512xbf16, #tpu.memory_space<vmem>>, vector<512x512xbf16>
    %cst_79 = arith.constant dense<0.000000e+00> : vector<2x512xf32>
    %377 = tpu.matmul %375, %376, %cst_79 {dimension_numbers = #tpu.dot_dimension_numbers<[1], [0], [0], [1], [0, 0, 1, 1], [], []>} : vector<2x512xbf16>, vector<512x512xbf16>, vector<2x512xf32> -> vector<2x512xf32>
    %c1_80 = arith.constant 1 : index
    %c0_81 = arith.constant 0 : index
    %378 = vector.load %arg4[%c1_80, %c0_81] : memref<3x512xf32, #tpu.memory_space<vmem>>, vector<1x512xf32>
    %379 = vector.broadcast %378 : vector<1x512xf32> to vector<2x512xf32>
    %380 = arith.addf %377, %379 : vector<2x512xf32>
    %381 = arith.truncf %380 : vector<2x512xf32> to vector<2x512xbf16>
    %c0_82 = arith.constant 0 : index
    %c0_83 = arith.constant 0 : index
    %382 = vector.load %arg6[%c0_82, %c0_83] : memref<512x3xbf16, #tpu.memory_space<vmem>>, vector<512x3xbf16>
    %cst_84 = arith.constant dense<0.000000e+00> : vector<2x3xf32>
    %383 = tpu.matmul %381, %382, %cst_84 {dimension_numbers = #tpu.dot_dimension_numbers<[1], [0], [0], [1], [0, 0, 1, 1], [], []>} : vector<2x512xbf16>, vector<512x3xbf16>, vector<2x3xf32> -> vector<2x3xf32>
    %c2_85 = arith.constant 2 : index
    %c0_86 = arith.constant 0 : index
    %384 = vector.load %arg4[%c2_85, %c0_86] : memref<3x512xf32, #tpu.memory_space<vmem>>, vector<1x3xf32>
    %385 = vector.broadcast %384 : vector<1x3xf32> to vector<2x3xf32>
    %386 = arith.addf %383, %385 : vector<2x3xf32>
    %c0_87 = arith.constant 0 : index
    %c0_88 = arith.constant 0 : index
    %387 = vector.load %arg7[%c0_87, %c0_88] : memref<2x3xf32, #tpu.memory_space<vmem>>, vector<2x3xf32>
    tpu.vector_store %arg7[%c0_87, %c0_88], %386 {strides = array<i32>} : memref<2x3xf32, #tpu.memory_space<vmem>>, vector<2x3xf32>,
    return
  }
}

</mosaic_0001>

<bundles_post_ra>
// kernel: _lambda_.1
= control target key start
LH: loop header
LB: loop body
LE: loop exit
PB: predicated region body
PF: predicated region fallthrough
CT: control target
= control target key end

     0   :  { %12 = vsyncpa [#allocation5], 0  ;;  %s5837_s0 = inlined_call_operand.vmem [shape: f32[8,8,32], index: 0, kind: input, shape index: {}]   ;;  %s5838_s1 = inlined_call_operand.vmem [shape: f32[8,8,1], index: 1, kind: input, shape index: {}]   ;;  %s5839_s2 = inlined_call_operand.vmem [shape: f32[272,128], index: 2, kind: input, shape index: {}]   ;;  %s5840_s3 = inlined_call_operand.vmem [shape: bf16[192,512], index: 3, kind: input, shape index: {}]   ;;  %s5841_s4 = inlined_call_operand.vmem [shape: f32[3,512], index: 4, kind: input, shape index: {}]   ;;  %s5842_s5 = inlined_call_operand.hbm [shape: bf16[512,512], index: 5, kind: input, shape index: {}]   ;;  %s5843_s6 = inlined_call_operand.hbm [shape: bf16[512,3], index: 6, kind: input, shape index: {}]   ;;  %s5844_s7 = inlined_call_operand.hbm [shape: f32[2,3], index: 7, kind: output, shape index: {}]  }
   0x1   :  { %13 = vsyncpa [#allocation6], 0  ;;  %s28_s26 = sshll.u32 %s5843_s6, 4  ;;  %s4501_s27 = smov [#allocation4]   ;;  %s29_s26 = int_to_ptr.hbm [resolvable:$true] %s28_s26 }
   0x2   :  { %s30_s28 = sshll.u32 %s4501_s27, 4  ;;  %s4502_s29 = smov 64   ;;  %s31_s28 = int_to_ptr.vmem [resolvable:$true] %s30_s28 }
   0x3   :  { %s4503_s30 = smov 4  }
   0x4   :  { %36 = dma.hbm_to_vmem [thread:$0]  %s29_s26, 4096, %s31_s28, [#allocation5], %s4502_s29, %s4502_s29, %s4503_s30  }
   0x5   :  { %4495 = dma.done.wait [#allocation5], 4096  }
   0x6   :  { %4496 = vsyncadd [#allocation5], 4294963200  ;;  %v4561_v0 = vld [vmem:[%s5837_s0] sm:$0xff]  ;;  %v70_v1 = vld [vmem:[%s5839_s2 + $0x78] sm:$0xff]  ;;  %s4504_s6 = smov 32   ;;  %s4505_s12 = smov 96  }
   0x7   :  { %105 = vrot.lane.b32.xlu0 %v4561_v0, %s4504_s6  ;;  %153 = vrot.lane.b32.xlu1 %v4561_v0, %s4505_s12  ;;  %v69_v2 = vld [vmem:[%s5839_s2 + $0x70] sm:$0xff]  ;;  %v4576_v3 = vld [vmem:[%s5839_s2 + $0xf8] sm:$0xff]  ;;  %v4506_v33 = vmov 0.0   ;;  %vm177_vm0 = vcmask 261120   ;;  %vm186_vm1 = vcmask 523264   ;;  %vm195_vm2 = vcmask 785408  }
   0x8   :  { %212 = vmatpush.msra.mxu0 %v70_v1  ;;  %253 = vmatpush.msra.mxu1 %v4576_v3  ;;  %v4582_v4 = vld [vmem:[%s5839_s2 + $0xf0] sm:$0xff]  ;;  %v68_v5 = vld [vmem:[%s5839_s2 + $0x68] sm:$0xff]  ;;  %v67_v7 = vld [vmem:[%s5839_s2 + $0x60] sm:$0xff]  ;;  %v4507_v49 = vmov 0   ;;  %s49_s28 = sshll.u32 %s5842_s5, 4  ;;  %s4511_s30 = smov [#allocation2]   ;;  %s50_s28 = int_to_ptr.hbm [resolvable:$true] %s49_s28 }
   0x9   :  { %v4590_v6 = vld [vmem:[%s5839_s2 + $0xe8] sm:$0xff]  ;;  %337 = vmatpush.msra.mxu2 %v4576_v3  ;;  %424 = vmatpush.msra.mxu3 %v4576_v3  ;;  %v4601_v8 = vld [vmem:[%s5839_s2 + $0xe0] sm:$0xff]  ;;  %v66_v9 = vld [vmem:[%s5839_s2 + $0x58] sm:$0xff]  ;;  %s51_s8 = sshll.u32 %s4511_s30, 4  ;;  %s52_s8 = int_to_ptr.vmem [resolvable:$true] %s51_s8 }
   0xa   :  { %213 = vmatpush.msra.mxu0 %v69_v2  ;;  %254 = vmatpush.msra.mxu1 %v4582_v4  ;;  %v4612_v10 = vld [vmem:[%s5839_s2 + $0xd8] sm:$0xff]  ;;  %v65_v11 = vld [vmem:[%s5839_s2 + $0x50] sm:$0xff]  ;;  %v64_v13 = vld [vmem:[%s5839_s2 + $0x48] sm:$0xff]  ;;  %54 = dma.hbm_to_vmem [thread:$0]  %s50_s28, 16384, %s52_s8, [#allocation3] }
   0xb   :  { %338 = vmatpush.msra.mxu2 %v4582_v4  ;;  %425 = vmatpush.msra.mxu3 %v4582_v4  ;;  %v4625_v12 = vld [vmem:[%s5839_s2 + $0xd0] sm:$0xff]  ;;  %v4635_v14 = vld [vmem:[%s5839_s2 + $0xc8] sm:$0xff]  ;;  %v63_v15 = vld [vmem:[%s5839_s2 + $0x40] sm:$0xff] }
   0xc   :  { %214 = vmatpush.msra.mxu0 %v68_v5  ;;  %255 = vmatpush.msra.mxu1 %v4590_v6  ;;  %v4646_v16 = vld [vmem:[%s5839_s2 + $0xc0] sm:$0xff]  ;;  %v62_v17 = vld [vmem:[%s5839_s2 + $0x38] sm:$0xff]  ;;  %v61_v18 = vld [vmem:[%s5839_s2 + $0x30] sm:$0xff] }
   0xd   :  { %339 = vmatpush.msra.mxu2 %v4590_v6  ;;  %426 = vmatpush.msra.mxu3 %v4590_v6  ;;  %v4666_v19 = vld [vmem:[%s5839_s2 + $0xb8] sm:$0xff]  ;;  %v60_v20 = vld [vmem:[%s5839_s2 + $0x28] sm:$0xff]  ;;  %v4675_v21 = vld [vmem:[%s5839_s2 + $0xb0] sm:$0xff] }
   0xe   :  { %215 = vmatpush.msra.mxu0 %v67_v7  ;;  %256 = vmatpush.msra.mxu1 %v4601_v8  ;;  %v59_v22 = vld [vmem:[%s5839_s2 + $0x20] sm:$0xff]  ;;  %v4686_v23 = vld [vmem:[%s5839_s2 + $0xa8] sm:$0xff]  ;;  %v58_v24 = vld [vmem:[%s5839_s2 + $0x18] sm:$0xff] }
   0xf   :  { %129 = vrot.lane.b32.xlu0 %v4561_v0, %s4502_s29  ;;  %340 = vmatpush.msra.mxu2 %v4601_v8  ;;  %v4694_v25 = vld [vmem:[%s5839_s2 + $0xa0] sm:$0xff]  ;;  %v57_v26 = vld [vmem:[%s5839_s2 + $0x10] sm:$0xff]  ;;  %v4708_v27 = vld [vmem:[%s5839_s2 + $0x98] sm:$0xff] }
  0x10   :  { %216 = vmatpush.msra.mxu0 %v66_v9  ;;  %257 = vmatpush.msra.mxu1 %v4612_v10  ;;  %v56_v28 = vld [vmem:[%s5839_s2 + $0x8] sm:$0xff]  ;;  %v4719_v29 = vld [vmem:[%s5839_s2 + $0x90] sm:$0xff]  ;;  %v55_v30 = vld [vmem:[%s5839_s2] sm:$0xff] }
  0x11   :  { %341 = vmatpush.msra.mxu2 %v4612_v10  ;;  %427 = vmatpush.msra.mxu3 %v4601_v8  ;;  %v4730_v31 = vld [vmem:[%s5839_s2 + $0x88] sm:$0xff]  ;;  %v4738_v32 = vld [vmem:[%s5839_s2 + $0x80] sm:$0xff] }
  0x12   :  { %217 = vmatpush.msra.mxu0 %v65_v11  ;;  %258 = vmatpush.msra.mxu1 %v4625_v12  ;;  %v4798_v38 = vld [vmem:[%s5839_s2 + $0x108] sm:$0xff]  ;;  %v4838_v42 = vld [vmem:[%s5839_s2 + $0x100] sm:$0xff] }
  0x13   :  { %342 = vmatpush.msra.mxu2 %v4625_v12  ;;  %428 = vmatpush.msra.mxu3 %v4612_v10  ;;  %v312_v48 = vld [vmem:[%s5838_s1] sm:$0xff] }
  0x14   :  { %218 = vmatpush.msra.mxu0 %v64_v13  ;;  %259 = vmatpush.msra.mxu1 %v4635_v14 }
  0x15   :  { %343 = vmatpush.msra.mxu2 %v4635_v14  ;;  %429 = vmatpush.msra.mxu3 %v4625_v12 }
  0x16   :  { %219 = vmatpush.msra.mxu0 %v63_v15  ;;  %260 = vmatpush.msra.mxu1 %v4646_v16 }
  0x17   :  { %344 = vmatpush.msra.mxu2 %v4646_v16  ;;  %430 = vmatpush.msra.mxu3 %v4635_v14 }
  0x18   :  { %220 = vmatpush.msra.mxu0 %v62_v17  ;;  %261 = vmatpush.msra.mxu1 %v4666_v19 }
  0x19   :  { %431 = vmatpush.msra.mxu3 %v4646_v16  ;;  %345 = vmatpush.msra.mxu2 %v4666_v19 }
  0x1a   :  { %221 = vmatpush.msra.mxu0 %v61_v18  ;;  %262 = vmatpush.msra.mxu1 %v4675_v21 }
  0x1b   :  { %432 = vmatpush.msra.mxu3 %v4666_v19  ;;  %346 = vmatpush.msra.mxu2 %v4675_v21 }
  0x1c   :  { %222 = vmatpush.msra.mxu0 %v60_v20  ;;  %263 = vmatpush.msra.mxu1 %v4686_v23 }
  0x1d   :  { %433 = vmatpush.msra.mxu3 %v4675_v21  ;;  %347 = vmatpush.msra.mxu2 %v4686_v23 }
  0x1e   :  { %223 = vmatpush.msra.mxu0 %v59_v22  ;;  %264 = vmatpush.msra.mxu1 %v4694_v25 }
  0x1f   :  { %434 = vmatpush.msra.mxu3 %v4686_v23  ;;  %348 = vmatpush.msra.mxu2 %v4694_v25 }
  0x20   :  { %224 = vmatpush.msra.mxu0 %v58_v24  ;;  %265 = vmatpush.msra.mxu1 %v4708_v27 }
  0x21   :  { %435 = vmatpush.msra.mxu3 %v4694_v25  ;;  %349 = vmatpush.msra.mxu2 %v4708_v27 }
  0x22   :  { %225 = vmatpush.msra.mxu0 %v57_v26  ;;  %266 = vmatpush.msra.mxu1 %v4719_v29 }
  0x23   :  { %436 = vmatpush.msra.mxu3 %v4708_v27  ;;  %350 = vmatpush.msra.mxu2 %v4719_v29 }
  0x24   :  { %226 = vmatpush.msra.mxu0 %v56_v28  ;;  %267 = vmatpush.msra.mxu1 %v4730_v31 }
  0x25   :  { %437 = vmatpush.msra.mxu3 %v4719_v29  ;;  %351 = vmatpush.msra.mxu2 %v4730_v31 }
  0x26   :  { %227 = vmatpush.msra.mxu0 %v55_v30  ;;  %268 = vmatpush.msra.mxu1 %v4738_v32 }
  0x27   :  { %438 = vmatpush.msra.mxu3 %v4730_v31  ;;  %269 = vmatmul.f32.vlgmr.msra.gmra.mxu1 %v4506_v33 }
  0x28   :  { %772 = vmatpush.msrb.mxu0 %v4576_v3  ;;  %352 = vmatpush.msra.mxu2 %v4738_v32 }
  0x29   :  { %439 = vmatpush.msra.mxu3 %v4738_v32  ;;  %511 = vmatpush.msrb.mxu1 %v4576_v3 }
  0x2a   :  { %598 = vmatpush.msrb.mxu2 %v4576_v3  ;;  %773 = vmatpush.msrb.mxu0 %v4582_v4 }
  0x2b   :  { %685 = vmatpush.msrb.mxu3 %v4576_v3  ;;  %512 = vmatpush.msrb.mxu1 %v4582_v4 }
  0x2c   :  { %599 = vmatpush.msrb.mxu2 %v4582_v4  ;;  %774 = vmatpush.msrb.mxu0 %v4590_v6 }
  0x2d   :  { %686 = vmatpush.msrb.mxu3 %v4582_v4  ;;  %513 = vmatpush.msrb.mxu1 %v4590_v6 }
  0x2e   :  { %600 = vmatpush.msrb.mxu2 %v4590_v6  ;;  %775 = vmatpush.msrb.mxu0 %v4601_v8 }
  0x2f   :  { %687 = vmatpush.msrb.mxu3 %v4590_v6  ;;  %514 = vmatpush.msrb.mxu1 %v4601_v8 }
  0x30   :  { %601 = vmatpush.msrb.mxu2 %v4601_v8  ;;  %776 = vmatpush.msrb.mxu0 %v4612_v10 }
  0x31   :  { %688 = vmatpush.msrb.mxu3 %v4601_v8  ;;  %515 = vmatpush.msrb.mxu1 %v4612_v10 }
  0x32   :  { %602 = vmatpush.msrb.mxu2 %v4612_v10  ;;  %777 = vmatpush.msrb.mxu0 %v4625_v12 }
  0x33   :  { %689 = vmatpush.msrb.mxu3 %v4612_v10  ;;  %516 = vmatpush.msrb.mxu1 %v4625_v12 }
  0x34   :  { %603 = vmatpush.msrb.mxu2 %v4625_v12  ;;  %778 = vmatpush.msrb.mxu0 %v4635_v14 }
  0x35   :  { %690 = vmatpush.msrb.mxu3 %v4625_v12  ;;  %517 = vmatpush.msrb.mxu1 %v4635_v14 }
  0x36   :  { %604 = vmatpush.msrb.mxu2 %v4635_v14  ;;  %779 = vmatpush.msrb.mxu0 %v4646_v16 }
  0x37   :  { %691 = vmatpush.msrb.mxu3 %v4635_v14  ;;  %518 = vmatpush.msrb.mxu1 %v4646_v16 }
  0x38   :  { %605 = vmatpush.msrb.mxu2 %v4646_v16  ;;  %780 = vmatpush.msrb.mxu0 %v4666_v19 }
  0x39   :  { %692 = vmatpush.msrb.mxu3 %v4646_v16  ;;  %519 = vmatpush.msrb.mxu1 %v4666_v19 }
  0x3a   :  { %606 = vmatpush.msrb.mxu2 %v4666_v19  ;;  %781 = vmatpush.msrb.mxu0 %v4675_v21 }
  0x3b   :  { %693 = vmatpush.msrb.mxu3 %v4666_v19  ;;  %520 = vmatpush.msrb.mxu1 %v4675_v21 }
  0x3c   :  { %607 = vmatpush.msrb.mxu2 %v4675_v21  ;;  %782 = vmatpush.msrb.mxu0 %v4686_v23 }
  0x3d   :  { %694 = vmatpush.msrb.mxu3 %v4675_v21  ;;  %521 = vmatpush.msrb.mxu1 %v4686_v23 }
  0x3e   :  { %608 = vmatpush.msrb.mxu2 %v4686_v23  ;;  %783 = vmatpush.msrb.mxu0 %v4694_v25 }
  0x3f   :  { %695 = vmatpush.msrb.mxu3 %v4686_v23  ;;  %522 = vmatpush.msrb.mxu1 %v4694_v25 }
  0x40   :  { %609 = vmatpush.msrb.mxu2 %v4694_v25  ;;  %784 = vmatpush.msrb.mxu0 %v4708_v27 }
  0x41   :  { %696 = vmatpush.msrb.mxu3 %v4694_v25  ;;  %523 = vmatpush.msrb.mxu1 %v4708_v27 }
  0x42   :  { %610 = vmatpush.msrb.mxu2 %v4708_v27  ;;  %785 = vmatpush.msrb.mxu0 %v4719_v29 }
  0x43   :  { %697 = vmatpush.msrb.mxu3 %v4708_v27  ;;  %524 = vmatpush.msrb.mxu1 %v4719_v29 }
  0x44   :  { %611 = vmatpush.msrb.mxu2 %v4719_v29  ;;  %786 = vmatpush.msrb.mxu0 %v4730_v31 }
  0x45   :  { %698 = vmatpush.msrb.mxu3 %v4719_v29  ;;  %525 = vmatpush.msrb.mxu1 %v4730_v31 }
  0x46   :  { %612 = vmatpush.msrb.mxu2 %v4730_v31  ;;  %787 = vmatpush.msrb.mxu0 %v4738_v32 }
  0x47   :  { %526 = vmatpush.msrb.mxu1 %v4738_v32  ;;  %699 = vmatpush.msrb.mxu3 %v4730_v31 }
  0x48   :  { %613 = vmatpush.msrb.mxu2 %v4738_v32  ;;  %4336 = vset.pattern.permute.xlu0 %v4507_v49 }
  0x49   :  { %700 = vmatpush.msrb.mxu3 %v4738_v32  ;;  %859 = vmatpush.msra.mxu1 %v4576_v3 }
  0x4a   :  { %4337 = vset.pattern.permute.xlu2 %v4507_v49  ;;  %315 = vperm.xlu0 %4336, %v312_v48  }
  0x4b   :  { %860 = vmatpush.msra.mxu1 %v4582_v4  ;;  %4338 = vset.pattern.permute.xlu1 %v4507_v49 }
  0x4d   :  { %861 = vmatpush.msra.mxu1 %v4590_v6  ;;  %v90_v6 = vld [vmem:[%s5837_s0 + $0x8] sm:$0xff] }
  0x4f   :  { %862 = vmatpush.msra.mxu1 %v4601_v8 }
  0x51   :  { %863 = vmatpush.msra.mxu1 %v4612_v10 }
  0x52   :  { %131 = vrot.lane.b32.xlu0 %v90_v6, %s4502_s29 }
  0x53   :  { %864 = vmatpush.msra.mxu1 %v4625_v12 }
  0x55   :  { %865 = vmatpush.msra.mxu1 %v4635_v14 }
  0x57   :  { %866 = vmatpush.msra.mxu1 %v4646_v16 }
  0x59   :  { %867 = vmatpush.msra.mxu1 %v4666_v19 }
  0x5b   :  { %868 = vmatpush.msra.mxu1 %v4675_v21 }
  0x5d   :  { %869 = vmatpush.msra.mxu1 %v4686_v23 }
  0x5f   :  { %870 = vmatpush.msra.mxu1 %v4694_v25 }
  0x61   :  { %871 = vmatpush.msra.mxu1 %v4708_v27 }
  0x63   :  { %872 = vmatpush.msra.mxu1 %v4719_v29 }
  0x65   :  { %873 = vmatpush.msra.mxu1 %v4730_v31 }
  0x67   :  { %874 = vmatpush.msra.mxu1 %v4738_v32 }
  0x79   :  { %v106_v34 = vpop.permute.xlu0 %105  ;;  %v154_v35 = vpop.permute.xlu1 %153 }
  0x7a   :  { %v178_v36 = vsel %vm177_vm0, %v4561_v0, %v106_v34 }
  0x81   :  { %v130_v37 = vpop.permute.xlu0 %129 }
  0x82   :  { %v187_v39 = vsel %vm186_vm1, %v178_v36, %v130_v37 }
  0x83   :  { %v196_v40 = vsel %vm195_vm2, %v187_v39, %v154_v35 }
  0x84   :  { %v204_v41 = vmul.f32 %v196_v40, %v4798_v38 }
  0x86   :  { %228 = vmatmul.f32.vlgmr.msra.gmra.mxu0 %v204_v41 }
  0xa4   :  { %v270_v44 = vpop.f32.mrf.mxu1 }
  0xbc   :  { %v4851_v9 = vpop.permute.xlu0 %315 }
  0xc4   :  { %v132_v20 = vpop.permute.xlu0 %131 }
 0x103   :  { %v229_v43 = vpop.f32.mrf.mxu0 }
 0x104   :  { %v230_v45 = vadd.f32 %v229_v43, %v4838_v42 }
 0x106   :  { %v273_v46 = vadd.f32 %v270_v44, %v230_v45 }
 0x108   :  { %v3247_v47 = vmul.f32 -1.442695, %v273_v46  ;;  %v3251_v46 = vld [vmem:[%s5838_s1 + $0x8] sm:$0xff] }
 0x10a   :  { %4339 = vpow2.f32 %v3247_v47 }
 0x110   :  { %v4340_v50 = vpop.eup %4339 }
 0x111   :  { %v277_v51 = vadd.f32 1.0, %v4340_v50 }
 0x113   :  { %4341 = vrcp.f32 %v277_v51  ;;  %v289_v55 = vand.u32 2147483648, %v277_v51  ;;  %v287_v57 = vand.u32 2147483647, %v277_v51  ;;  %vm283_vm4 = vweird.f32 %v277_v51 }
 0x115   :  { %v290_v59 = vor.u32 1.1754944e-38, %v289_v55  ;;  %vm288_vm6 = vcmp.eq.f32.partialorder %v287_v57, 8.507059e+37 }
 0x119   :  { %v4342_v52 = vpop.eup %4341 }
 0x11a   :  { %v279_v53 = vmul.f32 %v4342_v52, %v277_v51  ;;  %vm284_vm3 = vweird.f32 %v4342_v52 }
 0x11b   :  { %vm285_vm5 = vmor %vm283_vm4, %vm284_vm3 }
 0x11c   :  { %v280_v54 = vsub.f32 1.0, %v279_v53 }
 0x11e   :  { %v281_v56 = vmul.f32 %v4342_v52, %v280_v54 }
 0x120   :  { %v282_v58 = vadd.f32 %v4342_v52, %v281_v56 }
 0x122   :  { %v286_v60 = vsel %vm285_vm5, %v4342_v52, %v282_v58 }
 0x123   :  { %v291_v61 = vsel %vm288_vm6, %v290_v59, %v286_v60  ;;  %v91_v60 = vld [vmem:[%s5837_s0 + $0x10] sm:$0xff] }
 0x124   :  { %v293_v62 = vmul.f32 2.0, %v291_v61  ;;  %v295_v2 = vmul.f32 0.0, %v291_v61 }
 0x126   :  { %v3248_v63 = vadd.f32 -1.0, %v293_v62 }
 0x128   :  { %297 = vrot.lane.b32.xlu1 %v3248_v63, %s4502_s29 }
 0x19a   :  { %v298_v0 = vpop.permute.xlu1 %297 }
 0x19b   :  { %v300_v1 = vmul.f32 %v298_v0, %v291_v61 }
 0x19d   :  { %302 = vrot.lane.b32.xlu2 %v300_v1, %s4504_s6 }
 0x1f7   :  { %v303_v3 = vpop.permute.xlu2 %302 }
 0x1f8   :  { %v305_v4 = vadd.f32 %v303_v3, %v295_v2 }
 0x1fa   :  { %4343 = vtanh.f32 %v305_v4  ;;  %v4880_v49 = vmul.f32 %v4851_v9, %v305_v4 }
 0x200   :  { %v4344_v5 = vpop.eup %4343 }
 0x201   :  { %308 = vrot.lane.b32.xlu2 %v4344_v5, %s4502_s29 }
 0x25b   :  { %v309_v7 = vpop.permute.xlu2 %308 }
 0x25c   :  { %v311_v8 = vmul.f32 %v309_v7, %v291_v61 }
 0x25e   :  { %v4854_v10 = vmul.f32 %v4851_v9, %v311_v8 }
 0x260   :  { %327 = vrot.lane.b32.xlu2 %v4854_v10, %s4502_s29  ;;  %324 = vrot.lane.b32.xlu1 %v4854_v10, %s4504_s6 }
 0x268   :  { %330 = vrot.lane.b32.xlu1 %v4854_v10, %s4505_s12  ;;  %107 = vrot.lane.b32.xlu2 %v90_v6, %s4504_s6 }
 0x270   :  { %155 = vrot.lane.b32.xlu1 %v90_v6, %s4505_s12 }
 0x2ba   :  { %v328_v11 = vpop.permute.xlu2 %327 }
 0x2c2   :  { %v108_v15 = vpop.permute.xlu2 %107 }
 0x2c3   :  { %v179_v19 = vsel %vm177_vm0, %v90_v6, %v108_v15 }
 0x2c4   :  { %v188_v21 = vsel %vm186_vm1, %v179_v19, %v132_v20 }
 0x2d2   :  { %v325_v12 = vpop.permute.xlu1 %324 }
 0x2d3   :  { %v333_v13 = vsel %vm177_vm0, %v325_v12, %v328_v11 }
 0x2da   :  { %v331_v14 = vpop.permute.xlu1 %330 }
 0x2db   :  { %v334_v16 = vsel %vm186_vm1, %v333_v13, %v331_v14 }
 0x2dc   :  { %v335_v17 = vsel %vm195_vm2, %v334_v16, %v4854_v10 }
 0x2dd   :  { %v336_v18 = vmul.f32 %v335_v17, %v4798_v38 }
 0x2df   :  { %353 = vmatmul.f32.vlgmr.msra.gmra.mxu2 %v336_v18 }
 0x2e2   :  { %v156_v22 = vpop.permute.xlu1 %155 }
 0x2e3   :  { %v197_v23 = vsel %vm195_vm2, %v188_v21, %v156_v22 }
 0x2e4   :  { %v205_v24 = vmul.f32 %v197_v23, %v4798_v38 }
 0x2e6   :  { %231 = vmatmul.f32.gmra.mxu0 %v205_v24 }
 0x362   :  { %v354_v27 = vpop.f32.mrf.mxu2 }
 0x363   :  { %v232_v25 = vpop.f32.mrf.mxu0 }
 0x364   :  { %v233_v26 = vadd.f32 %v232_v25, %v4838_v42 }
 0x366   :  { %v357_v28 = vadd.f32 %v354_v27, %v233_v26 }
 0x368   :  { %v3249_v29 = vmul.f32 -1.442695, %v357_v28 }
 0x36a   :  { %4345 = vpow2.f32 %v3249_v29 }
 0x370   :  { %v4346_v30 = vpop.eup %4345 }
 0x371   :  { %v361_v31 = vadd.f32 1.0, %v4346_v30 }
 0x373   :  { %4347 = vrcp.f32 %v361_v31  ;;  %v373_v35 = vand.u32 2147483648, %v361_v31  ;;  %v371_v37 = vand.u32 2147483647, %v361_v31  ;;  %vm367_vm8 = vweird.f32 %v361_v31 }
 0x375   :  { %v374_v40 = vor.u32 1.1754944e-38, %v373_v35  ;;  %vm372_vm10 = vcmp.eq.f32.partialorder %v371_v37, 8.507059e+37  ;;  %v92_v35 = vld [vmem:[%s5837_s0 + $0x18] sm:$0xff] }
 0x379   :  { %v4348_v32 = vpop.eup %4347 }
 0x37a   :  { %v363_v33 = vmul.f32 %v4348_v32, %v361_v31  ;;  %vm368_vm7 = vweird.f32 %v4348_v32 }
 0x37b   :  { %vm369_vm9 = vmor %vm367_vm8, %vm368_vm7 }
 0x37c   :  { %v364_v34 = vsub.f32 1.0, %v363_v33 }
 0x37e   :  { %v365_v36 = vmul.f32 %v4348_v32, %v364_v34 }
 0x380   :  { %v366_v39 = vadd.f32 %v4348_v32, %v365_v36 }
 0x382   :  { %v370_v41 = vsel %vm369_vm9, %v4348_v32, %v366_v39  ;;  %v3254_v32 = vld [vmem:[%s5838_s1 + $0x10] sm:$0xff] }
 0x383   :  { %v375_v43 = vsel %vm372_vm10, %v374_v40, %v370_v41 }
 0x384   :  { %v377_v44 = vmul.f32 2.0, %v375_v43  ;;  %v379_v50 = vmul.f32 %v375_v43, %v4880_v49 }
 0x386   :  { %v3250_v45 = vadd.f32 -1.0, %v377_v44 }
 0x388   :  { %381 = vrot.lane.b32.xlu2 %v3250_v45, %s4502_s29 }
 0x390   :  { %401 = vperm.xlu2 %4337, %v3251_v46  }
 0x3e2   :  { %v382_v47 = vpop.permute.xlu2 %381 }
 0x3e3   :  { %v384_v48 = vmul.f32 %v382_v47, %v375_v43 }
 0x3e5   :  { %386 = vrot.lane.b32.xlu0 %v384_v48, %s4504_s6 }
 0x3ea   :  { %v4888_v57 = vpop.permute.xlu2 %401 }
 0x457   :  { %v387_v51 = vpop.permute.xlu0 %386 }
 0x458   :  { %v4883_v52 = vadd.f32 %v387_v51, %v379_v50 }
 0x45a   :  { %4349 = vtanh.f32 %v4883_v52  ;;  %v406_v36 = vsub.f32 %v4883_v52, %v4880_v49 }
 0x45c   :  { %v407_v37 = vmul.f32 %v406_v36, %v4888_v57 }
 0x45e   :  { %v4930_v39 = vadd.f32 %v407_v37, %v4880_v49 }
 0x460   :  { %v4350_v53 = vpop.eup %4349 }
 0x461   :  { %392 = vrot.lane.b32.xlu1 %v4350_v53, %s4502_s29 }
 0x4d3   :  { %v393_v54 = vpop.permute.xlu1 %392 }
 0x4d4   :  { %v395_v55 = vmul.f32 %v393_v54, %v375_v43 }
 0x4d6   :  { %v398_v56 = vsub.f32 %v395_v55, %v4854_v10 }
 0x4d8   :  { %v404_v58 = vmul.f32 %v4888_v57, %v398_v56 }
 0x4da   :  { %v4892_v59 = vadd.f32 %v404_v58, %v4854_v10 }
 0x4dc   :  { %417 = vrot.lane.b32.xlu2 %v4892_v59, %s4505_s12  ;;  %414 = vrot.lane.b32.xlu1 %v4892_v59, %s4502_s29 }
 0x4dd   :  { %411 = vrot.lane.b32.xlu0 %v4892_v59, %s4504_s6 }
 0x4e4   :  { %133 = vrot.lane.b32.xlu1 %v91_v60, %s4502_s29  ;;  %157 = vrot.lane.b32.xlu2 %v91_v60, %s4505_s12 }
 0x4e5   :  { %109 = vrot.lane.b32.xlu0 %v91_v60, %s4504_s6 }
 0x536   :  { %v418_v62 = vpop.permute.xlu2 %417 }
 0x53e   :  { %v158_v6 = vpop.permute.xlu2 %157 }
 0x54e   :  { %v415_v61 = vpop.permute.xlu1 %414 }
 0x54f   :  { %v412_v63 = vpop.permute.xlu0 %411 }
 0x550   :  { %v420_v0 = vsel %vm177_vm0, %v412_v63, %v415_v61 }
 0x551   :  { %v421_v1 = vsel %vm186_vm1, %v420_v0, %v418_v62 }
 0x552   :  { %v422_v2 = vsel %vm195_vm2, %v421_v1, %v4892_v59 }
 0x553   :  { %v423_v3 = vmul.f32 %v422_v2, %v4798_v38 }
 0x555   :  { %440 = vmatmul.f32.vlgmr.msra.gmra.mxu3 %v423_v3 }
 0x556   :  { %v134_v4 = vpop.permute.xlu1 %133 }
 0x557   :  { %v110_v5 = vpop.permute.xlu0 %109 }
 0x558   :  { %v180_v7 = vsel %vm177_vm0, %v91_v60, %v110_v5 }
 0x559   :  { %v189_v8 = vsel %vm186_vm1, %v180_v7, %v134_v4 }
 0x55a   :  { %v198_v11 = vsel %vm195_vm2, %v189_v8, %v158_v6 }
 0x55b   :  { %v206_v12 = vmul.f32 %v198_v11, %v4798_v38 }
 0x55d   :  { %234 = vmatmul.f32.gmra.mxu0 %v206_v12 }
 0x5d8   :  { %v441_v15 = vpop.f32.mrf.mxu3 }
 0x5da   :  { %v235_v13 = vpop.f32.mrf.mxu0 }
 0x5db   :  { %v236_v14 = vadd.f32 %v235_v13, %v4838_v42 }
 0x5dd   :  { %v444_v16 = vadd.f32 %v441_v15, %v236_v14 }
 0x5df   :  { %v3252_v17 = vmul.f32 -1.442695, %v444_v16 }
 0x5e1   :  { %4351 = vpow2.f32 %v3252_v17 }
 0x5e7   :  { %v4352_v18 = vpop.eup %4351 }
 0x5e8   :  { %v448_v19 = vadd.f32 1.0, %v4352_v18 }
 0x5ea   :  { %4353 = vrcp.f32 %v448_v19  ;;  %v460_v23 = vand.u32 2147483648, %v448_v19  ;;  %v458_v25 = vand.u32 2147483647, %v448_v19  ;;  %vm454_vm12 = vweird.f32 %v448_v19 }
 0x5ec   :  { %v461_v27 = vor.u32 1.1754944e-38, %v460_v23  ;;  %vm459_vm14 = vcmp.eq.f32.partialorder %v458_v25, 8.507059e+37 }
 0x5f0   :  { %v4354_v20 = vpop.eup %4353 }
 0x5f1   :  { %v450_v21 = vmul.f32 %v4354_v20, %v448_v19  ;;  %vm455_vm11 = vweird.f32 %v4354_v20 }
 0x5f2   :  { %vm456_vm13 = vmor %vm454_vm12, %vm455_vm11 }
 0x5f3   :  { %v451_v22 = vsub.f32 1.0, %v450_v21 }
 0x5f5   :  { %v452_v24 = vmul.f32 %v4354_v20, %v451_v22 }
 0x5f7   :  { %v453_v26 = vadd.f32 %v4354_v20, %v452_v24  ;;  %v3257_v24 = vld [vmem:[%s5838_s1 + $0x18] sm:$0xff] }
 0x5f9   :  { %v457_v28 = vsel %vm456_vm13, %v4354_v20, %v453_v26 }
 0x5fa   :  { %v462_v29 = vsel %vm459_vm14, %v461_v27, %v457_v28 }
 0x5fb   :  { %v464_v30 = vmul.f32 2.0, %v462_v29  ;;  %v466_v40 = vmul.f32 %v462_v29, %v4930_v39 }
 0x5fd   :  { %v3253_v31 = vadd.f32 -1.0, %v464_v30 }
 0x5ff   :  { %468 = vrot.lane.b32.xlu0 %v3253_v31, %s4502_s29 }
 0x607   :  { %488 = vperm.xlu0 %4336, %v3254_v32  }
 0x60f   :  { %159 = vrot.lane.b32.xlu0 %v92_v35, %s4505_s12 }
 0x671   :  { %v469_v33 = vpop.permute.xlu0 %468 }
 0x672   :  { %v471_v34 = vmul.f32 %v469_v33, %v462_v29 }
 0x674   :  { %473 = vrot.lane.b32.xlu1 %v471_v34, %s4504_s6 }
 0x679   :  { %v4939_v48 = vpop.permute.xlu0 %488 }
 0x67c   :  { %111 = vrot.lane.b32.xlu1 %v92_v35, %s4504_s6 }
 0x681   :  { %v160_v52 = vpop.permute.xlu0 %159 }
 0x6e6   :  { %v474_v41 = vpop.permute.xlu1 %473 }
 0x6e7   :  { %v4933_v43 = vadd.f32 %v474_v41, %v466_v40  ;;  %v93_v41 = vld [vmem:[%s5837_s0 + $0x20] sm:$0xff] }
 0x6e9   :  { %4355 = vtanh.f32 %v4933_v43  ;;  %v493_v27 = vsub.f32 %v4933_v43, %v4930_v39 }
 0x6eb   :  { %v494_v28 = vmul.f32 %v493_v27, %v4939_v48 }
 0x6ee   :  { %v112_v51 = vpop.permute.xlu1 %111 }
 0x6ef   :  { %v4356_v44 = vpop.eup %4355  ;;  %v181_v54 = vsel %vm177_vm0, %v92_v35, %v112_v51 }
 0x6f0   :  { %479 = vrot.lane.b32.xlu2 %v4356_v44, %s4502_s29 }
 0x6f8   :  { %135 = vrot.lane.b32.xlu2 %v92_v35, %s4502_s29 }
 0x74a   :  { %v480_v45 = vpop.permute.xlu2 %479 }
 0x74b   :  { %v482_v46 = vmul.f32 %v480_v45, %v462_v29  ;;  %v4970_v29 = vadd.f32 %v494_v28, %v4930_v39 }
 0x74d   :  { %v485_v47 = vsub.f32 %v482_v46, %v4892_v59 }
 0x74f   :  { %v491_v49 = vmul.f32 %v4939_v48, %v485_v47 }
 0x751   :  { %v4943_v50 = vadd.f32 %v491_v49, %v4892_v59 }
 0x752   :  { %v136_v53 = vpop.permute.xlu2 %135 }
 0x753   :  { %504 = vrot.lane.b32.xlu0 %v4943_v50, %s4505_s12  ;;  %501 = vrot.lane.b32.xlu2 %v4943_v50, %s4502_s29  ;;  %v190_v55 = vsel %vm186_vm1, %v181_v54, %v136_v53 }
 0x754   :  { %498 = vrot.lane.b32.xlu1 %v4943_v50, %s4504_s6  ;;  %v199_v56 = vsel %vm195_vm2, %v190_v55, %v160_v52 }
 0x755   :  { %v207_v58 = vmul.f32 %v199_v56, %v4798_v38 }
 0x757   :  { %237 = vmatmul.f32.gmra.mxu0 %v207_v58 }
 0x7ad   :  { %v502_v61 = vpop.permute.xlu2 %501 }
 0x7c5   :  { %v505_v60 = vpop.permute.xlu0 %504 }
 0x7c6   :  { %v499_v62 = vpop.permute.xlu1 %498 }
 0x7c7   :  { %v507_v63 = vsel %vm177_vm0, %v499_v62, %v502_v61 }
 0x7c8   :  { %v508_v0 = vsel %vm186_vm1, %v507_v63, %v505_v60 }
 0x7c9   :  { %v509_v1 = vsel %vm195_vm2, %v508_v0, %v4943_v50 }
 0x7ca   :  { %v510_v2 = vmul.f32 %v509_v1, %v4798_v38 }
 0x7cc   :  { %527 = vmatmul.f32.vlgmr.msrb.gmra.mxu1 %v510_v2 }
 0x7d4   :  { %v238_v3 = vpop.f32.mrf.mxu0 }
 0x7d5   :  { %v239_v4 = vadd.f32 %v238_v3, %v4838_v42 }
 0x849   :  { %v528_v5 = vpop.f32.mrf.mxu1 }
 0x84a   :  { %v531_v6 = vadd.f32 %v528_v5, %v239_v4 }
 0x84c   :  { %v3255_v7 = vmul.f32 -1.442695, %v531_v6 }
 0x84e   :  { %4357 = vpow2.f32 %v3255_v7 }
 0x854   :  { %v4358_v8 = vpop.eup %4357 }
 0x855   :  { %v535_v11 = vadd.f32 1.0, %v4358_v8 }
 0x857   :  { %4359 = vrcp.f32 %v535_v11  ;;  %v547_v15 = vand.u32 2147483648, %v535_v11  ;;  %v545_v17 = vand.u32 2147483647, %v535_v11  ;;  %vm541_vm3 = vweird.f32 %v535_v11 }
 0x859   :  { %v548_v19 = vor.u32 1.1754944e-38, %v547_v15  ;;  %vm546_vm5 = vcmp.eq.f32.partialorder %v545_v17, 8.507059e+37 }
 0x85d   :  { %v4360_v12 = vpop.eup %4359 }
 0x85e   :  { %v537_v13 = vmul.f32 %v4360_v12, %v535_v11  ;;  %vm542_vm15 = vweird.f32 %v4360_v12 }
 0x85f   :  { %vm543_vm4 = vmor %vm541_vm3, %vm542_vm15 }
 0x860   :  { %v538_v14 = vsub.f32 1.0, %v537_v13 }
 0x862   :  { %v539_v16 = vmul.f32 %v4360_v12, %v538_v14 }
 0x864   :  { %v540_v18 = vadd.f32 %v4360_v12, %v539_v16 }
 0x866   :  { %v544_v20 = vsel %vm543_vm4, %v4360_v12, %v540_v18  ;;  %v3260_v18 = vld [vmem:[%s5838_s1 + $0x20] sm:$0xff] }
 0x867   :  { %v549_v21 = vsel %vm546_vm5, %v548_v19, %v544_v20 }
 0x868   :  { %v551_v22 = vmul.f32 2.0, %v549_v21  ;;  %v553_v30 = vmul.f32 %v549_v21, %v4970_v29 }
 0x86a   :  { %v3256_v23 = vadd.f32 -1.0, %v551_v22 }
 0x86c   :  { %555 = vrot.lane.b32.xlu1 %v3256_v23, %s4502_s29 }
 0x874   :  { %575 = vperm.xlu1 %4338, %v3257_v24  }
 0x8de   :  { %v556_v25 = vpop.permute.xlu1 %555 }
 0x8df   :  { %v558_v26 = vmul.f32 %v556_v25, %v549_v21 }
 0x8e1   :  { %560 = vrot.lane.b32.xlu2 %v558_v26, %s4504_s6 }
 0x8e6   :  { %v4978_v37 = vpop.permute.xlu1 %575 }
 0x93b   :  { %v561_v31 = vpop.permute.xlu2 %560 }
 0x93c   :  { %v4973_v32 = vadd.f32 %v561_v31, %v553_v30 }
 0x93e   :  { %4361 = vtanh.f32 %v4973_v32 }
 0x944   :  { %v4362_v33 = vpop.eup %4361 }
 0x945   :  { %566 = vrot.lane.b32.xlu0 %v4362_v33, %s4502_s29 }
 0x9b7   :  { %v567_v34 = vpop.permute.xlu0 %566 }
 0x9b8   :  { %v569_v35 = vmul.f32 %v567_v34, %v549_v21  ;;  %v580_v21 = vsub.f32 %v4973_v32, %v4970_v29  ;;  %v94_v34 = vld [vmem:[%s5837_s0 + $0x28] sm:$0xff] }
 0x9ba   :  { %v572_v36 = vsub.f32 %v569_v35, %v4943_v50  ;;  %v581_v22 = vmul.f32 %v580_v21, %v4978_v37 }
 0x9bc   :  { %v578_v40 = vmul.f32 %v4978_v37, %v572_v36  ;;  %v5015_v23 = vadd.f32 %v581_v22, %v4970_v29 }
 0x9be   :  { %v4982_v39 = vadd.f32 %v578_v40, %v4943_v50 }
 0x9c0   :  { %591 = vrot.lane.b32.xlu1 %v4982_v39, %s4505_s12  ;;  %588 = vrot.lane.b32.xlu0 %v4982_v39, %s4502_s29 }
 0x9c1   :  { %585 = vrot.lane.b32.xlu2 %v4982_v39, %s4504_s6 }
 0x9c8   :  { %137 = vrot.lane.b32.xlu0 %v93_v41, %s4502_s29  ;;  %161 = vrot.lane.b32.xlu1 %v93_v41, %s4505_s12 }
 0x9c9   :  { %113 = vrot.lane.b32.xlu2 %v93_v41, %s4504_s6 }
 0xa1b   :  { %v586_v43 = vpop.permute.xlu2 %585 }
 0xa23   :  { %v114_v51 = vpop.permute.xlu2 %113 }
 0xa24   :  { %v182_v53 = vsel %vm177_vm0, %v93_v41, %v114_v51 }
 0xa32   :  { %v592_v44 = vpop.permute.xlu1 %591  ;;  %v589_v45 = vpop.permute.xlu0 %588 }
 0xa33   :  { %v594_v46 = vsel %vm177_vm0, %v586_v43, %v589_v45 }
 0xa34   :  { %v595_v47 = vsel %vm186_vm1, %v594_v46, %v592_v44 }
 0xa35   :  { %v596_v49 = vsel %vm195_vm2, %v595_v47, %v4982_v39 }
 0xa36   :  { %v597_v52 = vmul.f32 %v596_v49, %v4798_v38 }
 0xa38   :  { %614 = vmatmul.f32.vlgmr.msrb.gmra.mxu2 %v597_v52 }
 0xa3a   :  { %v138_v54 = vpop.permute.xlu0 %137  ;;  %v162_v55 = vpop.permute.xlu1 %161 }
 0xa3b   :  { %v191_v56 = vsel %vm186_vm1, %v182_v53, %v138_v54 }
 0xa3c   :  { %v200_v58 = vsel %vm195_vm2, %v191_v56, %v162_v55 }
 0xa3d   :  { %v208_v60 = vmul.f32 %v200_v58, %v4798_v38 }
 0xa3f   :  { %240 = vmatmul.f32.gmra.mxu0 %v208_v60 }
 0xabb   :  { %v615_v63 = vpop.f32.mrf.mxu2 }
 0xabc   :  { %v241_v61 = vpop.f32.mrf.mxu0 }
 0xabd   :  { %v242_v62 = vadd.f32 %v241_v61, %v4838_v42 }
 0xabf   :  { %v618_v0 = vadd.f32 %v615_v63, %v242_v62 }
 0xac1   :  { %v3258_v1 = vmul.f32 -1.442695, %v618_v0 }
 0xac3   :  { %4363 = vpow2.f32 %v3258_v1 }
 0xac9   :  { %v4364_v2 = vpop.eup %4363 }
 0xaca   :  { %v622_v3 = vadd.f32 1.0, %v4364_v2 }
 0xacc   :  { %4365 = vrcp.f32 %v622_v3  ;;  %v634_v7 = vand.u32 2147483648, %v622_v3  ;;  %v632_v11 = vand.u32 2147483647, %v622_v3  ;;  %vm628_vm7 = vweird.f32 %v622_v3 }
 0xace   :  { %v635_v13 = vor.u32 1.1754944e-38, %v634_v7  ;;  %vm633_vm9 = vcmp.eq.f32.partialorder %v632_v11, 8.507059e+37 }
 0xad2   :  { %v4366_v4 = vpop.eup %4365 }
 0xad3   :  { %v624_v5 = vmul.f32 %v4366_v4, %v622_v3  ;;  %vm629_vm6 = vweird.f32 %v4366_v4 }
 0xad4   :  { %vm630_vm8 = vmor %vm628_vm7, %vm629_vm6 }
 0xad5   :  { %v625_v6 = vsub.f32 1.0, %v624_v5 }
 0xad7   :  { %v626_v8 = vmul.f32 %v4366_v4, %v625_v6 }
 0xad9   :  { %v627_v12 = vadd.f32 %v4366_v4, %v626_v8 }
 0xadb   :  { %v631_v14 = vsel %vm630_vm8, %v4366_v4, %v627_v12  ;;  %vm1002_vm8 = vcmask 1047556  }
 0xadc   :  { %v636_v15 = vsel %vm633_vm9, %v635_v13, %v631_v14  ;;  %v3263_v14 = vld [vmem:[%s5838_s1 + $0x28] sm:$0xff] }
 0xadd   :  { %v638_v16 = vmul.f32 2.0, %v636_v15  ;;  %v640_v24 = vmul.f32 %v636_v15, %v5015_v23 }
 0xadf   :  { %v3259_v17 = vadd.f32 -1.0, %v638_v16 }
 0xae1   :  { %642 = vrot.lane.b32.xlu2 %v3259_v17, %s4502_s29  ;;  %v95_v17 = vld [vmem:[%s5837_s0 + $0x30] sm:$0xff] }
 0xae9   :  { %662 = vperm.xlu2 %4337, %v3260_v18   ;;  %v96_v18 = vld [vmem:[%s5837_s0 + $0x38] sm:$0xff] }
 0xb3b   :  { %v643_v19 = vpop.permute.xlu2 %642 }
 0xb3c   :  { %v645_v20 = vmul.f32 %v643_v19, %v636_v15 }
 0xb3e   :  { %647 = vrot.lane.b32.xlu0 %v645_v20, %s4504_s6 }
 0xb43   :  { %v5023_v32 = vpop.permute.xlu2 %662 }
 0xbb0   :  { %v648_v25 = vpop.permute.xlu0 %647 }
 0xbb1   :  { %v5018_v26 = vadd.f32 %v648_v25, %v640_v24 }
 0xbb3   :  { %4367 = vtanh.f32 %v5018_v26  ;;  %v667_v19 = vsub.f32 %v5018_v26, %v5015_v23 }
 0xbb5   :  { %v668_v20 = vmul.f32 %v667_v19, %v5023_v32 }
 0xbb7   :  { %v5070_v21 = vadd.f32 %v668_v20, %v5015_v23  ;;  %v3266_v20 = vld [vmem:[%s5838_s1 + $0x30] sm:$0xff] }
 0xbb9   :  { %v4368_v27 = vpop.eup %4367 }
 0xbba   :  { %653 = vrot.lane.b32.xlu1 %v4368_v27, %s4502_s29 }
 0xc2c   :  { %v654_v28 = vpop.permute.xlu1 %653 }
 0xc2d   :  { %v656_v30 = vmul.f32 %v654_v28, %v636_v15 }
 0xc2f   :  { %v659_v31 = vsub.f32 %v656_v30, %v4982_v39 }
 0xc31   :  { %v665_v33 = vmul.f32 %v5023_v32, %v659_v31 }
 0xc33   :  { %v5027_v29 = vadd.f32 %v665_v33, %v4982_v39 }
 0xc35   :  { %678 = vrot.lane.b32.xlu2 %v5027_v29, %s4505_s12  ;;  %675 = vrot.lane.b32.xlu1 %v5027_v29, %s4502_s29 }
 0xc36   :  { %672 = vrot.lane.b32.xlu0 %v5027_v29, %s4504_s6 }
 0xc3d   :  { %139 = vrot.lane.b32.xlu1 %v94_v34, %s4502_s29  ;;  %163 = vrot.lane.b32.xlu2 %v94_v34, %s4505_s12 }
 0xc3e   :  { %115 = vrot.lane.b32.xlu0 %v94_v34, %s4504_s6 }
 0xc8f   :  { %v679_v36 = vpop.permute.xlu2 %678 }
 0xc97   :  { %v164_v49 = vpop.permute.xlu2 %163 }
 0xca7   :  { %v676_v35 = vpop.permute.xlu1 %675 }
 0xca8   :  { %v673_v40 = vpop.permute.xlu0 %672 }
 0xca9   :  { %v681_v41 = vsel %vm177_vm0, %v673_v40, %v676_v35 }
 0xcaa   :  { %v682_v43 = vsel %vm186_vm1, %v681_v41, %v679_v36 }
 0xcab   :  { %v683_v44 = vsel %vm195_vm2, %v682_v43, %v5027_v29 }
 0xcac   :  { %v684_v45 = vmul.f32 %v683_v44, %v4798_v38 }
 0xcae   :  { %701 = vmatmul.f32.vlgmr.msrb.gmra.mxu3 %v684_v45 }
 0xcaf   :  { %v140_v46 = vpop.permute.xlu1 %139 }
 0xcb0   :  { %v116_v47 = vpop.permute.xlu0 %115 }
 0xcb1   :  { %v183_v51 = vsel %vm177_vm0, %v94_v34, %v116_v47 }
 0xcb2   :  { %v192_v52 = vsel %vm186_vm1, %v183_v51, %v140_v46 }
 0xcb3   :  { %v201_v53 = vsel %vm195_vm2, %v192_v52, %v164_v49 }
 0xcb4   :  { %v209_v54 = vmul.f32 %v201_v53, %v4798_v38 }
 0xcb6   :  { %243 = vmatmul.f32.gmra.mxu0 %v209_v54 }
 0xd31   :  { %v702_v58 = vpop.f32.mrf.mxu3 }
 0xd33   :  { %v244_v55 = vpop.f32.mrf.mxu0 }
 0xd34   :  { %v245_v56 = vadd.f32 %v244_v55, %v4838_v42 }
 0xd36   :  { %v705_v60 = vadd.f32 %v702_v58, %v245_v56 }
 0xd38   :  { %v3261_v61 = vmul.f32 -1.442695, %v705_v60 }
 0xd3a   :  { %4369 = vpow2.f32 %v3261_v61 }
 0xd40   :  { %v4370_v62 = vpop.eup %4369 }
 0xd41   :  { %v709_v63 = vadd.f32 1.0, %v4370_v62 }
 0xd43   :  { %4371 = vrcp.f32 %v709_v63  ;;  %v721_v3 = vand.u32 2147483648, %v709_v63  ;;  %v719_v5 = vand.u32 2147483647, %v709_v63  ;;  %vm715_vm11 = vweird.f32 %v709_v63 }
 0xd45   :  { %v722_v7 = vor.u32 1.1754944e-38, %v721_v3  ;;  %vm720_vm13 = vcmp.eq.f32.partialorder %v719_v5, 8.507059e+37 }
 0xd49   :  { %v4372_v0 = vpop.eup %4371 }
 0xd4a   :  { %v711_v1 = vmul.f32 %v4372_v0, %v709_v63  ;;  %vm716_vm10 = vweird.f32 %v4372_v0 }
 0xd4b   :  { %vm717_vm12 = vmor %vm715_vm11, %vm716_vm10 }
 0xd4c   :  { %v712_v2 = vsub.f32 1.0, %v711_v1 }
 0xd4e   :  { %v713_v4 = vmul.f32 %v4372_v0, %v712_v2 }
 0xd50   :  { %v714_v6 = vadd.f32 %v4372_v0, %v713_v4 }
 0xd52   :  { %v718_v8 = vsel %vm717_vm12, %v4372_v0, %v714_v6 }
 0xd53   :  { %v723_v11 = vsel %vm720_vm13, %v722_v7, %v718_v8 }
 0xd54   :  { %v725_v12 = vmul.f32 2.0, %v723_v11  ;;  %v727_v22 = vmul.f32 %v723_v11, %v5070_v21 }
 0xd56   :  { %v3262_v13 = vadd.f32 -1.0, %v725_v12 }
 0xd58   :  { %729 = vrot.lane.b32.xlu0 %v3262_v13, %s4502_s29 }
 0xd60   :  { %749 = vperm.xlu0 %4336, %v3263_v14  }
 0xd68   :  { %165 = vrot.lane.b32.xlu0 %v95_v17, %s4505_s12 }
 0xd70   :  { %167 = vrot.lane.b32.xlu0 %v96_v18, %s4505_s12 }
 0xdca   :  { %v730_v15 = vpop.permute.xlu0 %729 }
 0xdcb   :  { %v732_v16 = vmul.f32 %v730_v15, %v723_v11 }
 0xdcd   :  { %734 = vrot.lane.b32.xlu1 %v732_v16, %s4504_s6 }
 0xdd2   :  { %v5080_v23 = vpop.permute.xlu0 %749 }
 0xdd5   :  { %117 = vrot.lane.b32.xlu1 %v95_v17, %s4504_s6 }
 0xdda   :  { %v166_v36 = vpop.permute.xlu0 %165 }
 0xddd   :  { %119 = vrot.lane.b32.xlu1 %v96_v18, %s4504_s6 }
 0xde2   :  { %v168_v46 = vpop.permute.xlu0 %167 }
 0xe3f   :  { %v735_v24 = vpop.permute.xlu1 %734 }
 0xe40   :  { %v5073_v25 = vadd.f32 %v735_v24, %v727_v22 }
 0xe42   :  { %4373 = vtanh.f32 %v5073_v25 }
 0xe47   :  { %v118_v35 = vpop.permute.xlu1 %117 }
 0xe48   :  { %v4374_v27 = vpop.eup %4373  ;;  %v184_v40 = vsel %vm177_vm0, %v95_v17, %v118_v35 }
 0xe49   :  { %740 = vrot.lane.b32.xlu2 %v4374_v27, %s4502_s29  ;;  %v754_v27 = vsub.f32 %v5073_v25, %v5070_v21 }
 0xe4f   :  { %v120_v45 = vpop.permute.xlu1 %119 }
 0xe50   :  { %v185_v49 = vsel %vm177_vm0, %v96_v18, %v120_v45 }
 0xe51   :  { %141 = vrot.lane.b32.xlu2 %v95_v17, %s4502_s29 }
 0xe59   :  { %143 = vrot.lane.b32.xlu2 %v96_v18, %s4502_s29 }
 0xea3   :  { %v741_v26 = vpop.permute.xlu2 %740 }
 0xea4   :  { %v743_v28 = vmul.f32 %v741_v26, %v723_v11  ;;  %v755_v26 = vmul.f32 %v754_v27, %v5080_v23 }
 0xea6   :  { %v746_v30 = vsub.f32 %v743_v28, %v5027_v29  ;;  %v5115_v28 = vadd.f32 %v755_v26, %v5070_v21 }
 0xea8   :  { %v752_v31 = vmul.f32 %v5080_v23, %v746_v30 }
 0xeaa   :  { %v5084_v33 = vadd.f32 %v752_v31, %v5027_v29 }
 0xeab   :  { %v142_v34 = vpop.permute.xlu2 %141 }
 0xeac   :  { %765 = vrot.lane.b32.xlu0 %v5084_v33, %s4505_s12  ;;  %762 = vrot.lane.b32.xlu2 %v5084_v33, %s4502_s29  ;;  %v193_v41 = vsel %vm186_vm1, %v184_v40, %v142_v34 }
 0xead   :  { %759 = vrot.lane.b32.xlu1 %v5084_v33, %s4504_s6  ;;  %v202_v43 = vsel %vm195_vm2, %v193_v41, %v166_v36 }
 0xeae   :  { %v210_v44 = vmul.f32 %v202_v43, %v4798_v38 }
 0xeb0   :  { %246 = vmatmul.f32.gmra.mxu0 %v210_v44 }
 0xeb3   :  { %v144_v47 = vpop.permute.xlu2 %143 }
 0xeb4   :  { %v194_v51 = vsel %vm186_vm1, %v185_v49, %v144_v47 }
 0xeb5   :  { %v203_v52 = vsel %vm195_vm2, %v194_v51, %v168_v46 }
 0xeb6   :  { %v211_v53 = vmul.f32 %v203_v52, %v4798_v38  ;;  %v4421_v52 = vld [vmem:[%s5839_s2 + $0x108] sm:$0xff] }
 0xeb8   :  { %249 = vmatmul.f32.gmra.mxu0 %v211_v53 }
 0xf06   :  { %v763_v55 = vpop.permute.xlu2 %762 }
 0xf1e   :  { %v766_v54 = vpop.permute.xlu0 %765 }
 0xf1f   :  { %v760_v56 = vpop.permute.xlu1 %759 }
 0xf20   :  { %v768_v58 = vsel %vm177_vm0, %v760_v56, %v763_v55 }
 0xf21   :  { %v769_v60 = vsel %vm186_vm1, %v768_v58, %v766_v54 }
 0xf22   :  { %v770_v61 = vsel %vm195_vm2, %v769_v60, %v5084_v33 }
 0xf23   :  { %v771_v62 = vmul.f32 %v770_v61, %v4798_v38 }
 0xf25   :  { %788 = vmatmul.f32.vlgmr.msrb.gmra.mxu0 %v771_v62 }
 0xf2d   :  { %v247_v63 = vpop.f32.mrf.mxu0 }
 0xf2e   :  { %v248_v1 = vadd.f32 %v247_v63, %v4838_v42 }
 0xf35   :  { %v250_v0 = vpop.f32.mrf.mxu0 }
 0xf36   :  { %v251_v54 = vadd.f32 %v250_v0, %v4838_v42 }
 0xfa2   :  { %v789_v2 = vpop.f32.mrf.mxu0 }
 0xfa3   :  { %v792_v3 = vadd.f32 %v789_v2, %v248_v1 }
 0xfa5   :  { %v3264_v4 = vmul.f32 -1.442695, %v792_v3 }
 0xfa7   :  { %4375 = vpow2.f32 %v3264_v4 }
 0xfad   :  { %v4376_v5 = vpop.eup %4375 }
 0xfae   :  { %v796_v6 = vadd.f32 1.0, %v4376_v5 }
 0xfb0   :  { %4377 = vrcp.f32 %v796_v6  ;;  %v808_v12 = vand.u32 2147483648, %v796_v6  ;;  %v806_v14 = vand.u32 2147483647, %v796_v6  ;;  %vm802_vm15 = vweird.f32 %v796_v6 }
 0xfb2   :  { %v809_v15 = vor.u32 1.1754944e-38, %v808_v12  ;;  %vm807_vm4 = vcmp.eq.f32.partialorder %v806_v14, 8.507059e+37  ;;  %v757_v14 = vmul.f32 %v5084_v33, %v5080_v23  ;;  %v322_v23 = vmul.f32 %v4854_v10, %v4851_v9 }
 0xfb4   :  { %v954_v27 = vrot.slane %v757_v14, 4 }
 0xfb6   :  { %v4378_v7 = vpop.eup %4377 }
 0xfb7   :  { %v798_v8 = vmul.f32 %v4378_v7, %v796_v6  ;;  %vm803_vm14 = vweird.f32 %v4378_v7 }
 0xfb8   :  { %vm804_vm3 = vmor %vm802_vm15, %vm803_vm14 }
 0xfb9   :  { %v799_v11 = vsub.f32 1.0, %v798_v8 }
 0xfbb   :  { %v800_v13 = vmul.f32 %v4378_v7, %v799_v11  ;;  %v3269_v11 = vld [vmem:[%s5838_s1 + $0x38] sm:$0xff] }
 0xfbd   :  { %v801_v38 = vadd.f32 %v4378_v7, %v800_v13 }
 0xfbf   :  { %v805_v16 = vsel %vm804_vm3, %v4378_v7, %v801_v38  ;;  %v409_v38 = vmul.f32 %v4892_v59, %v4888_v57  ;;  %v496_v57 = vmul.f32 %v4943_v50, %v4939_v48 }
 0xfc0   :  { %v810_v17 = vsel %vm807_vm4, %v809_v15, %v805_v16 }
 0xfc1   :  { %v812_v18 = vmul.f32 2.0, %v810_v17  ;;  %v814_v30 = vmul.f32 %v810_v17, %v5115_v28  ;;  %v988_v15 = vrot.slane %v409_v38, 4  ;;  %v980_v59 = vrot.slane %v496_v57, 4 }
 0xfc3   :  { %v3265_v19 = vadd.f32 -1.0, %v812_v18  ;;  %v583_v18 = vmul.f32 %v4982_v39, %v4978_v37 }
 0xfc5   :  { %816 = vrot.lane.b32.xlu1 %v3265_v19, %s4502_s29  ;;  %v972_v19 = vrot.slane %v583_v18, 4 }
 0xfcd   :  { %836 = vperm.xlu1 %4338, %v3266_v20  }
0x1037   :  { %v817_v22 = vpop.permute.xlu1 %816 }
0x1038   :  { %v819_v24 = vmul.f32 %v817_v22, %v810_v17  ;;  %v670_v22 = vmul.f32 %v5027_v29, %v5023_v32 }
0x103a   :  { %821 = vrot.lane.b32.xlu2 %v819_v24, %s4504_s6  ;;  %v964_v24 = vrot.slane %v670_v22, 4 }
0x103f   :  { %v5123_v25 = vpop.permute.xlu1 %836 }
0x1094   :  { %v822_v31 = vpop.permute.xlu2 %821 }
0x1095   :  { %v5118_v34 = vadd.f32 %v822_v31, %v814_v30 }
0x1097   :  { %4379 = vtanh.f32 %v5118_v34  ;;  %v841_v37 = vsub.f32 %v5118_v34, %v5115_v28 }
0x1099   :  { %v842_v9 = vmul.f32 %v841_v37, %v5123_v25 }
0x109b   :  { %v843_v10 = vadd.f32 %v842_v9, %v5115_v28 }
0x109d   :  { %v4380_v35 = vpop.eup %4379 }
0x109e   :  { %827 = vrot.lane.b32.xlu0 %v4380_v35, %s4502_s29 }
0x1110   :  { %v828_v36 = vpop.permute.xlu0 %827 }
0x1111   :  { %v830_v40 = vmul.f32 %v828_v36, %v810_v17 }
0x1113   :  { %v833_v41 = vsub.f32 %v830_v40, %v5084_v33 }
0x1115   :  { %v839_v43 = vmul.f32 %v5123_v25, %v833_v41 }
0x1117   :  { %v5127_v21 = vadd.f32 %v839_v43, %v5084_v33  ;;  %v996_v33 = vrot.slane %v322_v23, 4 }
0x1119   :  { %852 = vrot.lane.b32.xlu1 %v5127_v21, %s4505_s12  ;;  %849 = vrot.lane.b32.xlu0 %v5127_v21, %s4502_s29  ;;  %v844_v12 = vmul.f32 %v5127_v21, %v5123_v25 }
0x111a   :  { %846 = vrot.lane.b32.xlu2 %v5127_v21, %s4504_s6 }
0x111b   :  { %v944_v13 = vrot.slane %v844_v12, 4 }
0x1174   :  { %v847_v44 = vpop.permute.xlu2 %846 }
0x118b   :  { %v853_v45 = vpop.permute.xlu1 %852  ;;  %v850_v46 = vpop.permute.xlu0 %849 }
0x118c   :  { %v855_v47 = vsel %vm177_vm0, %v847_v44, %v850_v46 }
0x118d   :  { %v856_v49 = vsel %vm186_vm1, %v855_v47, %v853_v45 }
0x118e   :  { %v857_v51 = vsel %vm195_vm2, %v856_v49, %v5127_v21 }
0x118f   :  { %v858_v53 = vmul.f32 %v4421_v52, %v857_v51 }
0x1191   :  { %875 = vmatmul.f32.vlgmr.msra.gmra.mxu1 %v858_v53 }
0x120e   :  { %v876_v55 = vpop.f32.mrf.mxu1 }
0x120f   :  { %v879_v56 = vadd.f32 %v876_v55, %v251_v54 }
0x1211   :  { %v3267_v58 = vmul.f32 -1.442695, %v879_v56 }
0x1213   :  { %4381 = vpow2.f32 %v3267_v58 }
0x1219   :  { %v4382_v60 = vpop.eup %4381 }
0x121a   :  { %v883_v61 = vadd.f32 1.0, %v4382_v60  ;;  %v4508_v60 = vmov 1983009808  }
0x121c   :  { %4383 = vrcp.f32 %v883_v61  ;;  %v895_v2 = vand.u32 2147483648, %v883_v61  ;;  %v893_v4 = vand.u32 2147483647, %v883_v61  ;;  %vm889_vm5 = vweird.f32 %v883_v61 }
0x121e   :  { %v896_v6 = vor.u32 1.1754944e-38, %v895_v2  ;;  %vm894_vm7 = vcmp.eq.f32.partialorder %v893_v4, 8.507059e+37 }
0x1222   :  { %v4384_v62 = vpop.eup %4383 }
0x1223   :  { %v885_v63 = vmul.f32 %v4384_v62, %v883_v61  ;;  %vm890_vm2 = vweird.f32 %v4384_v62  ;;  %v1005_v61 = vunpack.c.l.s4 %v4508_v60 }
0x1224   :  { %vm891_vm6 = vmor %vm889_vm5, %vm890_vm2 }
0x1225   :  { %v886_v1 = vsub.f32 1.0, %v885_v63 }
0x1227   :  { %v887_v3 = vmul.f32 %v4384_v62, %v886_v1 }
0x1229   :  { %v888_v5 = vadd.f32 %v4384_v62, %v887_v3 }
0x122b   :  { %v892_v7 = vsel %vm891_vm6, %v4384_v62, %v888_v5  ;;  %v1006_v5 = vunpack.c.0.s8 %v1005_v61 }
0x122c   :  { %v897_v42 = vsel %vm894_vm7, %v896_v6, %v892_v7 }
0x122d   :  { %v899_v0 = vmul.f32 2.0, %v897_v42  ;;  %v901_v39 = vmul.f32 %v897_v42, %v843_v10 }
0x122f   :  { %v3268_v8 = vadd.f32 -1.0, %v899_v0 }
0x1231   :  { %903 = vrot.lane.b32.xlu2 %v3268_v8, %s4502_s29  ;;  %v4509_v8 = vmov 1934713408  }
0x1239   :  { %923 = vperm.xlu2 %4337, %v3269_v11   ;;  %v1031_v11 = vunpack.c.l.s4 %v4509_v8 }
0x1241   :  { %945 = vrot.lane.b32.xlu2 %v944_v13, %s4502_s29 }
0x1249   :  { %977 = vrot.lane.b32.xlu2 %v757_v14, %s4504_s6 }
0x1251   :  { %989 = vrot.lane.b32.xlu2 %v988_v15, %s4502_s29  ;;  %v1032_v15 = vunpack.c.0.s8 %v1031_v11 }
0x128b   :  { %v904_v16 = vpop.permute.xlu2 %903 }
0x128c   :  { %v906_v17 = vmul.f32 %v904_v16, %v897_v42 }
0x128e   :  { %908 = vrot.lane.b32.xlu0 %v906_v17, %s4504_s6 }
0x1293   :  { %v924_v31 = vpop.permute.xlu2 %923 }
0x1296   :  { %960 = vrot.lane.b32.xlu0 %v583_v18, %s4504_s6 }
0x129b   :  { %v946_v40 = vpop.permute.xlu2 %945 }
0x129e   :  { %997 = vrot.lane.b32.xlu0 %v996_v33, %s4502_s29 }
0x12a3   :  { %v978_v43 = vpop.permute.xlu2 %977 }
0x12a6   :  { %950 = vrot.lane.b32.xlu0 %v496_v57, %s4504_s6 }
0x12ab   :  { %v990_v46 = vpop.permute.xlu2 %989 }
0x12ae   :  { %981 = vrot.lane.b32.xlu0 %v980_v59, %s4502_s29 }
0x12b6   :  { %930 = vrot.lane.b32.xlu0 %v322_v23, %s4504_s6 }
0x12be   :  { %973 = vrot.lane.b32.xlu0 %v972_v19, %s4502_s29 }
0x1300   :  { %v909_v20 = vpop.permute.xlu0 %908 }
0x1301   :  { %v911_v48 = vadd.f32 %v909_v20, %v901_v39 }
0x1303   :  { %4385 = vtanh.f32 %v911_v48 }
0x1308   :  { %v961_v29 = vpop.permute.xlu0 %960 }
0x1309   :  { %v4386_v50 = vpop.eup %4385 }
0x130a   :  { %914 = vrot.lane.b32.xlu1 %v4386_v50, %s4502_s29 }
0x1310   :  { %v998_v41 = vpop.permute.xlu0 %997 }
0x1312   :  { %965 = vrot.lane.b32.xlu1 %v964_v24, %s4502_s29 }
0x1318   :  { %v951_v44 = vpop.permute.xlu0 %950 }
0x131a   :  { %940 = vrot.lane.b32.xlu1 %v409_v38, %s4504_s6 }
0x1320   :  { %v982_v47 = vpop.permute.xlu0 %981 }
0x1321   :  { %v984_v1 = vsel %vm177_vm0, %v978_v43, %v982_v47 }
0x1322   :  { %955 = vrot.lane.b32.xlu1 %v954_v27, %s4502_s29 }
0x132a   :  { %985 = vrot.lane.b32.xlu1 %v844_v12, %s4504_s6 }
0x137c   :  { %v915_v26 = vpop.permute.xlu1 %914 }
0x137d   :  { %v917_v28 = vmul.f32 %v915_v26, %v897_v42 }
0x137f   :  { %v920_v30 = vsub.f32 %v917_v28, %v5127_v21 }
0x1381   :  { %v926_v34 = vmul.f32 %v924_v31, %v920_v30 }
0x1383   :  { %v927_v35 = vadd.f32 %v926_v34, %v5127_v21  ;;  %v931_v21 = vpop.permute.xlu0 %930 }
0x1384   :  { %v966_v25 = vpop.permute.xlu1 %965 }
0x1385   :  { %v928_v36 = vmul.f32 %v927_v35, %v924_v31  ;;  %v968_v4 = vsel %vm177_vm0, %v961_v29, %v966_v25 }
0x1386   :  { %v1008_v0 = vrot.slane %v968_v4, 4 }
0x1387   :  { %993 = vrot.lane.b32.xlu2 %v928_v36, %s4504_s6  ;;  %v934_v32 = vrot.slane %v928_v36, 4 }
0x1389   :  { %935 = vrot.lane.b32.xlu1 %v934_v32, %s4502_s29 }
0x138b   :  { %v974_v56 = vpop.permute.xlu0 %973 }
0x138c   :  { %v941_v45 = vpop.permute.xlu1 %940 }
0x138d   :  { %v948_v6 = vsel %vm177_vm0, %v941_v45, %v946_v40 }
0x138e   :  { %v1009_v12 = vsel %vm1002_vm8, %v1008_v0, %v948_v6 }
0x138f   :  { %969 = vrot.lane.b32.xlu2 %v670_v22, %s4504_s6  ;;  %v1013_v16 = vperm.slane %v1009_v12, %v1006_v5 }
0x1391   :  { %v1026_v37 = vrot.slane %v1013_v16, 4 }
0x1394   :  { %v956_v49 = vpop.permute.xlu1 %955 }
0x1395   :  { %v958_v13 = vsel %vm177_vm0, %v951_v44, %v956_v49 }
0x1396   :  { %v1001_v18 = vrot.slane %v958_v13, 4 }
0x139c   :  { %v986_v52 = vpop.permute.xlu1 %985 }
0x139d   :  { %v992_v55 = vsel %vm177_vm0, %v986_v52, %v990_v46 }
0x139e   :  { %v1014_v63 = vrot.slane %v992_v55, 4 }
0x13e1   :  { %v994_v51 = vpop.permute.xlu2 %993 }
0x13e2   :  { %v1000_v53 = vsel %vm177_vm0, %v994_v51, %v998_v41 }
0x13e3   :  { %v1020_v58 = vrot.slane %v1000_v53, 4 }
0x13e5   :  { %v1021_v2 = vsel %vm1002_vm8, %v1020_v58, %v984_v1 }
0x13e6   :  { %v1025_v7 = vperm.slane %v1021_v2, %v1006_v5 }
0x13e8   :  { %v1038_v14 = vrot.slane %v1025_v7, 4 }
0x13e9   :  { %v970_v54 = vpop.permute.xlu2 %969 }
0x13ea   :  { %v976_v62 = vsel %vm177_vm0, %v970_v54, %v974_v56 }
0x13eb   :  { %v1015_v3 = vsel %vm1002_vm8, %v1014_v63, %v976_v62 }
0x13ec   :  { %v1019_v42 = vperm.slane %v1015_v3, %v1006_v5 }
0x13ee   :  { %v1040_v38 = vrot.slane %v1019_v42, 4  ;;  %v1039_v17 = vsel %vm1002_vm8, %v1038_v14, %v1019_v42 }
0x13ef   :  { %v1045_v59 = vperm.slane %v1039_v17, %v1032_v15 }
0x13f0   :  { %v1041_v33 = vsel %vm1002_vm8, %v1025_v7, %v1040_v38 }
0x13f1   :  { %v1049_v10 = vperm.slane %v1041_v33, %v1032_v15  ;;  %v1050_v50 = vrot.slane %v1045_v59, 4 }
0x13f3   :  { %v1054_v28 = vrot.slane %v1049_v10, 4 }
0x13fb   :  { %v936_v23 = vpop.permute.xlu1 %935 }
0x13fc   :  { %v938_v57 = vsel %vm177_vm0, %v931_v21, %v936_v23  ;;  %vm1178_vm0 = vcmask 64512  }
0x13fd   :  { %v1003_v19 = vsel %vm1002_vm8, %v1001_v18, %v938_v57 }
0x13fe   :  { %v1007_v9 = vperm.slane %v1003_v19, %v1006_v5 }
0x1400   :  { %v1027_v39 = vsel %vm1002_vm8, %v1026_v37, %v1007_v9  ;;  %v1028_v20 = vrot.slane %v1007_v9, 4 }
0x1401   :  { %v1033_v48 = vperm.slane %v1027_v39, %v1032_v15 }
0x1402   :  { %v1029_v22 = vsel %vm1002_vm8, %v1013_v16, %v1028_v20 }
0x1403   :  { %v5202_v24 = vsel %vm1002_vm8, %v1050_v50, %v1033_v48  ;;  %v1052_v27 = vrot.slane %v1033_v48, 4  ;;  %v1037_v26 = vperm.slane %v1029_v22, %v1032_v15 }
0x1404   :  { %3270 = vmatpush.xpose.msk.msra.mxu2 %vm186_vm1, %v5202_v24 }
0x1405   :  { %v5207_v30 = vsel %vm1002_vm8, %v1045_v59, %v1052_v27  ;;  %v5210_v31 = vsel %vm1002_vm8, %v1054_v28, %v1037_v26  ;;  %v1056_v34 = vrot.slane %v1037_v26, 4 }
0x1406   :  { %3272 = vmatpush.xpose.msk.msra.mxu3 %vm186_vm1, %v5207_v30 }
0x1407   :  { %3271 = vmatmul.msk.f32.vlgmr.msra.gmra.mxu2 %vm186_vm1, %v5202_v24  ;;  %v5219_v35 = vsel %vm1002_vm8, %v1049_v10, %v1056_v34 }
0x1408   :  { %3274 = vmatpush.xpose.msk.msrb.mxu2 %vm186_vm1, %v5210_v31 }
0x1409   :  { %3273 = vmatmul.msk.f32.vlgmr.msra.gmra.mxu3 %vm186_vm1, %v5207_v30 }
0x140a   :  { %3276 = vmatpush.xpose.msk.msrb.mxu3 %vm186_vm1, %v5219_v35 }
0x140f   :  { %3275 = vmatmul.msk.f32.vlgmr.msrb.gmra.mxu2 %vm186_vm1, %v5210_v31 }
0x1411   :  { %3277 = vmatmul.msk.f32.vlgmr.msrb.gmra.mxu3 %vm186_vm1, %v5219_v35 }
0x148a   :  { %v1106_v36 = vpop.f32.mrf.mxu2 }
0x148b   :  { %v1179_v32 = vsel %vm1178_vm0, %v1106_v36, -inf }
0x148c   :  { %v1129_v29 = vpop.f32.mrf.mxu3  ;;  %1307 = vmax.xlane.f32.xlu1 %v1179_v32  ;;  %v1180_v5 = vrot.slane %v1179_v32, 4 }
0x148d   :  { %v1186_v40 = vsel %vm1178_vm0, %v1129_v29, -inf }
0x148e   :  { %1309 = vmax.xlane.f32.xlu2 %v1186_v40  ;;  %v1187_v6 = vrot.slane %v1186_v40, 4  ;;  %v1181_v7 = vmax.f32 %v1179_v32, %v1180_v5 }
0x1490   :  { %v1188_v42 = vmax.f32 %v1186_v40, %v1187_v6  ;;  %v1182_v0 = vrot.slane %v1181_v7, 2 }
0x1492   :  { %v5231_v41 = vpop.f32.mrf.mxu2  ;;  %v1189_v8 = vrot.slane %v1188_v42, 2  ;;  %v1183_v12 = vmax.f32 %v1181_v7, %v1182_v0 }
0x1493   :  { %v1193_v25 = vsel %vm1178_vm0, %v5231_v41, -inf }
0x1494   :  { %v5235_v43 = vpop.f32.mrf.mxu3  ;;  %1311 = vmax.xlane.f32.xlu0 %v1193_v25  ;;  %v1194_v11 = vrot.slane %v1193_v25, 4  ;;  %v1190_v13 = vmax.f32 %v1188_v42, %v1189_v8  ;;  %v1184_v38 = vrot.slane %v1183_v12, 1 }
0x1495   :  { %v1200_v44 = vsel %vm1178_vm0, %v5235_v43, -inf }
0x1496   :  { %1313 = vmax.xlane.f32.xlu2 %v1200_v44  ;;  %v1195_v14 = vmax.f32 %v1193_v25, %v1194_v11  ;;  %v1191_v15 = vrot.slane %v1190_v13, 1  ;;  %v1201_v17 = vrot.slane %v1200_v44, 4  ;;  %v1185_v18 = vmax.f32 %v1183_v12, %v1184_v38 }
0x1498   :  { %v1196_v16 = vrot.slane %v1195_v14, 2  ;;  %v1192_v23 = vmax.f32 %v1190_v13, %v1191_v15  ;;  %v1202_v57 = vmax.f32 %v1200_v44, %v1201_v17  ;;  %v1207_v59 = vsub.f32 %v1106_v36, %v1185_v18 }
0x1499   :  { %v4510_v17 = vmov 8.0  }
0x149a   :  { %v1197_v33 = vmax.f32 %v1195_v14, %v1196_v16  ;;  %v1208_v19 = vsub.f32 %v1129_v29, %v1192_v23  ;;  %v1203_v9 = vrot.slane %v1202_v57, 2  ;;  %v1211_v10 = vmul.f32 1.442695, %v1207_v59 }
0x149c   :  { %v1198_v37 = vrot.slane %v1197_v33, 1  ;;  %v1213_v39 = vmul.f32 1.442695, %v1208_v19  ;;  %v1204_v48 = vmax.f32 %v1202_v57, %v1203_v9 }
0x149e   :  { %v1199_v20 = vmax.f32 %v1197_v33, %v1198_v37  ;;  %v1205_v22 = vrot.slane %v1204_v48, 1 }
0x14a0   :  { %v1209_v50 = vsub.f32 %v5231_v41, %v1199_v20  ;;  %v1206_v34 = vmax.f32 %v1204_v48, %v1205_v22 }
0x14a2   :  { %v1215_v28 = vmul.f32 1.442695, %v1209_v50 }
0x14ff   :  { %v1308_v45 = vpop.xlane.xlu1 %1307 }
0x1500   :  { %v1315_v46 = vsub.f32 %v1106_v36, %v1308_v45 }
0x1501   :  { %v1310_v47 = vpop.xlane.xlu2 %1309 }
0x1502   :  { %v1319_v49 = vmul.f32 1.442695, %v1315_v46  ;;  %v1316_v51 = vsub.f32 %v1129_v29, %v1310_v47  ;;  %v1210_v29 = vsub.f32 %v5235_v43, %v1206_v34 }
0x1504   :  { %4387 = vpow2.f32 %v1319_v49  ;;  %v1321_v21 = vmul.f32 1.442695, %v1316_v51  ;;  %v1217_v44 = vmul.f32 1.442695, %v1210_v29 }
0x1506   :  { %4389 = vpow2.f32 %v1321_v21 }
0x1507   :  { %v1312_v52 = vpop.xlane.xlu0 %1311 }
0x1508   :  { %v1317_v53 = vsub.f32 %v5231_v41, %v1312_v52 }
0x1509   :  { %v1314_v54 = vpop.xlane.xlu2 %1313 }
0x150a   :  { %v5240_v55 = vpop.eup %4387  ;;  %v1323_v56 = vmul.f32 1.442695, %v1317_v53  ;;  %v1318_v58 = vsub.f32 %v5235_v43, %v1314_v54 }
0x150b   :  { %v1327_v60 = vsel %vm1178_vm0, %v5240_v55, 0.0 }
0x150c   :  { %v5245_v61 = vpop.eup %4389  ;;  %4391 = vpow2.f32 %v1323_v56  ;;  %v1325_v62 = vmul.f32 1.442695, %v1318_v58  ;;  %1328 = vadd.xlane.f32.xlu1 %v1327_v60 }
0x150d   :  { %v1330_v63 = vsel %vm1178_vm0, %v5245_v61, 0.0 }
0x150e   :  { %4393 = vpow2.f32 %v1325_v62  ;;  %1331 = vadd.xlane.f32.xlu2 %v1330_v63 }
0x150f   :  { %4395 = vpow2.f32 %v1211_v10 }
0x1510   :  { %4397 = vpow2.f32 %v1213_v39 }
0x1511   :  { %4399 = vpow2.f32 %v1215_v28 }
0x1512   :  { %v5249_v1 = vpop.eup %4391  ;;  %4401 = vpow2.f32 %v1217_v44 }
0x1513   :  { %v1333_v2 = vsel %vm1178_vm0, %v5249_v1, 0.0 }
0x1514   :  { %v5253_v3 = vpop.eup %4393  ;;  %1334 = vadd.xlane.f32.xlu0 %v1333_v2 }
0x1515   :  { %v1336_v4 = vsel %vm1178_vm0, %v5253_v3, 0.0  ;;  %v5258_v27 = vpop.eup %4395 }
0x1516   :  { %1337 = vadd.xlane.f32.xlu1 %v1336_v4  ;;  %v5260_v26 = vpop.eup %4397  ;;  %v1219_v36 = vsel %vm1178_vm0, %v5258_v27, 0.0 }
0x1517   :  { %v1226_v32 = vsel %vm1178_vm0, %v5260_v26, 0.0  ;;  %v1220_v40 = vrot.slane %v1219_v36, 4  ;;  %v5267_v45 = vpop.eup %4399 }
0x1518   :  { %v1227_v25 = vrot.slane %v1226_v32, 4  ;;  %v1233_v49 = vsel %vm1178_vm0, %v5267_v45, 0.0  ;;  %v5271_v53 = vpop.eup %4401 }
0x1519   :  { %v1221_v41 = vadd.f32 %v1220_v40, %v1219_v36  ;;  %v1234_v21 = vrot.slane %v1233_v49, 4  ;;  %v1240_v43 = vsel %vm1178_vm0, %v5271_v53, 0.0 }
0x151a   :  { %v1228_v46 = vadd.f32 %v1227_v25, %v1226_v32  ;;  %v1241_v63 = vrot.slane %v1240_v43, 4 }
0x151b   :  { %v1222_v47 = vrot.slane %v1221_v41, 2  ;;  %v1235_v56 = vadd.f32 %v1234_v21, %v1233_v49 }
0x151c   :  { %v1229_v51 = vrot.slane %v1228_v46, 2  ;;  %v1242_v6 = vadd.f32 %v1241_v63, %v1240_v43 }
0x151d   :  { %v1223_v52 = vadd.f32 %v1222_v47, %v1221_v41  ;;  %v1236_v62 = vrot.slane %v1235_v56, 2 }
0x151e   :  { %v1230_v54 = vadd.f32 %v1229_v51, %v1228_v46  ;;  %v1243_v7 = vrot.slane %v1242_v6, 2 }
0x151f   :  { %v1224_v58 = vrot.slane %v1223_v52, 1  ;;  %v1237_v5 = vadd.f32 %v1236_v62, %v1235_v56 }
0x1520   :  { %v1231_v60 = vrot.slane %v1230_v54, 1  ;;  %v1244_v11 = vadd.f32 %v1243_v7, %v1242_v6 }
0x1521   :  { %v5275_v2 = vadd.f32 %v1224_v58, %v1223_v52  ;;  %v1238_v42 = vrot.slane %v1237_v5, 1 }
0x1522   :  { %v5277_v4 = vadd.f32 %v1231_v60, %v1230_v54  ;;  %v1245_v38 = vrot.slane %v1244_v11, 1 }
0x1523   :  { %4403 = vrcp.f32 %v5275_v2  ;;  %v5285_v12 = vadd.f32 %v1238_v42, %v1237_v5  ;;  %v1258_v57 = vand.u32 2147483648, %v5275_v2  ;;  %vm1252_vm9 = vweird.f32 %v5275_v2 }
0x1524   :  { %4405 = vrcp.f32 %v5277_v4  ;;  %v5294_v33 = vadd.f32 %v1245_v38, %v1244_v11  ;;  %v1273_v37 = vand.u32 2147483648, %v5277_v4  ;;  %v1256_v39 = vand.u32 2147483647, %v5275_v2 }
0x1525   :  { %4407 = vrcp.f32 %v5285_v12  ;;  %v5308_v48 = vor.u32 1.1754944e-38, %v1258_v57  ;;  %vm1267_vm10 = vweird.f32 %v5277_v4  ;;  %v1271_v50 = vand.u32 2147483647, %v5277_v4 }
0x1526   :  { %4409 = vrcp.f32 %v4510_v17  ;;  %v5320_v32 = vor.u32 1.1754944e-38, %v1273_v37  ;;  %v1286_v47 = vand.u32 2147483647, %v5285_v12  ;;  %v1288_v49 = vand.u32 2147483648, %v5285_v12 }
0x1529   :  { %v5281_v0 = vpop.eup %4403 }
0x152a   :  { %v5283_v8 = vpop.eup %4405  ;;  %v1248_v13 = vmul.f32 %v5281_v0, %v5275_v2  ;;  %vm1253_vm11 = vweird.f32 %v5281_v0 }
0x152b   :  { %v1263_v14 = vmul.f32 %v5283_v8, %v5277_v4  ;;  %v5298_v59 = vpop.eup %4407  ;;  %vm1268_vm12 = vweird.f32 %v5283_v8  ;;  %vm5338_vm13 = vmor %vm1252_vm9, %vm1253_vm11 }
0x152c   :  { %v1249_v16 = vsub.f32 1.0, %v1248_v13  ;;  %v5303_v10 = vpop.eup %4409  ;;  %v1278_v22 = vmul.f32 %v5298_v59, %v5285_v12  ;;  %vm5352_vm15 = vmor %vm1267_vm10, %vm1268_vm12  ;;  %vm5377_vm10 = vcmp.eq.f32.partialorder %v1256_v39, 8.507059e+37  ;;  %vm5387_vm12 = vcmp.eq.f32.partialorder %v1271_v50, 8.507059e+37 }
0x152d   :  { %v1264_v18 = vsub.f32 1.0, %v1263_v14  ;;  %v1428_v40 = vmul.f32 8.0, %v5303_v10 }
0x152e   :  { %v1250_v19 = vmul.f32 %v5281_v0, %v1249_v16  ;;  %v1279_v54 = vsub.f32 1.0, %v1278_v22 }
0x152f   :  { %v1265_v9 = vmul.f32 %v5283_v8, %v1264_v18  ;;  %v1429_v6 = vsub.f32 1.0, %v1428_v40 }
0x1530   :  { %v5317_v36 = vadd.f32 %v5281_v0, %v1250_v19  ;;  %v5363_v38 = vmul.f32 %v5298_v59, %v1279_v54 }
0x1531   :  { %v5325_v25 = vadd.f32 %v5283_v8, %v1265_v9  ;;  %v1430_v9 = vmul.f32 %v5303_v10, %v1429_v6 }
0x1532   :  { %v1255_v60 = vsel %vm5338_vm13, %v5281_v0, %v5317_v36  ;;  %v1281_v0 = vadd.f32 %v5298_v59, %v5363_v38  ;;  %vm1297_vm13 = vweird.f32 %v5294_v33 }
0x1533   :  { %v1270_v7 = vsel %vm5352_vm15, %v5283_v8, %v5325_v25 }
0x1534   :  { %v1275_v52 = vsel %vm5387_vm12, %v5320_v32, %v1270_v7  ;;  %vm1287_vm12 = vcmp.eq.f32.partialorder %v1286_v47, 8.507059e+37 }
0x157f   :  { %v1329_v15 = vpop.xlane.xlu1 %1328 }
0x1580   :  { %4411 = vrcp.f32 %v1329_v15  ;;  %v1348_v51 = vand.u32 2147483647, %v1329_v15  ;;  %v1350_v21 = vand.u32 2147483648, %v1329_v15  ;;  %vm1344_vm3 = vweird.f32 %v1329_v15 }
0x1581   :  { %v5292_v23 = vpop.xlane.xlu2 %1331 }
0x1582   :  { %4413 = vrcp.f32 %v5292_v23  ;;  %v1363_v63 = vand.u32 2147483647, %v5292_v23  ;;  %v1365_v5 = vand.u32 2147483648, %v5292_v23  ;;  %vm1349_vm5 = vcmp.eq.f32.partialorder %v1348_v51, 8.507059e+37 }
0x1583   :  { %4415 = vrcp.f32 %v5294_v33  ;;  %v1351_v14 = vor.u32 1.1754944e-38, %v1350_v21  ;;  %vm1359_vm6 = vweird.f32 %v5292_v23 }
0x1584   :  { %vm1364_vm8 = vcmp.eq.f32.partialorder %v1363_v63, 8.507059e+37  ;;  %v1366_v37 = vor.u32 1.1754944e-38, %v1365_v5 }
0x1586   :  { %v4412_v20 = vpop.eup %4411 }
0x1587   :  { %v1340_v28 = vmul.f32 %v4412_v20, %v1329_v15  ;;  %v5314_v34 = vpop.xlane.xlu0 %1334  ;;  %vm1345_vm14 = vweird.f32 %v4412_v20 }
0x1588   :  { %v4414_v29 = vpop.eup %4413  ;;  %4417 = vrcp.f32 %v5314_v34  ;;  %vm1346_vm2 = vmor %vm1344_vm3, %vm1345_vm14  ;;  %vm1374_vm11 = vweird.f32 %v5314_v34 }
0x1589   :  { %v1341_v44 = vsub.f32 1.0, %v1340_v28  ;;  %v1355_v41 = vmul.f32 %v4414_v29, %v5292_v23  ;;  %v5329_v46 = vpop.xlane.xlu1 %1337  ;;  %v5342_v56 = vpop.eup %4415  ;;  %vm1360_vm4 = vweird.f32 %v4414_v29  ;;  %v1380_v23 = vand.u32 2147483648, %v5314_v34 }
0x158a   :  { %4419 = vrcp.f32 %v5329_v46  ;;  %v1293_v16 = vmul.f32 %v5342_v56, %v5294_v33  ;;  %vm1361_vm7 = vmor %vm1359_vm6, %vm1360_vm4  ;;  %vm1298_vm15 = vweird.f32 %v5342_v56 }
0x158b   :  { %v1342_v43 = vmul.f32 %v4412_v20, %v1341_v44  ;;  %v1356_v58 = vsub.f32 1.0, %v1355_v41  ;;  %v1381_v6 = vor.u32 1.1754944e-38, %v1380_v23 }
0x158d   :  { %v1343_v42 = vadd.f32 %v4412_v20, %v1342_v43  ;;  %v1357_v11 = vmul.f32 %v4414_v29, %v1356_v58  ;;  %v1395_v58 = vand.u32 2147483648, %v5329_v46 }
0x158e   :  { %v4418_v13 = vpop.eup %4417 }
0x158f   :  { %v1347_v17 = vsel %vm1346_vm2, %v4412_v20, %v1343_v42  ;;  %v1358_v18 = vadd.f32 %v4414_v29, %v1357_v11  ;;  %v1370_v57 = vmul.f32 %v4418_v13, %v5314_v34  ;;  %vm1375_vm9 = vweird.f32 %v4418_v13 }
0x1590   :  { %v4420_v19 = vpop.eup %4419  ;;  %v1352_v15 = vsel %vm1349_vm5, %v1351_v14, %v1347_v17  ;;  %v1378_v20 = vand.u32 2147483647, %v5314_v34  ;;  %vm1376_vm3 = vmor %vm1374_vm11, %vm1375_vm9  ;;  %v1294_v11 = vsub.f32 1.0, %v1293_v16  ;;  %vm1389_vm2 = vweird.f32 %v5329_v46 }
0x1591   :  { %v1353_v22 = vmul.f32 %v5240_v55, %v1352_v15  ;;  %v1362_v28 = vsel %vm1361_vm7, %v4414_v29, %v1358_v18  ;;  %v1371_v40 = vsub.f32 1.0, %v1370_v57  ;;  %v1385_v44 = vmul.f32 %v4420_v19, %v5329_v46  ;;  %vm5440_vm11 = vmor %vm1297_vm13, %vm1298_vm15 }
0x1592   :  { %v1367_v41 = vsel %vm1364_vm8, %v1366_v37, %v1362_v28  ;;  %v1393_v29 = vand.u32 2147483647, %v5329_v46  ;;  %vm1390_vm14 = vweird.f32 %v4420_v19  ;;  %vm1379_vm4 = vcmp.eq.f32.partialorder %v1378_v20, 8.507059e+37 }
0x1593   :  { %v1368_v51 = vmul.f32 %v5245_v61, %v1367_v41  ;;  %v1372_v21 = vmul.f32 %v4418_v13, %v1371_v40  ;;  %v1386_v54 = vsub.f32 1.0, %v1385_v44  ;;  %v1399_v55 = vsel %vm1178_vm0, %v1353_v22, 0.0  ;;  %vm1391_vm6 = vmor %vm1389_vm2, %vm1390_vm14 }
0x1594   :  { %v1400_v63 = vrot.slane %v1399_v55, 4  ;;  %vm1282_vm5 = vweird.f32 %v5285_v12  ;;  %v1396_v50 = vor.u32 1.1754944e-38, %v1395_v58  ;;  %vm1394_vm7 = vcmp.eq.f32.partialorder %v1393_v29, 8.507059e+37 }
0x1595   :  { %v1373_v2 = vadd.f32 %v4418_v13, %v1372_v21  ;;  %v1387_v39 = vmul.f32 %v4420_v19, %v1386_v54  ;;  %v1406_v5 = vsel %vm1178_vm0, %v1368_v51, 0.0  ;;  %v1431_v22 = vadd.f32 %v5303_v10, %v1430_v9 }
0x1596   :  { %v1401_v34 = vadd.f32 %v1400_v63, %v1399_v55  ;;  %v1407_v42 = vrot.slane %v1406_v5, 4  ;;  %vm1432_vm8 = vweird.f32 %v5303_v10  ;;  %vm1283_vm9 = vweird.f32 %v5298_v59 }
0x1597   :  { %v1377_v14 = vsel %vm1376_vm3, %v4418_v13, %v1373_v2  ;;  %v1388_v17 = vadd.f32 %v4420_v19, %v1387_v39  ;;  %v1295_v44 = vmul.f32 %v5342_v56, %v1294_v11  ;;  %v1301_v21 = vand.u32 2147483647, %v5294_v33 }
0x1598   :  { %v1382_v4 = vsel %vm1379_vm4, %v1381_v6, %v1377_v14  ;;  %v1402_v18 = vrot.slane %v1401_v34, 2  ;;  %v1408_v57 = vadd.f32 %v1407_v42, %v1406_v5  ;;  %v1303_v54 = vand.u32 2147483648, %v5294_v33 }
0x1599   :  { %v1383_v15 = vmul.f32 %v5249_v1, %v1382_v4  ;;  %v1392_v37 = vsel %vm1391_vm6, %v4420_v19, %v1388_v17  ;;  %v1260_v1 = vsel %vm5377_vm10, %v5308_v48, %v1255_v60  ;;  %v1296_v62 = vadd.f32 %v5342_v56, %v1295_v44  ;;  %vm5430_vm10 = vmor %vm1282_vm5, %vm1283_vm9  ;;  %v3442_v44 = vld [vmem:[%s5840_s3 + $0x150] sm:$0xf0] }
0x159a   :  { %v1397_v28 = vsel %vm1394_vm7, %v1396_v50, %v1392_v37  ;;  %v1403_v16 = vadd.f32 %v1402_v18, %v1401_v34  ;;  %v1409_v13 = vrot.slane %v1408_v57, 2  ;;  %v1285_v51 = vsel %vm5430_vm10, %v5298_v59, %v1281_v0 }
0x159b   :  { %v1398_v46 = vmul.f32 %v5253_v3, %v1397_v28  ;;  %v1413_v40 = vsel %vm1178_vm0, %v1383_v15, 0.0  ;;  %v1433_v3 = vsel %vm1432_vm8, %v5303_v10, %v1431_v22  ;;  %v1261_v10 = vmul.f32 %v5258_v27, %v1260_v1  ;;  %v3456_v15 = vld [vmem:[%s5840_s3 + $0x160] sm:$0xf]  ;;  %v3458_v22 = vld [vmem:[%s5840_s3 + $0x170] sm:$0xf0] }
0x159c   :  { %v1404_v19 = vrot.slane %v1403_v16, 1  ;;  %v1410_v9 = vadd.f32 %v1409_v13, %v1408_v57  ;;  %v1414_v41 = vrot.slane %v1413_v40, 4  ;;  %v1276_v27 = vmul.f32 %v5260_v26, %v1275_v52  ;;  %v4158_v13 = vld [vmem:[%s5840_s3 + $0x14c] sm:$0xf0]  ;;  %v3426_v52 = vld [vmem:[%s5840_s3 + $0x130] sm:$0xf0] }
0x159d   :  { %v1420_v36 = vsel %vm1178_vm0, %v1398_v46, 0.0  ;;  %v1289_v26 = vor.u32 1.1754944e-38, %v1288_v49  ;;  %v1300_v59 = vsel %vm5440_vm11, %v5342_v56, %v1296_v62  ;;  %v1304_v6 = vor.u32 1.1754944e-38, %v1303_v54  ;;  %v4156_v46 = vld [vmem:[%s5840_s3 + $0x144] sm:$0xf] }
0x159e   :  { %v1405_v48 = vadd.f32 %v1404_v19, %v1403_v16  ;;  %v1411_v60 = vrot.slane %v1410_v9, 1  ;;  %v1415_v20 = vadd.f32 %v1414_v41, %v1413_v40  ;;  %v1421_v23 = vrot.slane %v1420_v36, 4  ;;  %v3440_v16 = vld [vmem:[%s5840_s3 + $0x140] sm:$0xf]  ;;  %v4152_v41 = vld [vmem:[%s5840_s3 + $0x124] sm:$0xf] }
0x159f   :  { %v1290_v5 = vsel %vm1287_vm12, %v1289_v26, %v1285_v51  ;;  %vm1302_vm14 = vcmp.eq.f32.partialorder %v1301_v21, 8.507059e+37  ;;  %v3441_v40 = vor.u32 %v4158_v13, %v3440_v16  ;;  %v3445_v1 = vor.u32 %v4156_v46, %v3442_v44  ;;  %v3424_v19 = vld [vmem:[%s5840_s3 + $0x120] sm:$0xf]  ;;  %v3464_v62 = vld [vmem:[%s5840_s3 + $0x168] sm:$0xf] }
0x15a0   :  { %v1434_v8 = vmul.f32 %v1433_v3, %v1405_v48  ;;  %v1412_v25 = vadd.f32 %v1411_v60, %v1410_v9  ;;  %v1416_v7 = vrot.slane %v1415_v20, 2  ;;  %v1422_v38 = vadd.f32 %v1421_v23, %v1420_v36  ;;  %v4154_v9 = vld [vmem:[%s5840_s3 + $0x12c] sm:$0xf0]  ;;  %v3408_v36 = vld [vmem:[%s5840_s3 + $0x100] sm:$0xf] }
0x15a1   :  { %v1305_v12 = vsel %vm1302_vm14, %v1304_v6, %v1300_v59  ;;  %v1291_v49 = vmul.f32 %v5267_v45, %v1290_v5  ;;  %v4162_v45 = vld [vmem:[%s5840_s3 + $0x16c] sm:$0xf0]  ;;  %v3429_v0 = vor.u32 %v4152_v41, %v3426_v52  ;;  %v4148_v60 = vld [vmem:[%s5840_s3 + $0x104] sm:$0xf]  ;;  %v3410_v23 = vld [vmem:[%s5840_s3 + $0x110] sm:$0xf0] }
0x15a2   :  { %v1438_v43 = vmul.f32 %v1434_v8, %v1261_v10  ;;  %v1435_v55 = vmul.f32 %v1433_v3, %v1412_v25  ;;  %v1417_v29 = vadd.f32 %v1416_v7, %v1415_v20  ;;  %v1423_v63 = vrot.slane %v1422_v38, 2  ;;  %v4150_v48 = vld [vmem:[%s5840_s3 + $0x10c] sm:$0xf0]  ;;  %v4163_v8 = vld [vmem:[%s5840_s3 + $0x174] sm:$0xf0] }
0x15a3   :  { %v1306_v17 = vmul.f32 %v5271_v53, %v1305_v12  ;;  %v4160_v53 = vld [vmem:[%s5840_s3 + $0x164] sm:$0xf]  ;;  %v3457_v37 = vor.u32 %v4162_v45, %v3456_v15  ;;  %v3409_v20 = vor.u32 %v4150_v48, %v3408_v36  ;;  %v3413_v10 = vor.u32 %v4148_v60, %v3410_v23  ;;  %v3448_v25 = vld [vmem:[%s5840_s3 + $0x148] sm:$0xf]  ;;  %v4159_v7 = vld [vmem:[%s5840_s3 + $0x154] sm:$0xf0] }
0x15a4   :  { %v1442_v33 = vsel %vm1178_vm0, %v1438_v43, 0.0  ;;  %v1439_v61 = vmul.f32 %v1435_v55, %v1276_v27  ;;  %v1418_v2 = vrot.slane %v1417_v29, 1  ;;  %v1424_v39 = vadd.f32 %v1423_v63, %v1422_v38  ;;  %v3432_v21 = vld [vmem:[%s5840_s3 + $0x128] sm:$0xf]  ;;  %v4155_v54 = vld [vmem:[%s5840_s3 + $0x134] sm:$0xf0] }
0x15a5   :  { %1443 = vadd.xlane.f32.xlu2 %v1442_v33  ;;  %v3461_v28 = vor.u32 %v4160_v53, %v3458_v22  ;;  %1826 = vmatpush.bf16.msra.mxu3 %v3457_v37  ;;  %v3465_v32 = vor.u32 %v4163_v8, %v3464_v62  ;;  %v3449_v27 = vor.u32 %v4159_v7, %v3448_v25  ;;  %v3416_v59 = vld [vmem:[%s5840_s3 + $0x108] sm:$0xf]  ;;  %v4151_v33 = vld [vmem:[%s5840_s3 + $0x114] sm:$0xf0]  ;;  %v3376_v37 = vld [vmem:[%s5840_s3 + $0xc0] sm:$0xf] }
0x15a6   :  { %v1445_v34 = vsel %vm1178_vm0, %v1439_v61, 0.0  ;;  %v1419_v42 = vadd.f32 %v1418_v2, %v1417_v29  ;;  %v1425_v47 = vrot.slane %v1424_v39, 1  ;;  %v3433_v63 = vor.u32 %v4155_v54, %v3432_v21  ;;  %v4142_v22 = vld [vmem:[%s5840_s3 + $0xcc] sm:$0xf0]  ;;  %v4144_v44 = vld [vmem:[%s5840_s3 + $0xe4] sm:$0xf] }
0x15a7   :  { %1446 = vadd.xlane.f32.xlu0 %v1445_v34  ;;  %1852 = vmatpush.bf16.msrb.mxu1 %v3461_v28  ;;  %v3417_v34 = vor.u32 %v4151_v33, %v3416_v59  ;;  %v4147_v41 = vld [vmem:[%s5840_s3 + $0xf4] sm:$0xf0]  ;;  %v3360_v36 = vld [vmem:[%s5840_s3 + $0xa0] sm:$0xf]  ;;  %v4138_v48 = vld [vmem:[%s5840_s3 + $0xac] sm:$0xf0] }
0x15a8   :  { %v1436_v11 = vmul.f32 %v1433_v3, %v1419_v42  ;;  %v1426_v14 = vadd.f32 %v1425_v47, %v1424_v39  ;;  %v4140_v23 = vld [vmem:[%s5840_s3 + $0xc4] sm:$0xf]  ;;  %v3384_v62 = vld [vmem:[%s5840_s3 + $0xc8] sm:$0xf]  ;;  %v4143_v7 = vld [vmem:[%s5840_s3 + $0xd4] sm:$0xf0] }
0x15a9   :  { %1827 = vmatpush.bf16.msra.mxu3 %v3441_v40  ;;  %v3362_v21 = vld [vmem:[%s5840_s3 + $0xb0] sm:$0xf0]  ;;  %v4132_v33 = vld [vmem:[%s5840_s3 + $0x84] sm:$0xf] }
0x15aa   :  { %v1440_v56 = vmul.f32 %v1436_v11, %v1291_v49  ;;  %v1437_v4 = vmul.f32 %v1433_v3, %v1426_v14  ;;  %v3425_v3 = vor.u32 %v4154_v9, %v3424_v19  ;;  %v3394_v19 = vld [vmem:[%s5840_s3 + $0xf0] sm:$0xf0]  ;;  %v3400_v9 = vld [vmem:[%s5840_s3 + $0xe8] sm:$0xf] }
0x15ab   :  { %1853 = vmatpush.bf16.msrb.mxu1 %v3445_v1  ;;  %v3377_v1 = vor.u32 %v4142_v22, %v3376_v37  ;;  %v3397_v60 = vor.u32 %v4144_v44, %v3394_v19  ;;  %v3296_v22 = vld [vmem:[%s5840_s3 + $0x20] sm:$0xf]  ;;  %v4120_v44 = vld [vmem:[%s5840_s3 + $0x24] sm:$0xf] }
0x15ac   :  { %v1448_v50 = vsel %vm1178_vm0, %v1440_v56, 0.0  ;;  %v1441_v18 = vmul.f32 %v1437_v4, %v1306_v17 }
0x15ad   :  { %1449 = vadd.xlane.f32.xlu1 %v1448_v50  ;;  %1828 = vmatpush.bf16.msra.mxu3 %v3425_v3 }
0x15ae   :  { %v1451_v57 = vsel %vm1178_vm0, %v1441_v18, 0.0  ;;  %v3392_v18 = vld [vmem:[%s5840_s3 + $0xe0] sm:$0xf]  ;;  %vm1492_vm0 = vcmask 1041409   ;;  %1835 = vmatpush.bf16.msra.mxu0 %v3397_v60 }
0x15af   :  { %1452 = vadd.xlane.f32.xlu2 %v1451_v57  ;;  %1854 = vmatpush.bf16.msrb.mxu1 %v3429_v0  ;;  %v4146_v57 = vld [vmem:[%s5840_s3 + $0xec] sm:$0xf0] }
0x15b0   :  { %v3393_v28 = vor.u32 %v4146_v57, %v3392_v18  ;;  %v3336_v18 = vld [vmem:[%s5840_s3 + $0x68] sm:$0xf]  ;;  %v4131_v57 = vld [vmem:[%s5840_s3 + $0x74] sm:$0xf0] }
0x15b1   :  { %1829 = vmatpush.bf16.msra.mxu3 %v3409_v20  ;;  %v3401_v20 = vor.u32 %v4147_v41, %v3400_v9  ;;  %v3280_v9 = vld [vmem:[%s5840_s3] sm:$0xf] }
0x15b2   :  { %1809 = vmatpush.bf16.msra.mxu2 %v3393_v28  ;;  %v3337_v28 = vor.u32 %v4131_v57, %v3336_v18 }
0x15b3   :  { %1855 = vmatpush.bf16.msrb.mxu1 %v3413_v10  ;;  %v3378_v10 = vld [vmem:[%s5840_s3 + $0xd0] sm:$0xf0] }
0x15b5   :  { %1861 = vmatpush.bf16.msrb.mxu3 %v3401_v20 }
0x15b6   :  { %1810 = vmatpush.bf16.msra.mxu2 %v3377_v1  ;;  %v3298_v1 = vld [vmem:[%s5840_s3 + $0x30] sm:$0xf0] }
0x15b7   :  { %1878 = vmatpush.bf16.msra.mxu1 %v3465_v32  ;;  %v3381_v32 = vor.u32 %v4140_v23, %v3378_v10  ;;  %v3301_v60 = vor.u32 %v4120_v44, %v3298_v1  ;;  %v4117_v1 = vld [vmem:[%s5840_s3 + $0xc] sm:$0xf] }
0x15b9   :  { %1836 = vmatpush.bf16.msra.mxu0 %v3381_v32  ;;  %v4137_v32 = vld [vmem:[%s5840_s3 + $0xac] sm:$0xf] }
0x15bb   :  { %1879 = vmatpush.bf16.msra.mxu1 %v3449_v27  ;;  %v3385_v27 = vor.u32 %v4143_v7, %v3384_v62  ;;  %v4141_v62 = vld [vmem:[%s5840_s3 + $0xcc] sm:$0xf]  ;;  %v3370_v7 = vld [vmem:[%s5840_s3 + $0xb8] sm:$0xf0] }
0x15bd   :  { %1862 = vmatpush.bf16.msrb.mxu3 %v3385_v27  ;;  %v1079_v27 = vsel %vm186_vm1, %v5219_v35, -inf }
0x15bf   :  { %1880 = vmatpush.bf16.msra.mxu1 %v3433_v63 }
0x15c3   :  { %1881 = vmatpush.bf16.msra.mxu1 %v3417_v34 }
0x1618   :  { %v1444_v38 = vpop.xlane.xlu2 %1443 }
0x1619   :  { %v1454_v51 = vmul.f32 %v1444_v38, %v5202_v24  ;;  %v3361_v38 = vor.u32 %v4138_v48, %v3360_v36  ;;  %v4145_v36 = vld [vmem:[%s5840_s3 + $0xec] sm:$0xf]  ;;  %v3402_v48 = vld [vmem:[%s5840_s3 + $0xf8] sm:$0xf0] }
0x161a   :  { %v1447_v43 = vpop.xlane.xlu0 %1446  ;;  %v3405_v10 = vor.u32 %v4145_v36, %v3402_v48 }
0x161b   :  { %v1458_v55 = vsel %vm186_vm1, %v1454_v51, 0.0  ;;  %v1455_v29 = vmul.f32 %v1447_v43, %v5207_v30  ;;  %v4136_v51 = vld [vmem:[%s5840_s3 + $0xa4] sm:$0xf]  ;;  %v3344_v43 = vld [vmem:[%s5840_s3 + $0x80] sm:$0xf]  ;;  %1811 = vmatpush.bf16.msra.mxu2 %v3361_v38  ;;  %v3373_v38 = vor.u32 %v4137_v32, %v3370_v7 }
0x161c   :  { %v1459_v58 = vrot.slane %v1458_v55, 4  ;;  %v3365_v59 = vor.u32 %v4136_v51, %v3362_v21  ;;  %v1058_v51 = vsel %vm186_vm1, %v5202_v24, -inf  ;;  %v1065_v21 = vsel %vm186_vm1, %v5207_v30, -inf  ;;  %v4119_v30 = vld [vmem:[%s5840_s3 + $0x14] sm:$0xf0] }
0x161d   :  { %v1465_v26 = vsel %vm186_vm1, %v1455_v29, 0.0  ;;  %v3368_v29 = vld [vmem:[%s5840_s3 + $0xa8] sm:$0xf] }
0x161e   :  { %v1460_v61 = vadd.f32 %v1459_v58, %v1458_v55  ;;  %v1466_v2 = vrot.slane %v1465_v26, 4  ;;  %v4134_v55 = vld [vmem:[%s5840_s3 + $0x8c] sm:$0xf0]  ;;  %v4139_v58 = vld [vmem:[%s5840_s3 + $0xb4] sm:$0xf0]  ;;  %1837 = vmatpush.bf16.msra.mxu0 %v3365_v59 }
0x1620   :  { %v1461_v39 = vrot.slane %v1460_v61, 2  ;;  %v1467_v5 = vadd.f32 %v1466_v2, %v1465_v26  ;;  %v1450_v6 = vpop.xlane.xlu1 %1449 }
0x1621   :  { %v1456_v42 = vmul.f32 %v1450_v6, %v5210_v31  ;;  %v3369_v6 = vor.u32 %v4139_v58, %v3368_v29  ;;  %v3282_v29 = vld [vmem:[%s5840_s3 + $0x10] sm:$0xf0]  ;;  %v3354_v58 = vld [vmem:[%s5840_s3 + $0x98] sm:$0xf0] }
0x1622   :  { %v1462_v47 = vadd.f32 %v1461_v39, %v1460_v61  ;;  %v1468_v12 = vrot.slane %v1467_v5, 2  ;;  %v1453_v49 = vpop.xlane.xlu2 %1452  ;;  %v3346_v61 = vld [vmem:[%s5840_s3 + $0x90] sm:$0xf0]  ;;  %v3345_v39 = vor.u32 %v4134_v55, %v3344_v43  ;;  %v1080_v43 = vrot.slane %v1079_v27, 4  ;;  %v4116_v55 = vld [vmem:[%s5840_s3 + $0x4] sm:$0xf] }
0x1623   :  { %v1472_v11 = vsel %vm186_vm1, %v1456_v42, 0.0  ;;  %v1457_v14 = vmul.f32 %v1453_v49, %v5219_v35  ;;  %v4130_v42 = vld [vmem:[%s5840_s3 + $0x6c] sm:$0xf0]  ;;  %v3349_v49 = vor.u32 %v4132_v33, %v3346_v61  ;;  %1863 = vmatpush.bf16.msrb.mxu3 %v3369_v6  ;;  %v3288_v35 = vld [vmem:[%s5840_s3 + $0x8] sm:$0xf]  ;;  %v3285_v24 = vor.u32 %v4116_v55, %v3282_v29 }
0x1624   :  { %v1469_v56 = vadd.f32 %v1468_v12, %v1467_v5  ;;  %v1473_v17 = vrot.slane %v1472_v11, 4  ;;  %v1463_v4 = vrot.slane %v1462_v47, 1  ;;  %v3328_v5 = vld [vmem:[%s5840_s3 + $0x60] sm:$0xf]  ;;  %v4135_v12 = vld [vmem:[%s5840_s3 + $0x94] sm:$0xf0]  ;;  %1812 = vmatpush.bf16.msra.mxu2 %v3345_v39  ;;  %v3289_v59 = vor.u32 %v4119_v30, %v3288_v35 }
0x1625   :  { %v1479_v50 = vsel %vm186_vm1, %v1457_v14, 0.0  ;;  %v3330_v14 = vld [vmem:[%s5840_s3 + $0x70] sm:$0xf0]  ;;  %1838 = vmatpush.bf16.msra.mxu0 %v3349_v49  ;;  %v1059_v61 = vrot.slane %v1058_v51, 4  ;;  %v4129_v39 = vld [vmem:[%s5840_s3 + $0x6c] sm:$0xf] }
0x1626   :  { %v1474_v15 = vadd.f32 %v1473_v17, %v1472_v11  ;;  %v1480_v45 = vrot.slane %v1479_v50, 4  ;;  %v1470_v53 = vrot.slane %v1469_v56, 1  ;;  %v1464_v46 = vadd.f32 %v1463_v4, %v1462_v47  ;;  %v3352_v47 = vld [vmem:[%s5840_s3 + $0x88] sm:$0xf]  ;;  %v4128_v11 = vld [vmem:[%s5840_s3 + $0x64] sm:$0xf] }
0x1627   :  { %v3312_v17 = vld [vmem:[%s5840_s3 + $0x40] sm:$0xf]  ;;  %v3353_v4 = vor.u32 %v4135_v12, %v3352_v47  ;;  %v4161_v6 = vld [vmem:[%s5840_s3 + $0x16c] sm:$0xf]  ;;  %v3466_v47 = vld [vmem:[%s5840_s3 + $0x178] sm:$0xf0] }
0x1628   :  { %v1475_v16 = vrot.slane %v1474_v15, 2  ;;  %v1481_v13 = vadd.f32 %v1480_v45, %v1479_v50  ;;  %v1471_v40 = vadd.f32 %v1470_v53, %v1469_v56  ;;  %v3329_v56 = vor.u32 %v4130_v42, %v3328_v5  ;;  %v4126_v50 = vld [vmem:[%s5840_s3 + $0x4c] sm:$0xf0]  ;;  %v4124_v45 = vld [vmem:[%s5840_s3 + $0x44] sm:$0xf] }
0x1629   :  { %v3314_v53 = vld [vmem:[%s5840_s3 + $0x50] sm:$0xf0]  ;;  %v3313_v37 = vor.u32 %v4126_v50, %v3312_v17  ;;  %1864 = vmatpush.bf16.msrb.mxu3 %v3353_v4  ;;  %v3338_v5 = vld [vmem:[%s5840_s3 + $0x78] sm:$0xf0]  ;;  %v4125_v12 = vld [vmem:[%s5840_s3 + $0x4c] sm:$0xf]  ;;  %v1060_v50 = vmax.f32 %v1058_v51, %v1059_v61 }
0x162a   :  { %v1476_v3 = vadd.f32 %v1475_v16, %v1474_v15  ;;  %v1482_v52 = vrot.slane %v1481_v13, 2  ;;  %v1497_v0 = vsel %vm1492_vm0, %v1471_v40, %v1464_v46  ;;  %v3333_v15 = vor.u32 %v4128_v11, %v3330_v14  ;;  %1813 = vmatpush.bf16.msra.mxu2 %v3329_v56  ;;  %v4122_v16 = vld [vmem:[%s5840_s3 + $0x2c] sm:$0xf0]  ;;  %v4127_v46 = vld [vmem:[%s5840_s3 + $0x54] sm:$0xf0] }
0x162b   :  { %1498 = vrot.lane.b32.xlu0 %v1497_v0, %s4502_s29  ;;  %v3317_v40 = vor.u32 %v4124_v45, %v3314_v53  ;;  %v3297_v19 = vor.u32 %v4122_v16, %v3296_v22  ;;  %v4123_v0 = vld [vmem:[%s5840_s3 + $0x34] sm:$0xf0]  ;;  %v3341_v42 = vor.u32 %v4129_v39, %v3338_v5  ;;  %v3322_v49 = vld [vmem:[%s5840_s3 + $0x58] sm:$0xf0]  ;;  %v3469_v56 = vor.u32 %v4161_v6, %v3466_v47  ;;  %v4157_v17 = vld [vmem:[%s5840_s3 + $0x14c] sm:$0xf] }
0x162c   :  { %v1477_v8 = vrot.slane %v1476_v3, 1  ;;  %v1483_v25 = vadd.f32 %v1482_v52, %v1481_v13  ;;  %v3320_v13 = vld [vmem:[%s5840_s3 + $0x48] sm:$0xf]  ;;  %1839 = vmatpush.bf16.msra.mxu0 %v3333_v15  ;;  %v3450_v4 = vld [vmem:[%s5840_s3 + $0x158] sm:$0xf0]  ;;  %v3325_v57 = vor.u32 %v4125_v12, %v3322_v49 }
0x162d   :  { %1865 = vmatpush.bf16.msrb.mxu3 %v3337_v28  ;;  %v3321_v41 = vor.u32 %v4127_v46, %v3320_v13  ;;  %v3304_v52 = vld [vmem:[%s5840_s3 + $0x28] sm:$0xf]  ;;  %v3453_v15 = vor.u32 %v4157_v17, %v3450_v4  ;;  %v4121_v45 = vld [vmem:[%s5840_s3 + $0x2c] sm:$0xf]  ;;  %v3306_v53 = vld [vmem:[%s5840_s3 + $0x38] sm:$0xf0] }
0x162e   :  { %v1484_v54 = vrot.slane %v1483_v25, 1  ;;  %v1478_v63 = vadd.f32 %v1477_v8, %v1476_v3  ;;  %1814 = vmatpush.bf16.msra.mxu2 %v3313_v37  ;;  %v4118_v3 = vld [vmem:[%s5840_s3 + $0xc] sm:$0xf0]  ;;  %v3305_v23 = vor.u32 %v4123_v0, %v3304_v52  ;;  %v3386_v8 = vld [vmem:[%s5840_s3 + $0xd8] sm:$0xf0]  ;;  %v1061_v13 = vrot.slane %v1060_v50, 2 }
0x162f   :  { %v3281_v20 = vor.u32 %v4118_v3, %v3280_v9  ;;  %v4153_v37 = vld [vmem:[%s5840_s3 + $0x12c] sm:$0xf]  ;;  %v3434_v22 = vld [vmem:[%s5840_s3 + $0x138] sm:$0xf0] }
0x1630   :  { %v1485_v26 = vadd.f32 %v1484_v54, %v1483_v25  ;;  %1840 = vmatpush.bf16.msra.mxu0 %v3317_v40  ;;  %v3389_v25 = vor.u32 %v4141_v62, %v3386_v8  ;;  %v1072_v54 = vsel %vm186_vm1, %v5210_v31, -inf  ;;  %v4133_v31 = vld [vmem:[%s5840_s3 + $0x8c] sm:$0xf]  ;;  %v3309_v40 = vor.u32 %v4121_v45, %v3306_v53 }
0x1631   :  { %1866 = vmatpush.bf16.msrb.mxu3 %v3321_v41  ;;  %v3357_v33 = vor.u32 %v4133_v31, %v3354_v58  ;;  %v3437_v44 = vor.u32 %v4153_v37, %v3434_v22  ;;  %v4149_v9 = vld [vmem:[%s5840_s3 + $0x10c] sm:$0xf]  ;;  %v3418_v41 = vld [vmem:[%s5840_s3 + $0x118] sm:$0xf0]  ;;  %v1062_v0 = vmax.f32 %v1060_v50, %v1061_v13 }
0x1632   :  { %v1503_v2 = vsel %vm1492_vm0, %v1485_v26, %v1478_v63  ;;  %1815 = vmatpush.bf16.msra.mxu2 %v3297_v19  ;;  %v1066_v63 = vrot.slane %v1065_v21, 4  ;;  %v1073_v26 = vrot.slane %v1072_v54, 4  ;;  %v3290_v19 = vld [vmem:[%s5840_s3 + $0x18] sm:$0xf0] }
0x1633   :  { %v5609_v34 = vpack.c.bf16 %v1503_v2, %v1503_v2  ;;  %v1081_v2 = vmax.f32 %v1079_v27, %v1080_v43  ;;  %v3293_v48 = vor.u32 %v4117_v1, %v3290_v19  ;;  %v1063_v62 = vrot.slane %v1062_v0, 1 }
0x1634   :  { %1841 = vmatpush.bf16.msra.mxu0 %v3301_v60  ;;  %v1067_v11 = vmax.f32 %v1065_v21, %v1066_v63  ;;  %v1074_v14 = vmax.f32 %v1072_v54, %v1073_v26  ;;  %v3421_v60 = vor.u32 %v4149_v9, %v3418_v41  ;;  %v1556_v63 = vld [vmem:[%s5841_s4] ss:$4 sm:$0xf] }
0x1635   :  { %3470 = vmatmul.msk.bf16.vlgmr.msra.gmra.mxu3 %vm186_vm1, %v5609_v34  ;;  %3471 = vmatmul.msk.bf16.vlgmr.msrb.gmra.mxu1 %vm186_vm1, %v5609_v34  ;;  %v1082_v18 = vrot.slane %v1081_v2, 2  ;;  %v1064_v7 = vmax.f32 %v1062_v0, %v1063_v62  ;;  %v1558_v61 = vperm.slane %v1556_v63, 0  ;;  %v1561_v17 = vperm.slane %v1556_v63, 3 }
0x1636   :  { %1816 = vmatpush.bf16.msra.mxu2 %v3281_v20  ;;  %1867 = vmatpush.bf16.msrb.mxu3 %v3305_v23  ;;  %v1068_v28 = vrot.slane %v1067_v11, 2  ;;  %v1075_v16 = vrot.slane %v1074_v14, 2 }
0x1637   :  { %v1083_v46 = vmax.f32 %v1081_v2, %v1082_v18  ;;  %v1560_v2 = vperm.slane %v1556_v63, 2 }
0x1638   :  { %1842 = vmatpush.bf16.msra.mxu0 %v3285_v24  ;;  %v1069_v3 = vmax.f32 %v1067_v11, %v1068_v28  ;;  %v1076_v52 = vmax.f32 %v1074_v14, %v1075_v16 }
0x1639   :  { %v1084_v36 = vrot.slane %v1083_v46, 1 }
0x163a   :  { %1887 = vmatpush.bf16.msrb.mxu2 %v3405_v10  ;;  %1868 = vmatpush.bf16.msrb.mxu3 %v3289_v59  ;;  %v1070_v20 = vrot.slane %v1069_v3, 1  ;;  %v1077_v23 = vrot.slane %v1076_v52, 1 }
0x163b   :  { %v1085_v10 = vmax.f32 %v1083_v46, %v1084_v36 }
0x163c   :  { %1904 = vmatpush.bf16.msrb.mxu0 %v3469_v56  ;;  %v1071_v8 = vmax.f32 %v1069_v3, %v1070_v20 }
0x163e   :  { %1888 = vmatpush.bf16.msrb.mxu2 %v3389_v25  ;;  %v1078_v25 = vmax.f32 %v1076_v52, %v1077_v23  ;;  %v1487_v32 = vsub.f32 %v1071_v8, %v1085_v10 }
0x1640   :  { %1905 = vmatpush.bf16.msrb.mxu0 %v3453_v15  ;;  %v1489_v27 = vand.u32 2147483647, %v1487_v32 }
0x1642   :  { %1889 = vmatpush.bf16.msrb.mxu2 %v3373_v38  ;;  %v1486_v38 = vsub.f32 %v1064_v7, %v1078_v25 }
0x1644   :  { %1906 = vmatpush.bf16.msrb.mxu0 %v3437_v44  ;;  %v1488_v51 = vand.u32 2147483647, %v1486_v38 }
0x1645   :  { %3472 = vmatmul.msk.bf16.vlgmr.msra.gmra.mxu1 %vm186_vm1, %v5609_v34 }
0x1646   :  { %1890 = vmatpush.bf16.msrb.mxu2 %v3357_v33  ;;  %v1493_v54 = vsel %vm1492_vm0, %v1489_v27, %v1488_v51 }
0x1648   :  { %1907 = vmatpush.bf16.msrb.mxu0 %v3421_v60 }
0x164a   :  { %1891 = vmatpush.bf16.msrb.mxu2 %v3341_v42 }
0x164e   :  { %1892 = vmatpush.bf16.msrb.mxu2 %v3325_v57 }
0x1652   :  { %1893 = vmatpush.bf16.msrb.mxu2 %v3309_v40 }
0x1656   :  { %1894 = vmatpush.bf16.msrb.mxu2 %v3293_v48 }
0x169d   :  { %v1499_v21 = vpop.permute.xlu0 %1498 }
0x169e   :  { %v1505_v43 = vsel %vm186_vm1, %v1493_v54, %v1499_v21 }
0x169f   :  { %v1506_v55 = vpack.c.bf16 %v1505_v43, %v1505_v43 }
0x16a1   :  { %1817 = vmatmul.bf16.vlgmr.msra.gmra.mxu2 %v1506_v55  ;;  %1843 = vmatmul.bf16.vlgmr.msra.gmra.mxu0 %v1506_v55 }
0x16a2   :  { %1869 = vmatmul.bf16.vlgmr.msrb.gmra.mxu3 %v1506_v55 }
0x16b1   :  { %1895 = vmatmul.bf16.vlgmr.msrb.gmra.mxu2 %v1506_v55  ;;  %3473 = vmatmul.msk.bf16.vlgmr.msrb.gmra.mxu0 %vm186_vm1, %v5609_v34  ;;  %v1559_v34 = vperm.slane %v1556_v63, 1 }
0x16b2   :  { %v1857_v29 = vpop.f32.mrf.mxu1 }
0x16b8   :  { %v1831_v35 = vpop.f32.mrf.mxu3 }
0x16ba   :  { %v1859_v24 = vpop.f32.mrf.mxu1 }
0x16c0   :  { %v1833_v30 = vpop.f32.mrf.mxu3 }
0x16c2   :  { %v1883_v31 = vpop.f32.mrf.mxu1 }
0x16ca   :  { %v1885_v58 = vpop.f32.mrf.mxu1 }
0x171e   :  { %v1844_v26 = vpop.f32.mrf.mxu0 }
0x171f   :  { %v1845_v59 = vadd.f32 %v1844_v26, %v1559_v34 }
0x1721   :  { %v5782_v33 = vadd.f32 %v1857_v29, %v1845_v59 }
0x1724   :  { %v1818_v39 = vpop.f32.mrf.mxu2 }
0x1725   :  { %v1819_v5 = vadd.f32 %v1818_v39, %v1558_v61  ;;  %v1870_v6 = vpop.f32.mrf.mxu3 }
0x1726   :  { %v1871_v42 = vadd.f32 %v1870_v6, %v1560_v2  ;;  %v1846_v47 = vpop.f32.mrf.mxu0 }
0x1727   :  { %v5784_v12 = vadd.f32 %v1831_v35, %v1819_v5 }
0x1728   :  { %v5786_v49 = vadd.f32 %v1883_v31, %v1871_v42 }
0x172c   :  { %v1820_v11 = vpop.f32.mrf.mxu2 }
0x172d   :  { %v1872_v14 = vpop.f32.mrf.mxu3 }
0x172e   :  { %v1909_v56 = vpop.f32.mrf.mxu0 }
0x1734   :  { %v1896_v4 = vpop.f32.mrf.mxu2 }
0x1735   :  { %v1897_v50 = vadd.f32 %v1896_v4, %v1561_v17 }
0x1736   :  { %v1911_v18 = vpop.f32.mrf.mxu0 }
0x1737   :  { %v5788_v57 = vadd.f32 %v1909_v56, %v1897_v50 }
0x173c   :  { %v1898_v15 = vpop.f32.mrf.mxu2 }
0x173d   :  { %4497 = dma.done.wait [#allocation3], 16384 }
0x173e   :  { %4498 = vsyncadd [#allocation3], 4294950912  ;;  %v3589_v45 = vld [vmem:[#allocation2 + $0xe0] sm:$0xf]  ;;  %v4194_v53 = vld [vmem:[#allocation2 + $0xec] sm:$0xf0] }
0x173f   :  { %v3717_v37 = vld [vmem:[#allocation2 + $0x1e0] sm:$0xf]  ;;  %v3590_v22 = vor.u32 %v4194_v53, %v3589_v45  ;;  %v4226_v28 = vld [vmem:[#allocation2 + $0x1ec] sm:$0xf0]  ;;  %s4512_s15 = smov [#allocation7]   ;;  %s3231_s19 = sshll.u32 %s5844_s7, 4  ;;  %s3232_s19 = int_to_ptr.hbm [resolvable:$true] %s3231_s19 }
0x1740   :  { %v3845_v16 = vld [vmem:[#allocation2 + $0x2e0] sm:$0xf]  ;;  %v4258_v13 = vld [vmem:[#allocation2 + $0x2ec] sm:$0xf0]  ;;  %v3718_v46 = vor.u32 %v4226_v28, %v3717_v37  ;;  %s3229_s16 = sshll.u32 %s4512_s15, 4  ;;  %vm3222_vm1 = vcmask 17408   ;;  %s3230_s16 = int_to_ptr.vmem [resolvable:$true] %s3229_s16 }
0x1741   :  { %v3846_v40 = vor.u32 %v4258_v13, %v3845_v16  ;;  %v3973_v44 = vld [vmem:[#allocation2 + $0x3e0] sm:$0xf]  ;;  %v4290_v1 = vld [vmem:[#allocation2 + $0x3ec] sm:$0xf0]  ;;  %2700 = vmatpush.bf16.msrb.mxu1 %v3590_v22 }
0x1742   :  { %v3573_v19 = vld [vmem:[#allocation2 + $0xc0] sm:$0xf]  ;;  %v3974_v9 = vor.u32 %v4290_v1, %v3973_v44  ;;  %v4190_v41 = vld [vmem:[#allocation2 + $0xcc] sm:$0xf0]  ;;  %2713 = vmatpush.bf16.msra.mxu3 %v3718_v46 }
0x1743   :  { %v3701_v3 = vld [vmem:[#allocation2 + $0x1c0] sm:$0xf]  ;;  %v4222_v52 = vld [vmem:[#allocation2 + $0x1cc] sm:$0xf0]  ;;  %2726 = vmatpush.bf16.msra.mxu0 %v3846_v40  ;;  %v3574_v0 = vor.u32 %v4190_v41, %v3573_v19 }
0x1744   :  { %v3702_v36 = vor.u32 %v4222_v52, %v3701_v3  ;;  %v3829_v48 = vld [vmem:[#allocation2 + $0x2c0] sm:$0xf]  ;;  %v4254_v60 = vld [vmem:[#allocation2 + $0x2cc] sm:$0xf0]  ;;  %2739 = vmatpush.bf16.msra.mxu2 %v3974_v9 }
0x1745   :  { %v3957_v20 = vld [vmem:[#allocation2 + $0x3c0] sm:$0xf]  ;;  %v3830_v23 = vor.u32 %v4254_v60, %v3829_v48  ;;  %v4286_v10 = vld [vmem:[#allocation2 + $0x3cc] sm:$0xf0]  ;;  %2701 = vmatpush.bf16.msrb.mxu1 %v3574_v0 }
0x1746   :  { %v3557_v62 = vld [vmem:[#allocation2 + $0xa0] sm:$0xf]  ;;  %v4186_v8 = vld [vmem:[#allocation2 + $0xac] sm:$0xf0]  ;;  %v3958_v25 = vor.u32 %v4286_v10, %v3957_v20  ;;  %2714 = vmatpush.bf16.msra.mxu3 %v3702_v36 }
0x1747   :  { %v3685_v32 = vld [vmem:[#allocation2 + $0x1a0] sm:$0xf]  ;;  %v4218_v7 = vld [vmem:[#allocation2 + $0x1ac] sm:$0xf0]  ;;  %v3558_v27 = vor.u32 %v4186_v8, %v3557_v62  ;;  %2727 = vmatpush.bf16.msra.mxu0 %v3830_v23 }
0x1748   :  { %v3813_v38 = vld [vmem:[#allocation2 + $0x2a0] sm:$0xf]  ;;  %v4250_v51 = vld [vmem:[#allocation2 + $0x2ac] sm:$0xf0]  ;;  %v3686_v43 = vor.u32 %v4218_v7, %v3685_v32  ;;  %2740 = vmatpush.bf16.msra.mxu2 %v3958_v25 }
0x1749   :  { %v3941_v21 = vld [vmem:[#allocation2 + $0x3a0] sm:$0xf]  ;;  %v4282_v54 = vld [vmem:[#allocation2 + $0x3ac] sm:$0xf0]  ;;  %v3814_v55 = vor.u32 %v4250_v51, %v3813_v38  ;;  %2702 = vmatpush.bf16.msrb.mxu1 %v3558_v27 }
0x174a   :  { %v3541_v29 = vld [vmem:[#allocation2 + $0x80] sm:$0xf]  ;;  %v4182_v35 = vld [vmem:[#allocation2 + $0x8c] sm:$0xf0]  ;;  %v3942_v30 = vor.u32 %v4282_v54, %v3941_v21  ;;  %2715 = vmatpush.bf16.msra.mxu3 %v3686_v43  ;;  %v4192_v54 = vld [vmem:[#allocation2 + $0xe4] sm:$0xf] }
0x174b   :  { %v3669_v24 = vld [vmem:[#allocation2 + $0x180] sm:$0xf]  ;;  %v4214_v31 = vld [vmem:[#allocation2 + $0x18c] sm:$0xf0]  ;;  %v3542_v59 = vor.u32 %v4182_v35, %v3541_v29  ;;  %2728 = vmatpush.bf16.msra.mxu0 %v3814_v55  ;;  %v3591_v43 = vld [vmem:[#allocation2 + $0xf0] sm:$0xf0] }
0x174c   :  { %v3797_v58 = vld [vmem:[#allocation2 + $0x280] sm:$0xf]  ;;  %v4246_v63 = vld [vmem:[#allocation2 + $0x28c] sm:$0xf0]  ;;  %v3670_v61 = vor.u32 %v4214_v31, %v3669_v24  ;;  %2741 = vmatpush.bf16.msra.mxu2 %v3942_v30  ;;  %v4224_v55 = vld [vmem:[#allocation2 + $0x1e4] sm:$0xf] }
0x174d   :  { %v3925_v34 = vld [vmem:[#allocation2 + $0x380] sm:$0xf]  ;;  %v4278_v26 = vld [vmem:[#allocation2 + $0x38c] sm:$0xf0]  ;;  %v3798_v2 = vor.u32 %v4246_v63, %v3797_v58  ;;  %2703 = vmatpush.bf16.msrb.mxu1 %v3542_v59  ;;  %v3719_v35 = vld [vmem:[#allocation2 + $0x1f0] sm:$0xf0]  ;;  %v3594_v59 = vor.u32 %v4192_v54, %v3591_v43 }
0x174e   :  { %v3525_v39 = vld [vmem:[#allocation2 + $0x60] sm:$0xf]  ;;  %v4178_v5 = vld [vmem:[#allocation2 + $0x6c] sm:$0xf0]  ;;  %v3926_v42 = vor.u32 %v4278_v26, %v3925_v34  ;;  %2716 = vmatpush.bf16.msra.mxu3 %v3670_v61  ;;  %v4256_v24 = vld [vmem:[#allocation2 + $0x2e4] sm:$0xf]  ;;  %v3722_v61 = vor.u32 %v4224_v55, %v3719_v35 }
0x174f   :  { %v3653_v6 = vld [vmem:[#allocation2 + $0x160] sm:$0xf]  ;;  %v4210_v47 = vld [vmem:[#allocation2 + $0x16c] sm:$0xf0]  ;;  %v3526_v4 = vor.u32 %v4178_v5, %v3525_v39  ;;  %2729 = vmatpush.bf16.msra.mxu0 %v3798_v2  ;;  %v3847_v30 = vld [vmem:[#allocation2 + $0x2f0] sm:$0xf0] }
0x1750   :  { %v3781_v11 = vld [vmem:[#allocation2 + $0x260] sm:$0xf]  ;;  %v4242_v14 = vld [vmem:[#allocation2 + $0x26c] sm:$0xf0]  ;;  %v3654_v50 = vor.u32 %v4210_v47, %v3653_v6  ;;  %2742 = vmatpush.bf16.msra.mxu2 %v3926_v42  ;;  %v4288_v63 = vld [vmem:[#allocation2 + $0x3e4] sm:$0xf]  ;;  %v3850_v2 = vor.u32 %v4256_v24, %v3847_v30 }
0x1751   :  { %v3909_v56 = vld [vmem:[#allocation2 + $0x360] sm:$0xf]  ;;  %v4274_v17 = vld [vmem:[#allocation2 + $0x36c] sm:$0xf0]  ;;  %v3782_v18 = vor.u32 %v4242_v14, %v3781_v11  ;;  %2704 = vmatpush.bf16.msrb.mxu1 %v3526_v4  ;;  %v3975_v34 = vld [vmem:[#allocation2 + $0x3f0] sm:$0xf0] }
0x1752   :  { %v3509_v15 = vld [vmem:[#allocation2 + $0x40] sm:$0xf]  ;;  %v4174_v45 = vld [vmem:[#allocation2 + $0x4c] sm:$0xf0]  ;;  %v3910_v37 = vor.u32 %v4274_v17, %v3909_v56  ;;  %2717 = vmatpush.bf16.msra.mxu3 %v3654_v50  ;;  %v4188_v39 = vld [vmem:[#allocation2 + $0xc4] sm:$0xf]  ;;  %v3978_v42 = vor.u32 %v4288_v63, %v3975_v34  ;;  %v5792_v56 = vpack.c.bf16 %v5782_v33, %v5782_v33  ;;  %v5796_v50 = vpack.c.bf16 %v5784_v12, %v5784_v12 }
0x1753   :  { %v3637_v53 = vld [vmem:[#allocation2 + $0x140] sm:$0xf]  ;;  %v4206_v22 = vld [vmem:[#allocation2 + $0x14c] sm:$0xf0]  ;;  %v3510_v40 = vor.u32 %v4174_v45, %v3509_v15  ;;  %2730 = vmatpush.bf16.msra.mxu0 %v3782_v18  ;;  %v3575_v5 = vld [vmem:[#allocation2 + $0xd0] sm:$0xf0]  ;;  %v5800_v18 = vpack.c.bf16 %v5788_v57, %v5788_v57  ;;  %v5804_v45 = vpack.c.bf16 %v5786_v49, %v5786_v49 }
0x1754   :  { %v3765_v28 = vld [vmem:[#allocation2 + $0x240] sm:$0xf]  ;;  %v4238_v16 = vld [vmem:[#allocation2 + $0x24c] sm:$0xf0]  ;;  %v3638_v44 = vor.u32 %v4206_v22, %v3637_v53  ;;  %2743 = vmatpush.bf16.msra.mxu2 %v3910_v37  ;;  %v4220_v6 = vld [vmem:[#allocation2 + $0x1c4] sm:$0xf]  ;;  %v3578_v15 = vor.u32 %v4188_v39, %v3575_v5 }
0x1755   :  { %v3893_v13 = vld [vmem:[#allocation2 + $0x340] sm:$0xf]  ;;  %v4270_v46 = vld [vmem:[#allocation2 + $0x34c] sm:$0xf0]  ;;  %v3766_v1 = vor.u32 %v4238_v16, %v3765_v28  ;;  %2705 = vmatpush.bf16.msrb.mxu1 %v3510_v40  ;;  %v3703_v47 = vld [vmem:[#allocation2 + $0x1d0] sm:$0xf0] }
0x1756   :  { %v3493_v19 = vld [vmem:[#allocation2 + $0x20] sm:$0xf]  ;;  %v4170_v9 = vld [vmem:[#allocation2 + $0x2c] sm:$0xf0]  ;;  %v3894_v3 = vor.u32 %v4270_v46, %v3893_v13  ;;  %2718 = vmatpush.bf16.msra.mxu3 %v3638_v44  ;;  %v4252_v11 = vld [vmem:[#allocation2 + $0x2c4] sm:$0xf]  ;;  %v3706_v33 = vor.u32 %v4220_v6, %v3703_v47 }
0x1757   :  { %v3621_v41 = vld [vmem:[#allocation2 + $0x120] sm:$0xf]  ;;  %v4202_v52 = vld [vmem:[#allocation2 + $0x12c] sm:$0xf0]  ;;  %v3494_v20 = vor.u32 %v4170_v9, %v3493_v19  ;;  %2731 = vmatpush.bf16.msra.mxu0 %v3766_v1  ;;  %v3831_v14 = vld [vmem:[#allocation2 + $0x2d0] sm:$0xf0] }
0x1758   :  { %v3749_v0 = vld [vmem:[#allocation2 + $0x220] sm:$0xf]  ;;  %v4234_v36 = vld [vmem:[#allocation2 + $0x22c] sm:$0xf0]  ;;  %v3622_v62 = vor.u32 %v4202_v52, %v3621_v41  ;;  %2744 = vmatpush.bf16.msra.mxu2 %v3894_v3  ;;  %v4284_v17 = vld [vmem:[#allocation2 + $0x3c4] sm:$0xf]  ;;  %v3834_v53 = vor.u32 %v4252_v11, %v3831_v14 }
0x1759   :  { %v3877_v48 = vld [vmem:[#allocation2 + $0x320] sm:$0xf]  ;;  %v4266_v60 = vld [vmem:[#allocation2 + $0x32c] sm:$0xf0]  ;;  %v3750_v8 = vor.u32 %v4234_v36, %v3749_v0  ;;  %2706 = vmatpush.bf16.msrb.mxu1 %v3494_v20  ;;  %v3959_v4 = vld [vmem:[#allocation2 + $0x3d0] sm:$0xf0] }
0x175a   :  { %v3477_v23 = vld [vmem:[#allocation2] sm:$0xf]  ;;  %v4166_v10 = vld [vmem:[#allocation2 + $0xc] sm:$0xf0]  ;;  %v3878_v38 = vor.u32 %v4266_v60, %v3877_v48  ;;  %2719 = vmatpush.bf16.msra.mxu3 %v3622_v62  ;;  %v4184_v37 = vld [vmem:[#allocation2 + $0xa4] sm:$0xf]  ;;  %v3962_v12 = vor.u32 %v4284_v17, %v3959_v4 }
0x175b   :  { %v3605_v25 = vld [vmem:[#allocation2 + $0x100] sm:$0xf]  ;;  %v4198_v32 = vld [vmem:[#allocation2 + $0x10c] sm:$0xf0]  ;;  %v3478_v29 = vor.u32 %v4166_v10, %v3477_v23  ;;  %2732 = vmatpush.bf16.msra.mxu0 %v3750_v8  ;;  %v3559_v22 = vld [vmem:[#allocation2 + $0xb0] sm:$0xf0] }
0x175c   :  { %v3733_v7 = vld [vmem:[#allocation2 + $0x200] sm:$0xf]  ;;  %v4230_v27 = vld [vmem:[#allocation2 + $0x20c] sm:$0xf0]  ;;  %v3606_v31 = vor.u32 %v4198_v32, %v3605_v25  ;;  %2745 = vmatpush.bf16.msra.mxu2 %v3878_v38  ;;  %v4216_v28 = vld [vmem:[#allocation2 + $0x1a4] sm:$0xf]  ;;  %v3562_v49 = vor.u32 %v4184_v37, %v3559_v22 }
0x175d   :  { %v3861_v51 = vld [vmem:[#allocation2 + $0x300] sm:$0xf]  ;;  %v4262_v21 = vld [vmem:[#allocation2 + $0x30c] sm:$0xf0]  ;;  %v3734_v58 = vor.u32 %v4230_v27, %v3733_v7  ;;  %2707 = vmatpush.bf16.msrb.mxu1 %v3478_v29  ;;  %v3687_v16 = vld [vmem:[#allocation2 + $0x1b0] sm:$0xf0] }
0x175e   :  { %v3862_v26 = vor.u32 %v4262_v21, %v3861_v51  ;;  %2720 = vmatpush.bf16.msra.mxu3 %v3606_v31  ;;  %v4248_v13 = vld [vmem:[#allocation2 + $0x2a4] sm:$0xf]  ;;  %v3815_v57 = vld [vmem:[#allocation2 + $0x2b0] sm:$0xf0]  ;;  %v3690_v44 = vor.u32 %v4216_v28, %v3687_v16 }
0x175f   :  { %2733 = vmatpush.bf16.msra.mxu0 %v3734_v58  ;;  %v4280_v46 = vld [vmem:[#allocation2 + $0x3a4] sm:$0xf]  ;;  %v3943_v40 = vld [vmem:[#allocation2 + $0x3b0] sm:$0xf0]  ;;  %v3818_v1 = vor.u32 %v4248_v13, %v3815_v57 }
0x1760   :  { %2746 = vmatpush.bf16.msra.mxu2 %v3862_v26  ;;  %2708 = vmatmul.bf16.vlgmr.msrb.gmra.mxu1 %v5796_v50  ;;  %v4180_v19 = vld [vmem:[#allocation2 + $0x84] sm:$0xf]  ;;  %v3543_v9 = vld [vmem:[#allocation2 + $0x90] sm:$0xf0]  ;;  %v3946_v3 = vor.u32 %v4280_v46, %v3943_v40 }
0x1761   :  { %2752 = vmatpush.bf16.msra.mxu1 %v3594_v59  ;;  %2721 = vmatmul.bf16.vlgmr.msra.gmra.mxu3 %v5792_v56  ;;  %v4212_v41 = vld [vmem:[#allocation2 + $0x184] sm:$0xf]  ;;  %v3671_v52 = vld [vmem:[#allocation2 + $0x190] sm:$0xf0]  ;;  %v3546_v20 = vor.u32 %v4180_v19, %v3543_v9  ;;  %v4227_v9 = vld [vmem:[#allocation2 + $0x1f4] sm:$0xf0] }
0x1762   :  { %2765 = vmatpush.bf16.msrb.mxu3 %v3722_v61  ;;  %2734 = vmatmul.bf16.vlgmr.msra.gmra.mxu0 %v5804_v45  ;;  %v4244_v0 = vld [vmem:[#allocation2 + $0x284] sm:$0xf]  ;;  %v3799_v36 = vld [vmem:[#allocation2 + $0x290] sm:$0xf0]  ;;  %v3674_v23 = vor.u32 %v4212_v41, %v3671_v52  ;;  %v3853_v41 = vld [vmem:[#allocation2 + $0x2e8] sm:$0xf] }
0x1763   :  { %2778 = vmatpush.bf16.msrb.mxu0 %v3850_v2  ;;  %2747 = vmatmul.bf16.vlgmr.msra.gmra.mxu2 %v5800_v18  ;;  %v4276_v48 = vld [vmem:[#allocation2 + $0x384] sm:$0xf]  ;;  %v3927_v60 = vld [vmem:[#allocation2 + $0x390] sm:$0xf0]  ;;  %v3802_v10 = vor.u32 %v4244_v0, %v3799_v36  ;;  %v3981_v36 = vld [vmem:[#allocation2 + $0x3e8] sm:$0xf] }
0x1764   :  { %2791 = vmatpush.bf16.msrb.mxu2 %v3978_v42  ;;  %v4176_v62 = vld [vmem:[#allocation2 + $0x64] sm:$0xf]  ;;  %v3527_v8 = vld [vmem:[#allocation2 + $0x70] sm:$0xf0]  ;;  %v3930_v32 = vor.u32 %v4276_v48, %v3927_v60  ;;  %v4291_v48 = vld [vmem:[#allocation2 + $0x3f4] sm:$0xf0] }
0x1765   :  { %2753 = vmatpush.bf16.msra.mxu1 %v3578_v15  ;;  %v4208_v25 = vld [vmem:[#allocation2 + $0x164] sm:$0xf]  ;;  %v3655_v7 = vld [vmem:[#allocation2 + $0x170] sm:$0xf0]  ;;  %v3530_v54 = vor.u32 %v4176_v62, %v3527_v8  ;;  %v3581_v62 = vld [vmem:[#allocation2 + $0xc8] sm:$0xf] }
0x1766   :  { %2766 = vmatpush.bf16.msrb.mxu3 %v3706_v33  ;;  %v4240_v38 = vld [vmem:[#allocation2 + $0x264] sm:$0xf]  ;;  %v3783_v27 = vld [vmem:[#allocation2 + $0x270] sm:$0xf0]  ;;  %v3658_v43 = vor.u32 %v4208_v25, %v3655_v7  ;;  %v4191_v8 = vld [vmem:[#allocation2 + $0xd4] sm:$0xf0] }
0x1767   :  { %2779 = vmatpush.bf16.msrb.mxu0 %v3834_v53  ;;  %v4272_v51 = vld [vmem:[#allocation2 + $0x364] sm:$0xf]  ;;  %v3911_v21 = vld [vmem:[#allocation2 + $0x370] sm:$0xf0]  ;;  %v3786_v55 = vor.u32 %v4240_v38, %v3783_v27  ;;  %v3709_v25 = vld [vmem:[#allocation2 + $0x1c8] sm:$0xf] }
0x1768   :  { %2792 = vmatpush.bf16.msrb.mxu2 %v3962_v12  ;;  %v4172_v29 = vld [vmem:[#allocation2 + $0x44] sm:$0xf]  ;;  %v3511_v35 = vld [vmem:[#allocation2 + $0x50] sm:$0xf0]  ;;  %v3914_v30 = vor.u32 %v4272_v51, %v3911_v21  ;;  %v4223_v7 = vld [vmem:[#allocation2 + $0x1d4] sm:$0xf0] }
0x1769   :  { %2754 = vmatpush.bf16.msra.mxu1 %v3562_v49  ;;  %v4204_v24 = vld [vmem:[#allocation2 + $0x144] sm:$0xf]  ;;  %v3639_v31 = vld [vmem:[#allocation2 + $0x150] sm:$0xf0]  ;;  %v3514_v59 = vor.u32 %v4172_v29, %v3511_v35  ;;  %v3597_v49 = vld [vmem:[#allocation2 + $0xe8] sm:$0xf] }
0x176a   :  { %2767 = vmatpush.bf16.msrb.mxu3 %v3690_v44  ;;  %v4236_v58 = vld [vmem:[#allocation2 + $0x244] sm:$0xf]  ;;  %v3767_v63 = vld [vmem:[#allocation2 + $0x250] sm:$0xf0]  ;;  %v3642_v61 = vor.u32 %v4204_v24, %v3639_v31  ;;  %v4195_v44 = vld [vmem:[#allocation2 + $0xf4] sm:$0xf0] }
0x176b   :  { %2780 = vmatpush.bf16.msrb.mxu0 %v3818_v1  ;;  %v4268_v34 = vld [vmem:[#allocation2 + $0x344] sm:$0xf]  ;;  %v3895_v26 = vld [vmem:[#allocation2 + $0x350] sm:$0xf0]  ;;  %v3770_v2 = vor.u32 %v4236_v58, %v3767_v63  ;;  %v3725_v1 = vld [vmem:[#allocation2 + $0x1e8] sm:$0xf] }
0x176c   :  { %2793 = vmatpush.bf16.msrb.mxu2 %v3946_v3  ;;  %v4168_v39 = vld [vmem:[#allocation2 + $0x24] sm:$0xf]  ;;  %v3495_v5 = vld [vmem:[#allocation2 + $0x30] sm:$0xf0]  ;;  %v3898_v42 = vor.u32 %v4268_v34, %v3895_v26  ;;  %v4259_v3 = vld [vmem:[#allocation2 + $0x2f4] sm:$0xf0] }
0x176d   :  { %2755 = vmatpush.bf16.msra.mxu1 %v3546_v20  ;;  %v4200_v6 = vld [vmem:[#allocation2 + $0x124] sm:$0xf]  ;;  %v3623_v47 = vld [vmem:[#allocation2 + $0x130] sm:$0xf0]  ;;  %v3498_v15 = vor.u32 %v4168_v39, %v3495_v5  ;;  %v3598_v20 = vor.u32 %v4195_v44, %v3597_v49  ;;  %v3837_v38 = vld [vmem:[#allocation2 + $0x2c8] sm:$0xf] }
0x176e   :  { %2768 = vmatpush.bf16.msrb.mxu3 %v3674_v23  ;;  %v4232_v11 = vld [vmem:[#allocation2 + $0x224] sm:$0xf]  ;;  %v3751_v14 = vld [vmem:[#allocation2 + $0x230] sm:$0xf0]  ;;  %v3626_v37 = vor.u32 %v4200_v6, %v3623_v47  ;;  %v3726_v23 = vor.u32 %v4227_v9, %v3725_v1  ;;  %v4255_v27 = vld [vmem:[#allocation2 + $0x2d4] sm:$0xf0] }
0x176f   :  { %2781 = vmatpush.bf16.msrb.mxu0 %v3802_v10  ;;  %v4264_v17 = vld [vmem:[#allocation2 + $0x324] sm:$0xf]  ;;  %v3879_v4 = vld [vmem:[#allocation2 + $0x330] sm:$0xf0]  ;;  %v3754_v22 = vor.u32 %v4232_v11, %v3751_v14  ;;  %v3854_v10 = vor.u32 %v4259_v3, %v3853_v41  ;;  %v3965_v51 = vld [vmem:[#allocation2 + $0x3c8] sm:$0xf] }
0x1770   :  { %2794 = vmatpush.bf16.msrb.mxu2 %v3930_v32  ;;  %v4164_v33 = vld [vmem:[#allocation2 + $0x4] sm:$0xf]  ;;  %v3479_v53 = vld [vmem:[#allocation2 + $0x10] sm:$0xf0]  ;;  %v3882_v13 = vor.u32 %v4264_v17, %v3879_v4  ;;  %v3982_v32 = vor.u32 %v4291_v48, %v3981_v36  ;;  %v4287_v21 = vld [vmem:[#allocation2 + $0x3d4] sm:$0xf0] }
0x1771   :  { %2756 = vmatpush.bf16.msra.mxu1 %v3530_v54  ;;  %v4196_v28 = vld [vmem:[#allocation2 + $0x104] sm:$0xf]  ;;  %v3607_v12 = vld [vmem:[#allocation2 + $0x110] sm:$0xf0]  ;;  %v3482_v19 = vor.u32 %v4164_v33, %v3479_v53  ;;  %v3582_v54 = vor.u32 %v4191_v8, %v3581_v62  ;;  %v3565_v29 = vld [vmem:[#allocation2 + $0xa8] sm:$0xf] }
0x1772   :  { %2769 = vmatpush.bf16.msrb.mxu3 %v3658_v43  ;;  %v4228_v16 = vld [vmem:[#allocation2 + $0x204] sm:$0xf]  ;;  %v3735_v57 = vld [vmem:[#allocation2 + $0x210] sm:$0xf0]  ;;  %v3610_v52 = vor.u32 %v4196_v28, %v3607_v12  ;;  %v3710_v43 = vor.u32 %v4223_v7, %v3709_v25  ;;  %v4187_v35 = vld [vmem:[#allocation2 + $0xb4] sm:$0xf0] }
0x1773   :  { %2782 = vmatpush.bf16.msrb.mxu0 %v3786_v55  ;;  %v4260_v46 = vld [vmem:[#allocation2 + $0x304] sm:$0xf]  ;;  %v3863_v40 = vld [vmem:[#allocation2 + $0x310] sm:$0xf0]  ;;  %v3738_v0 = vor.u32 %v4228_v16, %v3735_v57  ;;  %v3838_v55 = vor.u32 %v4255_v27, %v3837_v38  ;;  %v3693_v24 = vld [vmem:[#allocation2 + $0x1a8] sm:$0xf] }
0x1774   :  { %2795 = vmatpush.bf16.msrb.mxu2 %v3914_v30  ;;  %v3866_v60 = vor.u32 %v4260_v46, %v3863_v40  ;;  %v3966_v30 = vor.u32 %v4287_v21, %v3965_v51  ;;  %v4219_v31 = vld [vmem:[#allocation2 + $0x1b4] sm:$0xf0]  ;;  %v3821_v58 = vld [vmem:[#allocation2 + $0x2a8] sm:$0xf] }
0x1775   :  { %2757 = vmatpush.bf16.msra.mxu1 %v3514_v59  ;;  %v4251_v63 = vld [vmem:[#allocation2 + $0x2b4] sm:$0xf0]  ;;  %v3949_v34 = vld [vmem:[#allocation2 + $0x3a8] sm:$0xf]  ;;  %v3566_v59 = vor.u32 %v4187_v35, %v3565_v29 }
0x1776   :  { %2770 = vmatpush.bf16.msrb.mxu3 %v3642_v61  ;;  %v4283_v26 = vld [vmem:[#allocation2 + $0x3b4] sm:$0xf0]  ;;  %v3694_v61 = vor.u32 %v4219_v31, %v3693_v24  ;;  %v3549_v39 = vld [vmem:[#allocation2 + $0x88] sm:$0xf] }
0x1777   :  { %2783 = vmatpush.bf16.msrb.mxu0 %v3770_v2  ;;  %v3822_v2 = vor.u32 %v4251_v63, %v3821_v58  ;;  %v4183_v5 = vld [vmem:[#allocation2 + $0x94] sm:$0xf0]  ;;  %v3677_v6 = vld [vmem:[#allocation2 + $0x188] sm:$0xf] }
0x1778   :  { %2796 = vmatpush.bf16.msrb.mxu2 %v3898_v42  ;;  %v3950_v42 = vor.u32 %v4283_v26, %v3949_v34  ;;  %v4215_v47 = vld [vmem:[#allocation2 + $0x194] sm:$0xf0]  ;;  %v3805_v11 = vld [vmem:[#allocation2 + $0x288] sm:$0xf] }
0x1779   :  { %2758 = vmatpush.bf16.msra.mxu1 %v3498_v15  ;;  %v4247_v14 = vld [vmem:[#allocation2 + $0x294] sm:$0xf0]  ;;  %v3933_v17 = vld [vmem:[#allocation2 + $0x388] sm:$0xf]  ;;  %v3550_v15 = vor.u32 %v4183_v5, %v3549_v39  ;;  %v3678_v33 = vor.u32 %v4215_v47, %v3677_v6  ;;  %v3727_v5 = vld [vmem:[#allocation2 + $0x1f8] sm:$0xf0] }
0x177a   :  { %2771 = vmatpush.bf16.msrb.mxu3 %v3626_v37  ;;  %v4279_v4 = vld [vmem:[#allocation2 + $0x394] sm:$0xf0]  ;;  %v3806_v53 = vor.u32 %v4247_v14, %v3805_v11  ;;  %v3533_v37 = vld [vmem:[#allocation2 + $0x68] sm:$0xf]  ;;  %v4257_v6 = vld [vmem:[#allocation2 + $0x2ec] sm:$0xf] }
0x177b   :  { %2784 = vmatpush.bf16.msrb.mxu0 %v3754_v22  ;;  %v4179_v22 = vld [vmem:[#allocation2 + $0x74] sm:$0xf0]  ;;  %v3661_v28 = vld [vmem:[#allocation2 + $0x168] sm:$0xf]  ;;  %v3934_v12 = vor.u32 %v4279_v4, %v3933_v17  ;;  %v4289_v14 = vld [vmem:[#allocation2 + $0x3ec] sm:$0xf] }
0x177c   :  { %2797 = vmatpush.bf16.msrb.mxu2 %v3882_v13  ;;  %v4211_v16 = vld [vmem:[#allocation2 + $0x174] sm:$0xf0]  ;;  %v3789_v13 = vld [vmem:[#allocation2 + $0x268] sm:$0xf]  ;;  %v3534_v49 = vor.u32 %v4179_v22, %v3533_v37  ;;  %v3983_v17 = vld [vmem:[#allocation2 + $0x3f8] sm:$0xf0] }
0x177d   :  { %2759 = vmatpush.bf16.msra.mxu1 %v3482_v19  ;;  %v4243_v57 = vld [vmem:[#allocation2 + $0x274] sm:$0xf0]  ;;  %v3917_v46 = vld [vmem:[#allocation2 + $0x368] sm:$0xf]  ;;  %v3662_v44 = vor.u32 %v4211_v16, %v3661_v28  ;;  %v4189_v37 = vld [vmem:[#allocation2 + $0xcc] sm:$0xf] }
0x177e   :  { %2772 = vmatpush.bf16.msrb.mxu3 %v3610_v52  ;;  %v4275_v40 = vld [vmem:[#allocation2 + $0x374] sm:$0xf0]  ;;  %v3790_v1 = vor.u32 %v4243_v57, %v3789_v13  ;;  %v3517_v19 = vld [vmem:[#allocation2 + $0x48] sm:$0xf]  ;;  %v3583_v22 = vld [vmem:[#allocation2 + $0xd8] sm:$0xf0] }
0x177f   :  { %2785 = vmatpush.bf16.msrb.mxu0 %v3738_v0  ;;  %v4175_v9 = vld [vmem:[#allocation2 + $0x54] sm:$0xf0]  ;;  %v3645_v41 = vld [vmem:[#allocation2 + $0x148] sm:$0xf]  ;;  %v3918_v3 = vor.u32 %v4275_v40, %v3917_v46  ;;  %v4221_v28 = vld [vmem:[#allocation2 + $0x1cc] sm:$0xf] }
0x1780   :  { %2798 = vmatpush.bf16.msrb.mxu2 %v3866_v60  ;;  %2760 = vmatmul.bf16.vlgmr.msra.gmra.mxu1 %v5796_v50  ;;  %v4207_v52 = vld [vmem:[#allocation2 + $0x154] sm:$0xf0]  ;;  %v3773_v0 = vld [vmem:[#allocation2 + $0x248] sm:$0xf]  ;;  %v3711_v16 = vld [vmem:[#allocation2 + $0x1d8] sm:$0xf0] }
0x1781   :  { %2804 = vmatpush.bf16.msrb.mxu1 %v3598_v20  ;;  %2773 = vmatmul.bf16.vlgmr.msrb.gmra.mxu3 %v5792_v56  ;;  %v4239_v36 = vld [vmem:[#allocation2 + $0x254] sm:$0xf0]  ;;  %v3901_v48 = vld [vmem:[#allocation2 + $0x348] sm:$0xf]  ;;  %v3518_v20 = vor.u32 %v4175_v9, %v3517_v19  ;;  %v4253_v13 = vld [vmem:[#allocation2 + $0x2cc] sm:$0xf] }
0x1782   :  { %2817 = vmatpush.bf16.msra.mxu3 %v3726_v23  ;;  %2786 = vmatmul.bf16.vlgmr.msrb.gmra.mxu0 %v5804_v45  ;;  %v4271_v60 = vld [vmem:[#allocation2 + $0x354] sm:$0xf0]  ;;  %v3646_v23 = vor.u32 %v4207_v52, %v3645_v41  ;;  %v3501_v62 = vld [vmem:[#allocation2 + $0x28] sm:$0xf]  ;;  %v3839_v57 = vld [vmem:[#allocation2 + $0x2d8] sm:$0xf0] }
0x1783   :  { %2830 = vmatpush.bf16.msra.mxu0 %v3854_v10  ;;  %2799 = vmatmul.bf16.vlgmr.msrb.gmra.mxu2 %v5800_v18  ;;  %v3774_v10 = vor.u32 %v4239_v36, %v3773_v0  ;;  %v4171_v8 = vld [vmem:[#allocation2 + $0x34] sm:$0xf0]  ;;  %v3629_v25 = vld [vmem:[#allocation2 + $0x128] sm:$0xf]  ;;  %v4285_v46 = vld [vmem:[#allocation2 + $0x3cc] sm:$0xf] }
0x1784   :  { %2843 = vmatpush.bf16.msra.mxu2 %v3982_v32  ;;  %v3902_v32 = vor.u32 %v4271_v60, %v3901_v48  ;;  %v4203_v7 = vld [vmem:[#allocation2 + $0x134] sm:$0xf0]  ;;  %v3757_v38 = vld [vmem:[#allocation2 + $0x228] sm:$0xf]  ;;  %v3967_v40 = vld [vmem:[#allocation2 + $0x3d8] sm:$0xf0] }
0x1785   :  { %2805 = vmatpush.bf16.msrb.mxu1 %v3582_v54  ;;  %v4235_v27 = vld [vmem:[#allocation2 + $0x234] sm:$0xf0]  ;;  %v3885_v51 = vld [vmem:[#allocation2 + $0x328] sm:$0xf]  ;;  %v3502_v54 = vor.u32 %v4171_v8, %v3501_v62  ;;  %v3630_v29 = vor.u32 %v4203_v7, %v3629_v25  ;;  %v4185_v19 = vld [vmem:[#allocation2 + $0xac] sm:$0xf] }
0x1786   :  { %2818 = vmatpush.bf16.msra.mxu3 %v3710_v43  ;;  %v4267_v21 = vld [vmem:[#allocation2 + $0x334] sm:$0xf0]  ;;  %v3485_v43 = vld [vmem:[#allocation2 + $0x8] sm:$0xf]  ;;  %v3758_v35 = vor.u32 %v4235_v27, %v3757_v38  ;;  %v3567_v9 = vld [vmem:[#allocation2 + $0xb8] sm:$0xf0] }
0x1787   :  { %2831 = vmatpush.bf16.msra.mxu0 %v3838_v55  ;;  %v4167_v55 = vld [vmem:[#allocation2 + $0x14] sm:$0xf0]  ;;  %v3613_v24 = vld [vmem:[#allocation2 + $0x108] sm:$0xf]  ;;  %v3886_v58 = vor.u32 %v4267_v21, %v3885_v51  ;;  %v4217_v41 = vld [vmem:[#allocation2 + $0x1ac] sm:$0xf] }
0x1788   :  { %2844 = vmatpush.bf16.msra.mxu2 %v3966_v30  ;;  %v4199_v30 = vld [vmem:[#allocation2 + $0x114] sm:$0xf0]  ;;  %v3741_v31 = vld [vmem:[#allocation2 + $0x208] sm:$0xf]  ;;  %v3486_v39 = vor.u32 %v4167_v55, %v3485_v43  ;;  %v3695_v52 = vld [vmem:[#allocation2 + $0x1b8] sm:$0xf0] }
0x1789   :  { %2806 = vmatpush.bf16.msrb.mxu1 %v3566_v59  ;;  %v4231_v63 = vld [vmem:[#allocation2 + $0x214] sm:$0xf0]  ;;  %v3869_v34 = vld [vmem:[#allocation2 + $0x308] sm:$0xf]  ;;  %v4193_v59 = vld [vmem:[#allocation2 + $0xec] sm:$0xf]  ;;  %v3614_v47 = vor.u32 %v4199_v30, %v3613_v24 }
0x178a   :  { %2819 = vmatpush.bf16.msra.mxu3 %v3694_v61  ;;  %v4263_v26 = vld [vmem:[#allocation2 + $0x314] sm:$0xf0]  ;;  %v3599_v61 = vld [vmem:[#allocation2 + $0xf8] sm:$0xf0]  ;;  %v3742_v11 = vor.u32 %v4231_v63, %v3741_v31  ;;  %v4249_v0 = vld [vmem:[#allocation2 + $0x2ac] sm:$0xf] }
0x178b   :  { %2832 = vmatpush.bf16.msra.mxu0 %v3822_v2  ;;  %v4225_v2 = vld [vmem:[#allocation2 + $0x1ec] sm:$0xf]  ;;  %v3870_v4 = vor.u32 %v4263_v26, %v3869_v34  ;;  %v3823_v36 = vld [vmem:[#allocation2 + $0x2b8] sm:$0xf0] }
0x178c   :  { %2845 = vmatpush.bf16.msra.mxu2 %v3950_v42  ;;  %v3855_v42 = vld [vmem:[#allocation2 + $0x2f8] sm:$0xf0]  ;;  %v4281_v48 = vld [vmem:[#allocation2 + $0x3ac] sm:$0xf] }
0x178d   :  { %2807 = vmatpush.bf16.msrb.mxu1 %v3550_v15  ;;  %v3602_v15 = vor.u32 %v4193_v59, %v3599_v61  ;;  %v3951_v60 = vld [vmem:[#allocation2 + $0x3b8] sm:$0xf0]  ;;  %v4181_v62 = vld [vmem:[#allocation2 + $0x8c] sm:$0xf] }
0x178e   :  { %2820 = vmatpush.bf16.msra.mxu3 %v3678_v33  ;;  %v3730_v33 = vor.u32 %v4225_v2, %v3727_v5  ;;  %v3551_v8 = vld [vmem:[#allocation2 + $0x98] sm:$0xf0]  ;;  %v4213_v25 = vld [vmem:[#allocation2 + $0x18c] sm:$0xf] }
0x178f   :  { %2833 = vmatpush.bf16.msra.mxu0 %v3806_v53  ;;  %v3858_v53 = vor.u32 %v4257_v6, %v3855_v42  ;;  %v3679_v7 = vld [vmem:[#allocation2 + $0x198] sm:$0xf0]  ;;  %v4245_v38 = vld [vmem:[#allocation2 + $0x28c] sm:$0xf] }
0x1790   :  { %2846 = vmatpush.bf16.msra.mxu2 %v3934_v12  ;;  %v3986_v12 = vor.u32 %v4289_v14, %v3983_v17  ;;  %v3807_v27 = vld [vmem:[#allocation2 + $0x298] sm:$0xf0]  ;;  %v4277_v51 = vld [vmem:[#allocation2 + $0x38c] sm:$0xf]  ;;  %v3682_v43 = vor.u32 %v4213_v25, %v3679_v7 }
0x1791   :  { %2808 = vmatpush.bf16.msrb.mxu1 %v3534_v49  ;;  %v3586_v49 = vor.u32 %v4189_v37, %v3583_v22  ;;  %v3935_v21 = vld [vmem:[#allocation2 + $0x398] sm:$0xf0]  ;;  %v3810_v55 = vor.u32 %v4245_v38, %v3807_v27  ;;  %v4209_v24 = vld [vmem:[#allocation2 + $0x16c] sm:$0xf]  ;;  %v4306_v38 = vld [vmem:[#allocation4 + $0x70] sm:$0xff] }
0x1792   :  { %2821 = vmatpush.bf16.msra.mxu3 %v3662_v44  ;;  %v3714_v44 = vor.u32 %v4221_v28, %v3711_v16  ;;  %v3938_v30 = vor.u32 %v4277_v51, %v3935_v21  ;;  %v3663_v31 = vld [vmem:[#allocation2 + $0x178] sm:$0xf0]  ;;  %v4273_v34 = vld [vmem:[#allocation2 + $0x36c] sm:$0xf]  ;;  %v4296_v27 = vld [vmem:[#allocation4 + $0x20] sm:$0xff] }
0x1793   :  { %2834 = vmatpush.bf16.msra.mxu0 %v3790_v1  ;;  %v3842_v1 = vor.u32 %v4253_v13, %v3839_v57  ;;  %v3791_v63 = vld [vmem:[#allocation2 + $0x278] sm:$0xf0]  ;;  %v3666_v61 = vor.u32 %v4209_v24, %v3663_v31  ;;  %v4205_v6 = vld [vmem:[#allocation2 + $0x14c] sm:$0xf] }
0x1794   :  { %2847 = vmatpush.bf16.msra.mxu2 %v3918_v3  ;;  %v3970_v3 = vor.u32 %v4285_v46, %v3967_v40  ;;  %v3919_v26 = vld [vmem:[#allocation2 + $0x378] sm:$0xf0]  ;;  %v4269_v17 = vld [vmem:[#allocation2 + $0x34c] sm:$0xf] }
0x1795   :  { %2809 = vmatpush.bf16.msrb.mxu1 %v3518_v20  ;;  %v3570_v20 = vor.u32 %v4185_v19, %v3567_v9  ;;  %v3519_v5 = vld [vmem:[#allocation2 + $0x58] sm:$0xf0]  ;;  %v3922_v42 = vor.u32 %v4273_v34, %v3919_v26  ;;  %v4169_v37 = vld [vmem:[#allocation2 + $0x2c] sm:$0xf] }
0x1796   :  { %2822 = vmatpush.bf16.msra.mxu3 %v3646_v23  ;;  %v3698_v23 = vor.u32 %v4217_v41, %v3695_v52  ;;  %v3775_v14 = vld [vmem:[#allocation2 + $0x258] sm:$0xf0]  ;;  %v4201_v28 = vld [vmem:[#allocation2 + $0x12c] sm:$0xf] }
0x1797   :  { %2835 = vmatpush.bf16.msra.mxu0 %v3774_v10  ;;  %v3826_v10 = vor.u32 %v4249_v0, %v3823_v36  ;;  %v3503_v22 = vld [vmem:[#allocation2 + $0x38] sm:$0xf0]  ;;  %v4233_v13 = vld [vmem:[#allocation2 + $0x22c] sm:$0xf] }
0x1798   :  { %2848 = vmatpush.bf16.msra.mxu2 %v3902_v32  ;;  %v3954_v32 = vor.u32 %v4281_v48, %v3951_v60  ;;  %v3631_v16 = vld [vmem:[#allocation2 + $0x138] sm:$0xf0]  ;;  %v4265_v46 = vld [vmem:[#allocation2 + $0x32c] sm:$0xf] }
0x1799   :  { %2810 = vmatpush.bf16.msrb.mxu1 %v3502_v54  ;;  %v3554_v54 = vor.u32 %v4181_v62, %v3551_v8  ;;  %v3759_v57 = vld [vmem:[#allocation2 + $0x238] sm:$0xf0]  ;;  %v4165_v19 = vld [vmem:[#allocation2 + $0xc] sm:$0xf] }
0x179a   :  { %2823 = vmatpush.bf16.msra.mxu3 %v3630_v29  ;;  %v4177_v29 = vld [vmem:[#allocation2 + $0x6c] sm:$0xf]  ;;  %v3887_v40 = vld [vmem:[#allocation2 + $0x338] sm:$0xf0] }
0x179b   :  { %2836 = vmatpush.bf16.msra.mxu0 %v3758_v35  ;;  %v3535_v35 = vld [vmem:[#allocation2 + $0x78] sm:$0xf0]  ;;  %v4197_v41 = vld [vmem:[#allocation2 + $0x10c] sm:$0xf] }
0x179c   :  { %2849 = vmatpush.bf16.msra.mxu2 %v3886_v58  ;;  %v4241_v58 = vld [vmem:[#allocation2 + $0x26c] sm:$0xf]  ;;  %v3538_v59 = vor.u32 %v4177_v29, %v3535_v35  ;;  %v3487_v9 = vld [vmem:[#allocation2 + $0x18] sm:$0xf0]  ;;  %v4302_v29 = vld [vmem:[#allocation4 + $0x50] sm:$0xff] }
0x179d   :  { %2811 = vmatpush.bf16.msrb.mxu1 %v3486_v39  ;;  %v3794_v2 = vor.u32 %v4241_v58, %v3791_v63  ;;  %v4173_v39 = vld [vmem:[#allocation2 + $0x4c] sm:$0xf]  ;;  %v3615_v52 = vld [vmem:[#allocation2 + $0x118] sm:$0xf0] }
0x179e   :  { %2824 = vmatpush.bf16.msra.mxu3 %v3614_v47  ;;  %v3647_v47 = vld [vmem:[#allocation2 + $0x158] sm:$0xf0]  ;;  %v4229_v0 = vld [vmem:[#allocation2 + $0x20c] sm:$0xf] }
0x179f   :  { %2837 = vmatpush.bf16.msra.mxu0 %v3742_v11  ;;  %v4237_v11 = vld [vmem:[#allocation2 + $0x24c] sm:$0xf]  ;;  %v3743_v36 = vld [vmem:[#allocation2 + $0x218] sm:$0xf0] }
0x17a0   :  { %2850 = vmatpush.bf16.msra.mxu2 %v3870_v4  ;;  %2812 = vmatmul.bf16.vlgmr.msrb.gmra.mxu1 %v5796_v50  ;;  %v3903_v4 = vld [vmem:[#allocation2 + $0x358] sm:$0xf0]  ;;  %v4261_v48 = vld [vmem:[#allocation2 + $0x30c] sm:$0xf] }
0x17a1   :  { %2856 = vmatpush.bf16.msra.mxu1 %v3602_v15  ;;  %2825 = vmatmul.bf16.vlgmr.msra.gmra.mxu3 %v5792_v56  ;;  %v3522_v15 = vor.u32 %v4173_v39, %v3519_v5  ;;  %v3871_v60 = vld [vmem:[#allocation2 + $0x318] sm:$0xf0]  ;;  %v4297_v7 = vld [vmem:[#allocation4 + $0x28] sm:$0xff]  ;;  %v4300_v39 = vld [vmem:[#allocation4 + $0x40] sm:$0xff] }
0x17a2   :  { %2869 = vmatpush.bf16.msrb.mxu3 %v3730_v33  ;;  %2838 = vmatmul.bf16.vlgmr.msra.gmra.mxu0 %v5804_v45  ;;  %v3650_v33 = vor.u32 %v4205_v6, %v3647_v47  ;;  %v3874_v62 = vor.u32 %v4261_v48, %v3871_v60  ;;  %v4299_v8 = vld [vmem:[#allocation4 + $0x38] sm:$0xff]  ;;  %v4305_v21 = vld [vmem:[#allocation4 + $0x68] sm:$0xff]  ;;  %v4318_v60 = vld [vmem:[#allocation4 + $0xd0] sm:$0xff] }
0x17a3   :  { %2882 = vmatpush.bf16.msrb.mxu0 %v3858_v53  ;;  %2851 = vmatmul.bf16.vlgmr.msra.gmra.mxu2 %v5800_v18  ;;  %v3778_v53 = vor.u32 %v4237_v11, %v3775_v14  ;;  %v4307_v25 = vld [vmem:[#allocation4 + $0x78] sm:$0xff]  ;;  %v4301_v34 = vld [vmem:[#allocation4 + $0x48] sm:$0xff] }
0x17a4   :  { %2895 = vmatpush.bf16.msrb.mxu2 %v3986_v12  ;;  %v3906_v12 = vor.u32 %v4269_v17, %v3903_v4  ;;  %v4295_v51 = vld [vmem:[#allocation4 + $0x18] sm:$0xff]  ;;  %v4313_v14 = vld [vmem:[#allocation4 + $0xa8] sm:$0xff]  ;;  %v4312_v17 = vld [vmem:[#allocation4 + $0xa0] sm:$0xff] }
0x17a5   :  { %2857 = vmatpush.bf16.msra.mxu1 %v3586_v49  ;;  %v3506_v49 = vor.u32 %v4169_v37, %v3503_v22  ;;  %v4315_v5 = vld [vmem:[#allocation4 + $0xb8] sm:$0xff] }
0x17a6   :  { %2870 = vmatpush.bf16.msrb.mxu3 %v3714_v44  ;;  %v3634_v44 = vor.u32 %v4201_v28, %v3631_v16  ;;  %v4311_v4 = vld [vmem:[#allocation4 + $0x98] sm:$0xff] }
0x17a7   :  { %2883 = vmatpush.bf16.msrb.mxu0 %v3842_v1  ;;  %v3762_v1 = vor.u32 %v4233_v13, %v3759_v57 }
0x17a8   :  { %2896 = vmatpush.bf16.msrb.mxu2 %v3970_v3  ;;  %v3890_v3 = vor.u32 %v4265_v46, %v3887_v40 }
0x17a9   :  { %2858 = vmatpush.bf16.msra.mxu1 %v3570_v20  ;;  %v3490_v20 = vor.u32 %v4165_v19, %v3487_v9  ;;  %v4322_v9 = vld [vmem:[#allocation4 + $0xf0] sm:$0xff] }
0x17aa   :  { %2871 = vmatpush.bf16.msrb.mxu3 %v3698_v23  ;;  %v3618_v23 = vor.u32 %v4197_v41, %v3615_v52  ;;  %v4321_v52 = vld [vmem:[#allocation4 + $0xe8] sm:$0xff] }
0x17ab   :  { %2884 = vmatpush.bf16.msrb.mxu0 %v3826_v10  ;;  %v3746_v10 = vor.u32 %v4229_v0, %v3743_v36  ;;  %v4320_v0 = vld [vmem:[#allocation4 + $0xe0] sm:$0xff]  ;;  %v4319_v36 = vld [vmem:[#allocation4 + $0xd8] sm:$0xff] }
0x17ac   :  { %2897 = vmatpush.bf16.msrb.mxu2 %v3954_v32  ;;  %v4298_v32 = vld [vmem:[#allocation4 + $0x30] sm:$0xff] }
0x17ad   :  { %2859 = vmatpush.bf16.msra.mxu1 %v3554_v54  ;;  %v4294_v54 = vld [vmem:[#allocation4 + $0x10] sm:$0xff] }
0x17ae   :  { %2872 = vmatpush.bf16.msrb.mxu3 %v3682_v43  ;;  %v4303_v43 = vld [vmem:[#allocation4 + $0x58] sm:$0xff] }
0x17af   :  { %2885 = vmatpush.bf16.msrb.mxu0 %v3810_v55 }
0x17b0   :  { %2898 = vmatpush.bf16.msrb.mxu2 %v3938_v30 }
0x17b1   :  { %2860 = vmatpush.bf16.msra.mxu1 %v3538_v59 }
0x17b2   :  { %2873 = vmatpush.bf16.msrb.mxu3 %v3666_v61 }
0x17b3   :  { %2886 = vmatpush.bf16.msrb.mxu0 %v3794_v2 }
0x17b4   :  { %2899 = vmatpush.bf16.msrb.mxu2 %v3922_v42  ;;  %v4314_v42 = vld [vmem:[#allocation4 + $0xb0] sm:$0xff] }
0x17b5   :  { %2861 = vmatpush.bf16.msra.mxu1 %v3522_v15 }
0x17b6   :  { %2874 = vmatpush.bf16.msrb.mxu3 %v3650_v33  ;;  %v4310_v33 = vld [vmem:[#allocation4 + $0x90] sm:$0xff] }
0x17b7   :  { %2887 = vmatpush.bf16.msrb.mxu0 %v3778_v53 }
0x17b8   :  { %2900 = vmatpush.bf16.msrb.mxu2 %v3906_v12  ;;  %v4309_v12 = vld [vmem:[#allocation4 + $0x88] sm:$0xff] }
0x17b9   :  { %2862 = vmatpush.bf16.msra.mxu1 %v3506_v49  ;;  %v4308_v49 = vld [vmem:[#allocation4 + $0x80] sm:$0xff] }
0x17ba   :  { %2875 = vmatpush.bf16.msrb.mxu3 %v3634_v44 }
0x17bb   :  { %2888 = vmatpush.bf16.msrb.mxu0 %v3762_v1  ;;  %v4323_v1 = vld [vmem:[#allocation4 + $0xf8] sm:$0xff] }
0x17bc   :  { %2901 = vmatpush.bf16.msrb.mxu2 %v3890_v3 }
0x17bd   :  { %2863 = vmatpush.bf16.msra.mxu1 %v3490_v20 }
0x17be   :  { %2876 = vmatpush.bf16.msrb.mxu3 %v3618_v23 }
0x17bf   :  { %2889 = vmatpush.bf16.msrb.mxu0 %v3746_v10 }
0x17c0   :  { %2902 = vmatpush.bf16.msrb.mxu2 %v3874_v62  ;;  %2864 = vmatmul.bf16.vlgmr.msra.gmra.mxu1 %v5796_v50  ;;  %v4304_v50 = vld [vmem:[#allocation4 + $0x60] sm:$0xff]  ;;  %v4317_v62 = vld [vmem:[#allocation4 + $0xc8] sm:$0xff] }
0x17c1   :  { %3170 = vmatpush.bf16.msrb.mxu1 %v4299_v8  ;;  %2877 = vmatmul.bf16.vlgmr.msrb.gmra.mxu3 %v5792_v56  ;;  %v4293_v56 = vld [vmem:[#allocation4 + $0x8] sm:$0xff] }
0x17c2   :  { %3183 = vmatpush.bf16.msra.mxu3 %v4307_v25  ;;  %2890 = vmatmul.bf16.vlgmr.msrb.gmra.mxu0 %v5804_v45  ;;  %v5825_v45 = vld [vmem:[%s5841_s4 + $0x1] ss:$4 sm:$0xf] }
0x17c3   :  { %2903 = vmatmul.bf16.vlgmr.msrb.gmra.mxu2 %v5800_v18  ;;  %v4292_v18 = vld [vmem:[#allocation4] sm:$0xff]  ;;  %v2052_v55 = vperm.slane %v5825_v45, 0  ;;  %3196 = vmatpush.bf16.msra.mxu0 %v4315_v5  ;;  %v2053_v15 = vperm.slane %v5825_v45, 1  ;;  %v2054_v48 = vperm.slane %v5825_v45, 2 }
0x17c4   :  { %3209 = vmatpush.bf16.msra.mxu2 %v4323_v1 }
0x17c5   :  { %3171 = vmatpush.bf16.msrb.mxu1 %v4298_v32 }
0x17c6   :  { %3184 = vmatpush.bf16.msra.mxu3 %v4306_v38 }
0x17c7   :  { %3197 = vmatpush.bf16.msra.mxu0 %v4314_v42 }
0x17c8   :  { %3210 = vmatpush.bf16.msra.mxu2 %v4322_v9 }
0x17c9   :  { %3172 = vmatpush.bf16.msrb.mxu1 %v4297_v7 }
0x17ca   :  { %3185 = vmatpush.bf16.msra.mxu3 %v4305_v21 }
0x17cb   :  { %3198 = vmatpush.bf16.msra.mxu0 %v4313_v14 }
0x17cc   :  { %3211 = vmatpush.bf16.msra.mxu2 %v4321_v52 }
0x17cd   :  { %3173 = vmatpush.bf16.msrb.mxu1 %v4296_v27  ;;  %v4316_v27 = vld [vmem:[#allocation4 + $0xc0] sm:$0xff] }
0x17ce   :  { %3186 = vmatpush.bf16.msra.mxu3 %v4304_v50 }
0x17cf   :  { %3199 = vmatpush.bf16.msra.mxu0 %v4312_v17 }
0x17d0   :  { %3212 = vmatpush.bf16.msra.mxu2 %v4320_v0 }
0x17d1   :  { %3174 = vmatpush.bf16.msrb.mxu1 %v4295_v51 }
0x17d2   :  { %3187 = vmatpush.bf16.msra.mxu3 %v4303_v43  ;;  %v2055_v43 = vperm.slane %v5825_v45, 3 }
0x17d3   :  { %3200 = vmatpush.bf16.msra.mxu0 %v4311_v4 }
0x17d4   :  { %3213 = vmatpush.bf16.msra.mxu2 %v4319_v36 }
0x17d5   :  { %3175 = vmatpush.bf16.msrb.mxu1 %v4294_v54 }
0x17d6   :  { %3188 = vmatpush.bf16.msra.mxu3 %v4302_v29 }
0x17d7   :  { %3201 = vmatpush.bf16.msra.mxu0 %v4310_v33 }
0x17d8   :  { %3214 = vmatpush.bf16.msra.mxu2 %v4318_v60 }
0x17d9   :  { %3176 = vmatpush.bf16.msrb.mxu1 %v4293_v56 }
0x17da   :  { %3189 = vmatpush.bf16.msra.mxu3 %v4301_v34 }
0x17db   :  { %3202 = vmatpush.bf16.msra.mxu0 %v4309_v12 }
0x17dc   :  { %3215 = vmatpush.bf16.msra.mxu2 %v4317_v62 }
0x17dd   :  { %3177 = vmatpush.bf16.msrb.mxu1 %v4292_v18  ;;  %v2709_v35 = vpop.f32.mrf.mxu1 }
0x17de   :  { %v2710_v30 = vadd.f32 %v2709_v35, %v2052_v55  ;;  %3190 = vmatpush.bf16.msra.mxu3 %v4300_v39 }
0x17df   :  { %v2735_v24 = vpop.f32.mrf.mxu0  ;;  %3203 = vmatpush.bf16.msra.mxu0 %v4308_v49 }
0x17e0   :  { %3216 = vmatpush.bf16.msra.mxu2 %v4316_v27 }
0x17e4   :  { %v2722_v31 = vpop.f32.mrf.mxu3 }
0x17e5   :  { %v2723_v58 = vadd.f32 %v2722_v31, %v2710_v30  ;;  %v2711_v59 = vpop.f32.mrf.mxu1 }
0x17e6   :  { %v2748_v63 = vpop.f32.mrf.mxu2 }
0x17e7   :  { %v2736_v26 = vadd.f32 %v2735_v24, %v2723_v58  ;;  %v2737_v61 = vpop.f32.mrf.mxu0 }
0x17e9   :  { %v2749_v2 = vadd.f32 %v2748_v63, %v2736_v26 }
0x17eb   :  { %v2908_v6 = vpack.c.bf16 %v2749_v2, %v2749_v2 }
0x17ec   :  { %v2724_v47 = vpop.f32.mrf.mxu3 }
0x17ed   :  { %3178 = vmatmul.bf16.vlgmr.msrb.gmra.mxu1 %v2908_v6  ;;  %v4422_v47 = vld [vmem:[%s5841_s4 + $0x2] ss:$0 sm:$0xff] }
0x17ee   :  { %v2750_v11 = vpop.f32.mrf.mxu2 }
0x17fd   :  { %v2761_v53 = vpop.f32.mrf.mxu1 }
0x17fe   :  { %v2762_v22 = vadd.f32 %v2761_v53, %v2053_v15 }
0x17ff   :  { %v2787_v37 = vpop.f32.mrf.mxu0 }
0x1804   :  { %v2774_v28 = vpop.f32.mrf.mxu3 }
0x1805   :  { %v2775_v16 = vadd.f32 %v2774_v28, %v2762_v22  ;;  %v2763_v46 = vpop.f32.mrf.mxu1 }
0x1806   :  { %v2800_v13 = vpop.f32.mrf.mxu2 }
0x1807   :  { %v2788_v57 = vadd.f32 %v2787_v37, %v2775_v16  ;;  %v2789_v40 = vpop.f32.mrf.mxu0 }
0x1809   :  { %v2801_v44 = vadd.f32 %v2800_v13, %v2788_v57 }
0x180b   :  { %v2909_v19 = vpack.c.bf16 %v2801_v44, %v2801_v44 }
0x180c   :  { %v2776_v41 = vpop.f32.mrf.mxu3 }
0x180d   :  { %3191 = vmatmul.bf16.vlgmr.msra.gmra.mxu3 %v2909_v19 }
0x180e   :  { %v2802_v3 = vpop.f32.mrf.mxu2 }
0x181d   :  { %v2813_v20 = vpop.f32.mrf.mxu1 }
0x181e   :  { %v2814_v10 = vadd.f32 %v2813_v20, %v2054_v48 }
0x181f   :  { %v2839_v23 = vpop.f32.mrf.mxu0 }
0x1824   :  { %v2826_v8 = vpop.f32.mrf.mxu3 }
0x1825   :  { %v2827_v25 = vadd.f32 %v2826_v8, %v2814_v10  ;;  %v2815_v38 = vpop.f32.mrf.mxu1 }
0x1826   :  { %v2852_v32 = vpop.f32.mrf.mxu2 }
0x1827   :  { %v2840_v7 = vadd.f32 %v2839_v23, %v2827_v25  ;;  %v2841_v51 = vpop.f32.mrf.mxu0 }
0x1829   :  { %v2853_v21 = vadd.f32 %v2852_v32, %v2840_v7 }
0x182b   :  { %v2910_v54 = vpack.c.bf16 %v2853_v21, %v2853_v21 }
0x182c   :  { %v2828_v50 = vpop.f32.mrf.mxu3 }
0x182d   :  { %3204 = vmatmul.bf16.vlgmr.msra.gmra.mxu0 %v2910_v54 }
0x182e   :  { %v2854_v56 = vpop.f32.mrf.mxu2 }
0x183d   :  { %v2865_v18 = vpop.f32.mrf.mxu1 }
0x183e   :  { %v2866_v29 = vadd.f32 %v2865_v18, %v2055_v43 }
0x183f   :  { %v2891_v55 = vpop.f32.mrf.mxu0 }
0x1844   :  { %v2878_v35 = vpop.f32.mrf.mxu3 }
0x1845   :  { %v2879_v24 = vadd.f32 %v2878_v35, %v2866_v29  ;;  %v2867_v31 = vpop.f32.mrf.mxu1 }
0x1846   :  { %v2904_v30 = vpop.f32.mrf.mxu2 }
0x1847   :  { %v2893_v58 = vpop.f32.mrf.mxu0  ;;  %v2892_v63 = vadd.f32 %v2891_v55, %v2879_v24 }
0x1849   :  { %v2905_v34 = vadd.f32 %v2904_v30, %v2892_v63 }
0x184b   :  { %v2911_v26 = vpack.c.bf16 %v2905_v34, %v2905_v34 }
0x184c   :  { %v2880_v59 = vpop.f32.mrf.mxu3 }
0x184d   :  { %3217 = vmatmul.bf16.vlgmr.msra.gmra.mxu2 %v2911_v26 }
0x184e   :  { %v2906_v61 = vpop.f32.mrf.mxu2 }
0x186a   :  { %v3179_v2 = vpop.f32.mrf.mxu1 }
0x186b   :  { %v3180_v11 = vadd.f32 %v4422_v47, %v3179_v2 }
0x1872   :  { %v3181_v39 = vpop.f32.mrf.mxu1 }
0x1890   :  { %v3192_v5 = vpop.f32.mrf.mxu3 }
0x1891   :  { %v3193_v14 = vadd.f32 %v3192_v5, %v3180_v11 }
0x1898   :  { %v3194_v6 = vpop.f32.mrf.mxu3 }
0x18aa   :  { %v3205_v42 = vpop.f32.mrf.mxu0 }
0x18ab   :  { %v3206_v17 = vadd.f32 %v3205_v42, %v3193_v14 }
0x18b2   :  { %v3207_v45 = vpop.f32.mrf.mxu0 }
0x18d0   :  { %v3218_v4 = vpop.f32.mrf.mxu2 }
0x18d1   :  { %v3219_v15 = vadd.f32 %v3218_v4, %v3206_v17 }
0x18d3   :  { %3223 = vst.msk [vmem:[#allocation7] sm:$0x3] %vm3222_vm1, %v3219_v15 }
0x18d4   :  { %3234 = dma.vmem_to_hbm [thread:$0]  %s3230_s16, 32, %s3232_s19, [#allocation6]  }
0x18d8   :  { %v3220_v33 = vpop.f32.mrf.mxu2 }
0x18d9   :  { %4499 = dma.done.wait [#allocation6], 32  }
0x18da   :  { %4500 = vsyncadd [#allocation6], 4294967264 }
0x18db   :  { %3239 = vsyncpa [#allocation5], 1 }
0x18dc   :  { %3240 = vsyncpa [#allocation6], 1 }
0x18dd   :  { %3241 = vsyncmov [#allocation3] }
0x18e0   :  { %s3242_s4 = vpop.sfrf %3241 }
0x18e1   :  { %p4115_p0 = scmp.ne.s32.totalorder %s3242_s4, 0 }
0x18e3   :  { %3246 = shalt.err (%p4115_p0)  }

</bundles_post_ra>
